<compile_context>
chip_gen: v7x
topology: tpu7x:2x2x1
jax: 0.10.0
libtpu: 0.0.40
codegen_flags: <defaults>
</compile_context>

<pallas_src>
import functools

import jax
import jax.numpy as jnp
from jax.experimental import pallas as pl
from jax.experimental.pallas import tpu as pltpu

Z_DIM = 128
HIDDEN = (256, 512, 720, 1024)
LANE = 128

# Indices of w3, w4, w5 inside the flat [w1,b1,...,w5,b5] param list.
_ANY_WEIGHT_IDX = (4, 6, 8)


def _round_up(n, m):
    return ((n + m - 1) // m) * m


def _leaky_relu(x, slope=0.2):
    return jnp.where(x > 0, x, slope * x)


def generator_kernel(x_ref,
                     w1_ref, b1_ref,
                     w2_ref, b2_ref,
                     w3_hbm, b3_ref,
                     w4_hbm, b4_ref,
                     w5_hbm, b5_ref,
                     o_ref,
                     w3_v, w4_v, w5_v, dma_sem):
    """Fused 5-layer MLP on one (tile_b, feat) batch tile.

    w1/w2 + biases are pipelined VMEM inputs (constant index_map, resident
    across grid steps).  w3/w4/w5 live in HBM (pl.ANY) and are streamed into
    persistent VMEM scratch at grid step 0, with each wait placed right before
    the dot that needs it so earlier-layer compute hides the stream.
    """
    first_step = pl.program_id(0) == 0

    @pl.when(first_step)
    def _start_weight_streams():
        pltpu.make_async_copy(w3_hbm, w3_v, dma_sem.at[0]).start()
        pltpu.make_async_copy(w4_hbm, w4_v, dma_sem.at[1]).start()
        pltpu.make_async_copy(w5_hbm, w5_v, dma_sem.at[2]).start()

    def linear(h, w, b_ref):
        # bf16 x bf16 on the MXU, f32 accumulation; f32 bias add.
        return jnp.dot(h, w, preferred_element_type=jnp.float32) + b_ref[...]

    h = x_ref[...]                                                # bf16
    h = _leaky_relu(linear(h, w1_ref[...], b1_ref)).astype(jnp.bfloat16)
    h = _leaky_relu(linear(h, w2_ref[...], b2_ref)).astype(jnp.bfloat16)

    @pl.when(first_step)
    def _wait_w3():
        pltpu.make_async_copy(w3_hbm, w3_v, dma_sem.at[0]).wait()
    h = _leaky_relu(linear(h, w3_v[...], b3_ref)).astype(jnp.bfloat16)

    @pl.when(first_step)
    def _wait_w4():
        pltpu.make_async_copy(w4_hbm, w4_v, dma_sem.at[1]).wait()
    h = _leaky_relu(linear(h, w4_v[...], b4_ref)).astype(jnp.bfloat16)

    @pl.when(first_step)
    def _wait_w5():
        pltpu.make_async_copy(w5_hbm, w5_v, dma_sem.at[2]).wait()
    h = jnp.tanh(linear(h, w5_v[...], b5_ref))
    o_ref[...] = h.astype(o_ref.dtype)


@functools.partial(jax.jit, static_argnames=("out_dim",))
def generator_forward(x, padded_params, out_dim):
    """x: (B, Z_DIM) f32.  padded_params: [w1,b1,...,w5,b5] with bf16 weights
    zero-padded to multiples of 128 and f32 (1, out_pad) biases.
    Returns (B, out_dim) f32."""
    batch, z = x.shape
    z_pad = padded_params[0].shape[0]
    out_pad = padded_params[-2].shape[1]

    # Batch tile: up to 512 rows, multiple of 16 (bf16 sublane packing).
    tile_b = max(16, min(512, _round_up((batch + 1) // 2, 16)))
    b_pad = _round_up(batch, tile_b)

    if batch == b_pad and z == z_pad:
        x_pad = x.astype(jnp.bfloat16)            # no pad round trip needed
    else:
        x_pad = jnp.zeros((b_pad, z_pad), jnp.bfloat16).at[:batch, :z].set(
            x.astype(jnp.bfloat16))

    x_spec = pl.BlockSpec((tile_b, z_pad), lambda i: (i, 0))
    param_specs = []
    for idx, p in enumerate(padded_params):
        if idx in _ANY_WEIGHT_IDX:
            # Stays in HBM; copied manually inside the kernel.
            param_specs.append(pl.BlockSpec(memory_space=pl.ANY))
        else:
            # Constant index_map -> DMA'd once, VMEM-resident across steps.
            param_specs.append(pl.BlockSpec(p.shape, lambda i: (0, 0)))
    out_spec = pl.BlockSpec((tile_b, out_pad), lambda i: (i, 0))

    w3p, w4p, w5p = (padded_params[i] for i in _ANY_WEIGHT_IDX)
    scratch_shapes = [
        pltpu.VMEM(w3p.shape, w3p.dtype),
        pltpu.VMEM(w4p.shape, w4p.dtype),
        pltpu.VMEM(w5p.shape, w5p.dtype),
        pltpu.SemaphoreType.DMA((3,)),
    ]

    out = pl.pallas_call(
        generator_kernel,
        out_shape=jax.ShapeDtypeStruct((b_pad, out_pad), jnp.float32),
        grid_spec=pltpu.PrefetchScalarGridSpec(
            num_scalar_prefetch=0,
            grid=(b_pad // tile_b,),
            in_specs=[x_spec] + param_specs,
            out_specs=out_spec,
            scratch_shapes=scratch_shapes,
        ),
        compiler_params=pltpu.CompilerParams(
            # "arbitrary": the step-0 weight load must run exactly once.
            dimension_semantics=("arbitrary",),
            vmem_limit_bytes=32 << 20,
        ),
    )(x_pad, *padded_params)
    return out[:batch, :out_dim]


def init_params(key, z_dim, out_dim):
    """Deterministic f32 init mirroring nn.Linear's U(-1/sqrt(in), 1/sqrt(in)).
    Weights stored as (in, out) == PyTorch weight.T; biases as (1, out)."""
    dims = (z_dim,) + HIDDEN + (out_dim,)
    params = []
    for fan_in, fan_out in zip(dims[:-1], dims[1:]):
        kw, kb, key = jax.random.split(key, 3)
        bound = 1.0 / (fan_in ** 0.5)
        w = jax.random.uniform(kw, (fan_in, fan_out), jnp.float32, -bound, bound)
        b = jax.random.uniform(kb, (1, fan_out), jnp.float32, -bound, bound)
        params += [w, b]
    return params


def prepare_params(params):
    """Zero-pad every layer's (in, out) to multiples of 128 and cast weights
    to bf16.  Padded activation columns stay exactly 0 through LeakyReLU
    (zero-preserving), so the math is unchanged; padded output columns are
    sliced off in generator_forward."""
    padded = []
    for i in range(0, len(params), 2):
        w, b = params[i], params[i + 1]
        fi, fo = w.shape
        fi_p, fo_p = _round_up(fi, LANE), _round_up(fo, LANE)
        w_p = jnp.zeros((fi_p, fo_p), jnp.bfloat16).at[:fi, :fo].set(
            w.astype(jnp.bfloat16))
        b_p = jnp.zeros((1, fo_p), jnp.float32).at[:, :fo].set(b)
        padded += [w_p, b_p]
    return padded


def reference_forward(x, params):
    h = x
    for i in range(0, len(params), 2):
        w, b = params[i], params[i + 1]
        h = jnp.dot(h, w, preferred_element_type=jnp.float32) + b
        if i < len(params) - 2:
            h = jnp.where(h > 0, h, 0.2 * h)
        else:
            h = jnp.tanh(h)
    return h


if __name__ == "__main__":
    key = jax.random.PRNGKey(0)
    k_x, k_p = jax.random.split(key)

    batch = 32           # -> tile_b=16, 2 grid steps (exercises the step-0 gating)
    out_dim = 784        # 28x28 image flattened

    x = jax.random.normal(k_x, (batch, Z_DIM), jnp.float32)
    params = init_params(k_p, Z_DIM, out_dim)          # f32 reference params
    padded_params = prepare_params(params)             # bf16, 128-aligned

    out = generator_forward(x, padded_params, out_dim)
    out = jax.block_until_ready(out)

    ref = reference_forward(x, params)
    assert out.shape == (batch, out_dim), out.shape
    # bf16 weights/activations (deliberate choice) -> loose tolerance vs f32 ref.
    max_err = float(jnp.max(jnp.abs(out - ref)))
    assert jnp.allclose(out, ref, atol=5e-2, rtol=5e-2), max_err
    print("KERNEL_OK")
</pallas_src>

<mosaic_0001>
module attributes {stable_mosaic.version = 11 : i64} {
  func.func @generator_kernel(%arg0: i32, %arg1: memref<16x128xbf16, #tpu.memory_space<vmem>>, %arg2: memref<128x256xbf16, #tpu.memory_space<vmem>>, %arg3: memref<1x256xf32, #tpu.memory_space<vmem>>, %arg4: memref<256x512xbf16, #tpu.memory_space<vmem>>, %arg5: memref<1x512xf32, #tpu.memory_space<vmem>>, %arg6: memref<512x768xbf16, #tpu.memory_space<any>>, %arg7: memref<1x768xf32, #tpu.memory_space<vmem>>, %arg8: memref<768x1024xbf16, #tpu.memory_space<any>>, %arg9: memref<1x1024xf32, #tpu.memory_space<vmem>>, %arg10: memref<1024x896xbf16, #tpu.memory_space<any>>, %arg11: memref<1x896xf32, #tpu.memory_space<vmem>>, %arg12: memref<16x896xf32, #tpu.memory_space<vmem>>, %arg13: memref<512x768xbf16, #tpu.memory_space<vmem>>, %arg14: memref<768x1024xbf16, #tpu.memory_space<vmem>>, %arg15: memref<1024x896xbf16, #tpu.memory_space<vmem>>, %arg16: memref<3x!tpu.dma_semaphore, #tpu.memory_space<semaphore_mem>>) attributes {dimension_semantics = [#tpu.dimension_semantics<arbitrary>], iteration_bounds = array<i64: 2>, scalar_prefetch = 0 : i64, scratch_operands = 4 : i64, tpu.core_type = #tpu.core_type<tc>, window_params = [{transform_indices = @transform_0, window_bounds = array<i64: 16, 128>}, {pipeline_mode = #tpu.pipeline_mode<synchronous>, transform_indices = @transform_1, window_bounds = array<i64: 128, 256>}, {pipeline_mode = #tpu.pipeline_mode<synchronous>, transform_indices = @transform_2, window_bounds = array<i64: 1, 256>}, {pipeline_mode = #tpu.pipeline_mode<synchronous>, transform_indices = @transform_3, window_bounds = array<i64: 256, 512>}, {pipeline_mode = #tpu.pipeline_mode<synchronous>, transform_indices = @transform_4, window_bounds = array<i64: 1, 512>}, {}, {pipeline_mode = #tpu.pipeline_mode<synchronous>, transform_indices = @transform_6, window_bounds = array<i64: 1, 768>}, {}, {pipeline_mode = #tpu.pipeline_mode<synchronous>, transform_indices = @transform_8, window_bounds = array<i64: 1, 1024>}, {}, {pipeline_mode = #tpu.pipeline_mode<synchronous>, transform_indices = @transform_10, window_bounds = array<i64: 1, 896>}, {transform_indices = @transform_11, window_bounds = array<i64: 16, 896>}]} {
    %c0_i32 = arith.constant 0 : i32
    %0 = arith.cmpi eq, %arg0, %c0_i32 : i32
    %1 = arith.extui %0 : i1 to i32
    %c0_i32_0 = arith.constant 0 : i32
    %2 = arith.cmpi ne, %1, %c0_i32_0 : i32
    scf.if %2 {
      %c0_i32_39 = arith.constant 0 : i32
      %61 = tpu.memref_slice %arg16[%c0_i32_39] : memref<3x!tpu.dma_semaphore, #tpu.memory_space<semaphore_mem>> -> memref<1x!tpu.dma_semaphore, #tpu.memory_space<semaphore_mem>>
      %62 = tpu.memref_squeeze %61 : memref<1x!tpu.dma_semaphore, #tpu.memory_space<semaphore_mem>> -> memref<!tpu.dma_semaphore, #tpu.memory_space<semaphore_mem>>
      tpu.enqueue_dma source(%arg6 : memref<512x768xbf16, #tpu.memory_space<any>>) target(%arg13 : memref<512x768xbf16, #tpu.memory_space<vmem>>) target_semaphore(%62 : memref<!tpu.dma_semaphore, #tpu.memory_space<semaphore_mem>>)
      %c1_i32 = arith.constant 1 : i32
      %63 = tpu.memref_slice %arg16[%c1_i32] : memref<3x!tpu.dma_semaphore, #tpu.memory_space<semaphore_mem>> -> memref<1x!tpu.dma_semaphore, #tpu.memory_space<semaphore_mem>>
      %64 = tpu.memref_squeeze %63 : memref<1x!tpu.dma_semaphore, #tpu.memory_space<semaphore_mem>> -> memref<!tpu.dma_semaphore, #tpu.memory_space<semaphore_mem>>
      tpu.enqueue_dma source(%arg8 : memref<768x1024xbf16, #tpu.memory_space<any>>) target(%arg14 : memref<768x1024xbf16, #tpu.memory_space<vmem>>) target_semaphore(%64 : memref<!tpu.dma_semaphore, #tpu.memory_space<semaphore_mem>>)
      %c2_i32 = arith.constant 2 : i32
      %65 = tpu.memref_slice %arg16[%c2_i32] : memref<3x!tpu.dma_semaphore, #tpu.memory_space<semaphore_mem>> -> memref<1x!tpu.dma_semaphore, #tpu.memory_space<semaphore_mem>>
      %66 = tpu.memref_squeeze %65 : memref<1x!tpu.dma_semaphore, #tpu.memory_space<semaphore_mem>> -> memref<!tpu.dma_semaphore, #tpu.memory_space<semaphore_mem>>
      tpu.enqueue_dma source(%arg10 : memref<1024x896xbf16, #tpu.memory_space<any>>) target(%arg15 : memref<1024x896xbf16, #tpu.memory_space<vmem>>) target_semaphore(%66 : memref<!tpu.dma_semaphore, #tpu.memory_space<semaphore_mem>>)
    } else {
    }
    %c0 = arith.constant 0 : index
    %c0_1 = arith.constant 0 : index
    %3 = vector.load %arg1[%c0, %c0_1] : memref<16x128xbf16, #tpu.memory_space<vmem>>, vector<16x128xbf16>
    %c0_2 = arith.constant 0 : index
    %c0_3 = arith.constant 0 : index
    %4 = vector.load %arg2[%c0_2, %c0_3] : memref<128x256xbf16, #tpu.memory_space<vmem>>, vector<128x256xbf16>
    %cst = arith.constant dense<0.000000e+00> : vector<16x256xf32>
    %5 = tpu.matmul %3, %4, %cst {dimension_numbers = #tpu.dot_dimension_numbers<[1], [0], [0], [1], [0, 0, 1, 1], [], []>} : vector<16x128xbf16>, vector<128x256xbf16>, vector<16x256xf32> -> vector<16x256xf32>
    %c0_4 = arith.constant 0 : index
    %c0_5 = arith.constant 0 : index
    %6 = vector.load %arg3[%c0_4, %c0_5] : memref<1x256xf32, #tpu.memory_space<vmem>>, vector<1x256xf32>
    %7 = vector.broadcast %6 : vector<1x256xf32> to vector<16x256xf32>
    %8 = arith.addf %5, %7 : vector<16x256xf32>
    %cst_6 = arith.constant 0.000000e+00 : f32
    %9 = vector.broadcast %cst_6 : f32 to vector<16x256xf32>
    %10 = arith.cmpf ogt, %8, %9 : vector<16x256xf32>
    %cst_7 = arith.constant 2.000000e-01 : f32
    %11 = vector.broadcast %cst_7 : f32 to vector<16x256xf32>
    %12 = arith.mulf %11, %8 : vector<16x256xf32>
    %13 = arith.select %10, %8, %12 : vector<16x256xi1>, vector<16x256xf32>
    %14 = arith.truncf %13 : vector<16x256xf32> to vector<16x256xbf16>
    %c0_8 = arith.constant 0 : index
    %c0_9 = arith.constant 0 : index
    %15 = vector.load %arg4[%c0_8, %c0_9] : memref<256x512xbf16, #tpu.memory_space<vmem>>, vector<256x512xbf16>
    %cst_10 = arith.constant dense<0.000000e+00> : vector<16x512xf32>
    %16 = tpu.matmul %14, %15, %cst_10 {dimension_numbers = #tpu.dot_dimension_numbers<[1], [0], [0], [1], [0, 0, 1, 1], [], []>} : vector<16x256xbf16>, vector<256x512xbf16>, vector<16x512xf32> -> vector<16x512xf32>
    %c0_11 = arith.constant 0 : index
    %c0_12 = arith.constant 0 : index
    %17 = vector.load %arg5[%c0_11, %c0_12] : memref<1x512xf32, #tpu.memory_space<vmem>>, vector<1x512xf32>
    %18 = vector.broadcast %17 : vector<1x512xf32> to vector<16x512xf32>
    %19 = arith.addf %16, %18 : vector<16x512xf32>
    %cst_13 = arith.constant 0.000000e+00 : f32
    %20 = vector.broadcast %cst_13 : f32 to vector<16x512xf32>
    %21 = arith.cmpf ogt, %19, %20 : vector<16x512xf32>
    %cst_14 = arith.constant 2.000000e-01 : f32
    %22 = vector.broadcast %cst_14 : f32 to vector<16x512xf32>
    %23 = arith.mulf %22, %19 : vector<16x512xf32>
    %24 = arith.select %21, %19, %23 : vector<16x512xi1>, vector<16x512xf32>
    %25 = arith.truncf %24 : vector<16x512xf32> to vector<16x512xbf16>
    %26 = arith.extui %0 : i1 to i32
    %c0_i32_15 = arith.constant 0 : i32
    %27 = arith.cmpi ne, %26, %c0_i32_15 : i32
    scf.if %27 {
      %c0_i32_39 = arith.constant 0 : i32
      %61 = tpu.memref_slice %arg16[%c0_i32_39] : memref<3x!tpu.dma_semaphore, #tpu.memory_space<semaphore_mem>> -> memref<1x!tpu.dma_semaphore, #tpu.memory_space<semaphore_mem>>
      %62 = tpu.memref_squeeze %61 : memref<1x!tpu.dma_semaphore, #tpu.memory_space<semaphore_mem>> -> memref<!tpu.dma_semaphore, #tpu.memory_space<semaphore_mem>>
      tpu.wait_dma2 semaphore(%62 : memref<!tpu.dma_semaphore, #tpu.memory_space<semaphore_mem>>) src(%arg6 : memref<512x768xbf16, #tpu.memory_space<any>>) dst(%arg13 : memref<512x768xbf16, #tpu.memory_space<vmem>>)
    } else {
    }
    %c0_16 = arith.constant 0 : index
    %c0_17 = arith.constant 0 : index
    %28 = vector.load %arg13[%c0_16, %c0_17] : memref<512x768xbf16, #tpu.memory_space<vmem>>, vector<512x768xbf16>
    %cst_18 = arith.constant dense<0.000000e+00> : vector<16x768xf32>
    %29 = tpu.matmul %25, %28, %cst_18 {dimension_numbers = #tpu.dot_dimension_numbers<[1], [0], [0], [1], [0, 0, 1, 1], [], []>} : vector<16x512xbf16>, vector<512x768xbf16>, vector<16x768xf32> -> vector<16x768xf32>
    %c0_19 = arith.constant 0 : index
    %c0_20 = arith.constant 0 : index
    %30 = vector.load %arg7[%c0_19, %c0_20] : memref<1x768xf32, #tpu.memory_space<vmem>>, vector<1x768xf32>
    %31 = vector.broadcast %30 : vector<1x768xf32> to vector<16x768xf32>
    %32 = arith.addf %29, %31 : vector<16x768xf32>
    %cst_21 = arith.constant 0.000000e+00 : f32
    %33 = vector.broadcast %cst_21 : f32 to vector<16x768xf32>
    %34 = arith.cmpf ogt, %32, %33 : vector<16x768xf32>
    %cst_22 = arith.constant 2.000000e-01 : f32
    %35 = vector.broadcast %cst_22 : f32 to vector<16x768xf32>
    %36 = arith.mulf %35, %32 : vector<16x768xf32>
    %37 = arith.select %34, %32, %36 : vector<16x768xi1>, vector<16x768xf32>
    %38 = arith.truncf %37 : vector<16x768xf32> to vector<16x768xbf16>
    %39 = arith.extui %0 : i1 to i32
    %c0_i32_23 = arith.constant 0 : i32
    %40 = arith.cmpi ne, %39, %c0_i32_23 : i32
    scf.if %40 {
      %c1_i32 = arith.constant 1 : i32
      %61 = tpu.memref_slice %arg16[%c1_i32] : memref<3x!tpu.dma_semaphore, #tpu.memory_space<semaphore_mem>> -> memref<1x!tpu.dma_semaphore, #tpu.memory_space<semaphore_mem>>
      %62 = tpu.memref_squeeze %61 : memref<1x!tpu.dma_semaphore, #tpu.memory_space<semaphore_mem>> -> memref<!tpu.dma_semaphore, #tpu.memory_space<semaphore_mem>>
      tpu.wait_dma2 semaphore(%62 : memref<!tpu.dma_semaphore, #tpu.memory_space<semaphore_mem>>) src(%arg8 : memref<768x1024xbf16, #tpu.memory_space<any>>) dst(%arg14 : memref<768x1024xbf16, #tpu.memory_space<vmem>>)
    } else {
    }
    %c0_24 = arith.constant 0 : index
    %c0_25 = arith.constant 0 : index
    %41 = vector.load %arg14[%c0_24, %c0_25] : memref<768x1024xbf16, #tpu.memory_space<vmem>>, vector<768x1024xbf16>
    %cst_26 = arith.constant dense<0.000000e+00> : vector<16x1024xf32>
    %42 = tpu.matmul %38, %41, %cst_26 {dimension_numbers = #tpu.dot_dimension_numbers<[1], [0], [0], [1], [0, 0, 1, 1], [], []>} : vector<16x768xbf16>, vector<768x1024xbf16>, vector<16x1024xf32> -> vector<16x1024xf32>
    %c0_27 = arith.constant 0 : index
    %c0_28 = arith.constant 0 : index
    %43 = vector.load %arg9[%c0_27, %c0_28] : memref<1x1024xf32, #tpu.memory_space<vmem>>, vector<1x1024xf32>
    %44 = vector.broadcast %43 : vector<1x1024xf32> to vector<16x1024xf32>
    %45 = arith.addf %42, %44 : vector<16x1024xf32>
    %cst_29 = arith.constant 0.000000e+00 : f32
    %46 = vector.broadcast %cst_29 : f32 to vector<16x1024xf32>
    %47 = arith.cmpf ogt, %45, %46 : vector<16x1024xf32>
    %cst_30 = arith.constant 2.000000e-01 : f32
    %48 = vector.broadcast %cst_30 : f32 to vector<16x1024xf32>
    %49 = arith.mulf %48, %45 : vector<16x1024xf32>
    %50 = arith.select %47, %45, %49 : vector<16x1024xi1>, vector<16x1024xf32>
    %51 = arith.truncf %50 : vector<16x1024xf32> to vector<16x1024xbf16>
    %52 = arith.extui %0 : i1 to i32
    %c0_i32_31 = arith.constant 0 : i32
    %53 = arith.cmpi ne, %52, %c0_i32_31 : i32
    scf.if %53 {
      %c2_i32 = arith.constant 2 : i32
      %61 = tpu.memref_slice %arg16[%c2_i32] : memref<3x!tpu.dma_semaphore, #tpu.memory_space<semaphore_mem>> -> memref<1x!tpu.dma_semaphore, #tpu.memory_space<semaphore_mem>>
      %62 = tpu.memref_squeeze %61 : memref<1x!tpu.dma_semaphore, #tpu.memory_space<semaphore_mem>> -> memref<!tpu.dma_semaphore, #tpu.memory_space<semaphore_mem>>
      tpu.wait_dma2 semaphore(%62 : memref<!tpu.dma_semaphore, #tpu.memory_space<semaphore_mem>>) src(%arg10 : memref<1024x896xbf16, #tpu.memory_space<any>>) dst(%arg15 : memref<1024x896xbf16, #tpu.memory_space<vmem>>)
    } else {
    }
    %c0_32 = arith.constant 0 : index
    %c0_33 = arith.constant 0 : index
    %54 = vector.load %arg15[%c0_32, %c0_33] : memref<1024x896xbf16, #tpu.memory_space<vmem>>, vector<1024x896xbf16>
    %cst_34 = arith.constant dense<0.000000e+00> : vector<16x896xf32>
    %55 = tpu.matmul %51, %54, %cst_34 {dimension_numbers = #tpu.dot_dimension_numbers<[1], [0], [0], [1], [0, 0, 1, 1], [], []>} : vector<16x1024xbf16>, vector<1024x896xbf16>, vector<16x896xf32> -> vector<16x896xf32>
    %c0_35 = arith.constant 0 : index
    %c0_36 = arith.constant 0 : index
    %56 = vector.load %arg11[%c0_35, %c0_36] : memref<1x896xf32, #tpu.memory_space<vmem>>, vector<1x896xf32>
    %57 = vector.broadcast %56 : vector<1x896xf32> to vector<16x896xf32>
    %58 = arith.addf %55, %57 : vector<16x896xf32>
    %59 = math.tanh %58 : vector<16x896xf32>
    %c0_37 = arith.constant 0 : index
    %c0_38 = arith.constant 0 : index
    %60 = vector.load %arg12[%c0_37, %c0_38] : memref<16x896xf32, #tpu.memory_space<vmem>>, vector<16x896xf32>
    tpu.vector_store %arg12[%c0_37, %c0_38], %59 {strides = array<i32>} : memref<16x896xf32, #tpu.memory_space<vmem>>, vector<16x896xf32>,
    return
  }
  func.func @transform_0(%arg0: i32) -> (i32, i32) {
    %c0_i32 = arith.constant 0 : i32
    %c0_i32_0 = arith.constant 0 : i32
    return %arg0, %c0_i32 : i32, i32
  }
  func.func @transform_1(%arg0: i32) -> (i32, i32) {
    %c0_i32 = arith.constant 0 : i32
    %c0_i32_0 = arith.constant 0 : i32
    %c0_i32_1 = arith.constant 0 : i32
    return %c0_i32, %c0_i32_0 : i32, i32
  }
  func.func @transform_2(%arg0: i32) -> (i32, i32) {
    %c0_i32 = arith.constant 0 : i32
    %c0_i32_0 = arith.constant 0 : i32
    %c0_i32_1 = arith.constant 0 : i32
    return %c0_i32, %c0_i32_0 : i32, i32
  }
  func.func @transform_3(%arg0: i32) -> (i32, i32) {
    %c0_i32 = arith.constant 0 : i32
    %c0_i32_0 = arith.constant 0 : i32
    %c0_i32_1 = arith.constant 0 : i32
    return %c0_i32, %c0_i32_0 : i32, i32
  }
  func.func @transform_4(%arg0: i32) -> (i32, i32) {
    %c0_i32 = arith.constant 0 : i32
    %c0_i32_0 = arith.constant 0 : i32
    %c0_i32_1 = arith.constant 0 : i32
    return %c0_i32, %c0_i32_0 : i32, i32
  }
  func.func @transform_6(%arg0: i32) -> (i32, i32) {
    %c0_i32 = arith.constant 0 : i32
    %c0_i32_0 = arith.constant 0 : i32
    %c0_i32_1 = arith.constant 0 : i32
    return %c0_i32, %c0_i32_0 : i32, i32
  }
  func.func @transform_8(%arg0: i32) -> (i32, i32) {
    %c0_i32 = arith.constant 0 : i32
    %c0_i32_0 = arith.constant 0 : i32
    %c0_i32_1 = arith.constant 0 : i32
    return %c0_i32, %c0_i32_0 : i32, i32
  }
  func.func @transform_10(%arg0: i32) -> (i32, i32) {
    %c0_i32 = arith.constant 0 : i32
    %c0_i32_0 = arith.constant 0 : i32
    %c0_i32_1 = arith.constant 0 : i32
    return %c0_i32, %c0_i32_0 : i32, i32
  }
  func.func @transform_11(%arg0: i32) -> (i32, i32) {
    %c0_i32 = arith.constant 0 : i32
    %c0_i32_0 = arith.constant 0 : i32
    return %arg0, %c0_i32 : i32, i32
  }
}

</mosaic_0001>

<bundles_post_ra>
// kernel: generator_forward.1
= control target key start
LH: loop header
LB: loop body
LE: loop exit
PB: predicated region body
PF: predicated region fallthrough
CT: control target
= control target key end

     0   :  { %s5728_s0 = inlined_call_operand.vmem [shape: bf16[32,128], index: 0, kind: input, shape index: {}]   ;;  %s5729_s1 = inlined_call_operand.hbm [shape: bf16[128,256], index: 1, kind: input, shape index: {}]   ;;  %s5730_s2 = inlined_call_operand.hbm [shape: f32[1,256], index: 2, kind: input, shape index: {}]   ;;  %s5731_s3 = inlined_call_operand.hbm [shape: bf16[256,512], index: 3, kind: input, shape index: {}]   ;;  %s5732_s4 = inlined_call_operand.hbm [shape: f32[1,512], index: 4, kind: input, shape index: {}]   ;;  %s5733_s5 = inlined_call_operand.hbm [shape: bf16[512,768], index: 5, kind: input, shape index: {}]   ;;  %s5734_s6 = inlined_call_operand.hbm [shape: f32[1,768], index: 6, kind: input, shape index: {}]   ;;  %s5735_s7 = inlined_call_operand.hbm [shape: bf16[768,1024], index: 7, kind: input, shape index: {}]   ;;  %s5736_s8 = inlined_call_operand.hbm [shape: f32[1,1024], index: 8, kind: input, shape index: {}]   ;;  %s5737_s9 = inlined_call_operand.hbm [shape: bf16[1024,896], index: 9, kind: input, shape index: {}]   ;;  %s5738_s10 = inlined_call_operand.hbm [shape: f32[1,896], index: 10, kind: input, shape index: {}]   ;;  %s5739_s11 = inlined_call_operand.hbm [shape: f32[32,896], index: 11, kind: output, shape index: {}]  }
   0x1   :  { %5748 = sst [smem:[#allocation39_spill]] %s5729_s1 }
   0x2   :  { %5749 = sst [smem:[#allocation40_spill]] %s5730_s2 }
   0x3   :  { %5750 = sst [smem:[#allocation41_spill]] %s5732_s4 }
   0x4   :  { %5751 = sst [smem:[#allocation42_spill]] %s5736_s8 }
   0x5   :  { %16 = vsyncpa [#allocation7], 0 }
   0x6   :  { %17 = vsyncpa [#allocation10], 0 }
   0x7   :  { %18 = vsyncpa [#allocation13], 0 }
   0x8   :  { %19 = vsyncpa [#allocation16], 0 }
   0x9   :  { %20 = vsyncpa [#allocation8], 0 }
   0xa   :  { %22 = vsyncpa [#allocation8 + $0x1], 0  ;;  %s5153_s17 = smov 0   ;;  %s5155_s18 = smov 0  }
   0xb   :  { %s5157_s19 = smov 0   ;;  %s5159_s20 = smov 0  }
   0xc LB: > { %5752 = sst [smem:[#allocation34_spill]] %s5042_s17  ;;  %s5174_s21 = sadd.s32 4294967295, %s5054_s20   ;;  %s5054_s20 = sphi %s5159_s20, %s5813_s20   ;;  %s5050_s19 = sphi %s5157_s19, %s5815_s19   ;;  %s5046_s18 = sphi %s5155_s18, %s5817_s18   ;;  %s5042_s17 = sphi %s5153_s17, %s5816_s17  }
   0xd   : > { %5753 = sst [smem:[#allocation35_spill]] %s5050_s19  ;;  %s4109_s22 = sadd.s32 4294967294, %s5054_s20  }
   0xe   : > { %s5178_s23 = sadd.s32 1, %s5054_s20   ;;  %s208_s24 = sadd.s32 1, %s5050_s19 }
   0xf   : > { %5754 = sst [smem:[#allocation36_spill]] %s5178_s23  ;;  %s205_s25 = ssub.s32 %s5054_s20, %s5178_s23 }
  0x10   : > { %p218_p0 = scmp.ne.s32.totalorder %s5050_s19, %s5046_s18  ;;  %p206_p1 = scmp.eq.s32.totalorder %s205_s25, 0 }
  0x11   : > { %p219_p2 = scmp.eq.s32.totalorder %s5174_s21, 1  ;;  %p224_p3 = scmp.ne.s32.totalorder %s5046_s18, %s5042_s17 }
  0x12   : > { %p225_p4 = scmp.eq.s32.totalorder %s4109_s22, 1  ;;  %p4110_p7 = scmp.ge.s32.totalorder %s5054_s20, 1 }
  0x13   : > { %s5189_s26 = scalar_select %p206_p1, %s5050_s19, %s208_s24  }
  0x14   : > { %p5191_p5 = por %p219_p2, %p218_p0  ;;  %p5195_p6 = por %p225_p4, %p224_p3 }
  0x15   : > { %5755 = sst [smem:[#allocation37_spill]] %s5189_s26  ;;  %p232_p8 = scmp.lt.s32.totalorder %s5054_s20, 3 }
  0x16   : > { %s5756_s27 = scalar_select %p5191_p5, 1, 0 }
  0x17   : > { %s5757_s28 = scalar_select %p5195_p6, 1, 0 }
  0x18   : > { %p5743_p9 = scmp.eq.s32.totalorder %s5174_s21, 0  ;;  %p5202_p10 = pnand %p4110_p7, %p232_p8 }
  0x19   : > { %5758 = sst [smem:[#allocation38_spill]] %s5757_s28  ;;  %s5056_s30 = smov [#allocation9]  }
  0x1a   : > { %s5759_s29 = scalar_select %p5202_p10, 1, 0 }
  0x1b   : > { %s258_s12 = sshll.u32 %s5056_s30, 4  ;;  %p4506_p11 = pneg %p5202_p10  ;;  %s259_s12 = int_to_ptr.vmem [resolvable:$true] %s258_s12 }
  0x1c   : > { %s5057_s13 = smov [#allocation12]   ;;  %s5058_s16 = smov [#allocation15]  }
  0x1d   : > { %s282_s14 = sshll.u32 %s5057_s13, 4  ;;  %p5210_p12 = pnand %p5743_p9, %p4506_p11  ;;  %s5214_s14 = int_to_ptr.vmem [resolvable:$true] %s282_s14 }
  0x1e   : > { %s304_s22 = sshll.u32 %s5058_s16, 4  ;;  %s5761_s2 = sld [smem:[#allocation40_spill]]  ;;  %s5216_s22 = int_to_ptr.vmem [resolvable:$true] %s304_s22 }
  0x1f   : > { %p5226_p0 = pneg %p5210_p12 }
  0x24   : > { %s4768_s30 = scalar_lea.hbm %s5761_s2, 32 }
  0x25   : > { %p4769_p13 = scmp.ne.s32.totalorder %s5761_s2, %s4768_s30  ;;  %p4775_p3 = scmp.lt.u32.totalorder %s4768_s30, %s5761_s2 }
  0x27   : > { %p4771_p1 = pnand %p5226_p0, %p4769_p13 }
  0x29   : > { %p4772_p2 = pneg %p4771_p1 }
  0x2b   : > { %p4777_p4 = pnand %p4775_p3, %p4772_p2 }
  0x2d   : > { %4780 = shalt.err (!%p4777_p4)
}
  0x2e   : > { %s4781_s24 = scalar_lea.vmem %s259_s12, 32  ;;  %p4789_p9 = scmp.lt.s32.totalorder %s259_s12, %s259_s12 }
  0x2f   : > { %p4782_p7 = scmp.ne.s32.totalorder %s259_s12, %s4781_s24  ;;  %p4790_p6 = scmp.lt.s32.totalorder %s4781_s24, %s4781_s24 }
  0x31   : > { %p4784_p8 = pnand %p4782_p7, %p5226_p0  ;;  %p4791_p5 = por %p4790_p6, %p4789_p9 }
  0x33   : > { %p4785_p11 = pneg %p4784_p8 }
  0x35   : > { %p4792_p10 = pnand %p4791_p5, %p4785_p11 }
  0x37   : > { %4795 = shalt.err (!%p4792_p10)
}
  0x38   : > { %4512 = dma.hbm_to_vmem [thread:$0]  (!%p5210_p12), %s5761_s2, 32, %s259_s12, [#allocation10]  }
  0x39   : > { %s5763_s4 = sld [smem:[#allocation41_spill]] }
  0x3f   : > { %s4796_s30 = scalar_lea.hbm %s5763_s4, 64 }
  0x40   : > { %p4797_p13 = scmp.ne.s32.totalorder %s5763_s4, %s4796_s30  ;;  %p4803_p5 = scmp.lt.u32.totalorder %s4796_s30, %s5763_s4 }
  0x42   : > { %p4799_p1 = pnand %p4797_p13, %p5226_p0 }
  0x44   : > { %p4800_p6 = pneg %p4799_p1 }
  0x46   : > { %p4805_p9 = pnand %p4803_p5, %p4800_p6 }
  0x48   : > { %4808 = shalt.err (!%p4805_p9)
}
  0x49   : > { %s4809_s12 = scalar_lea.vmem %s5214_s14, 64  ;;  %p4817_p4 = scmp.lt.s32.totalorder %s5214_s14, %s5214_s14 }
  0x4a   : > { %p4810_p10 = scmp.ne.s32.totalorder %s5214_s14, %s4809_s12  ;;  %p4818_p7 = scmp.lt.s32.totalorder %s4809_s12, %s4809_s12 }
  0x4c   : > { %p4812_p2 = pnand %p4810_p10, %p5226_p0  ;;  %p4819_p8 = por %p4818_p7, %p4817_p4 }
  0x4e   : > { %p4813_p3 = pneg %p4812_p2 }
  0x50   : > { %p4820_p11 = pnand %p4819_p8, %p4813_p3 }
  0x52   : > { %4823 = shalt.err (!%p4820_p11)
}
  0x53   : > { %4518 = dma.hbm_to_vmem [thread:$0]  (!%p5210_p12), %s5763_s4, 64, %s5214_s14, [#allocation13]  }
  0x54   : > { %s5764_s8 = sld [smem:[#allocation42_spill]] }
  0x5a   : > { %s4824_s23 = scalar_lea.hbm %s5764_s8, 128 }
  0x5b   : > { %p4825_p13 = scmp.ne.s32.totalorder %s5764_s8, %s4824_s23  ;;  %p4831_p5 = scmp.lt.u32.totalorder %s4824_s23, %s5764_s8 }
  0x5d   : > { %p4827_p1 = pnand %p4825_p13, %p5226_p0 }
  0x5f   : > { %p4828_p6 = pneg %p4827_p1 }
  0x61   : > { %p4833_p9 = pnand %p4831_p5, %p4828_p6 }
  0x63   : > { %4836 = shalt.err (!%p4833_p9)
}
  0x64   : > { %s4837_s14 = scalar_lea.vmem %s5216_s22, 128  ;;  %p4845_p4 = scmp.lt.s32.totalorder %s5216_s22, %s5216_s22 }
  0x65   : > { %p4838_p10 = scmp.ne.s32.totalorder %s5216_s22, %s4837_s14  ;;  %p4846_p7 = scmp.lt.s32.totalorder %s4837_s14, %s4837_s14 }
  0x67   : > { %p4840_p2 = pnand %p4838_p10, %p5226_p0  ;;  %p4847_p8 = por %p4846_p7, %p4845_p4 }
  0x69   : > { %p4841_p3 = pneg %p4840_p2 }
  0x6b   : > { %p4848_p11 = pnand %p4847_p8, %p4841_p3 }
  0x6d   : > { %4851 = shalt.err (!%p4848_p11)
}
  0x6e   : > { %4524 = dma.hbm_to_vmem [thread:$0]  (!%p5210_p12), %s5764_s8, 128, %s5216_s22, [#allocation16]  }
  0x6f   : > { %s5059_s28 = smov [#allocation6]   ;;  %s5765_s1 = sld [smem:[#allocation39_spill]] }
  0x70   : > { %s244_s19 = sshll.u32 %s5059_s28, 4  ;;  %s245_s19 = int_to_ptr.vmem [resolvable:$true] %s244_s19 }
  0x75   : > { %s4852_s25 = scalar_lea.hbm %s5765_s1, 2048 }
  0x76   : > { %p4853_p13 = scmp.ne.s32.totalorder %s5765_s1, %s4852_s25  ;;  %p4859_p5 = scmp.lt.u32.totalorder %s4852_s25, %s5765_s1 }
  0x78   : > { %p4855_p1 = pnand %p4853_p13, %p5226_p0 }
  0x7a   : > { %p4856_p6 = pneg %p4855_p1 }
  0x7c   : > { %p4861_p9 = pnand %p4859_p5, %p4856_p6 }
  0x7e   : > { %4864 = shalt.err (!%p4861_p9)
}
  0x7f   : > { %s4865_s22 = scalar_lea.vmem %s245_s19, 2048  ;;  %p4873_p4 = scmp.lt.s32.totalorder %s245_s19, %s245_s19 }
  0x80   : > { %p4866_p10 = scmp.ne.s32.totalorder %s245_s19, %s4865_s22  ;;  %p4874_p7 = scmp.lt.s32.totalorder %s4865_s22, %s4865_s22 }
  0x82   : > { %p4868_p2 = pnand %p4866_p10, %p5226_p0  ;;  %p4875_p8 = por %p4874_p7, %p4873_p4 }
  0x84   : > { %p4869_p3 = pneg %p4868_p2 }
  0x86   : > { %p4876_p11 = pnand %p4875_p8, %p4869_p3 }
  0x88   : > { %4879 = shalt.err (!%p4876_p11)
}
  0x89   : > { %s5060_s12 = smov 128   ;;  %s5061_s17 = smov 8  }
  0x8a   : > { %4509 = dma.hbm_to_vmem [thread:$0]  (!%p5210_p12), %s5765_s1, 2048, %s245_s19, [#allocation7], %s5060_s12, %s5060_s12, %s5061_s17  }
  0x8b   : > { %s5062_s23 = smov [#allocation11]   ;;  %s4880_s24 = scalar_lea.hbm %s5731_s3, 8192 }
  0x8c   : > { %s268_s25 = sshll.u32 %s5062_s23, 4  ;;  %p4881_p13 = scmp.ne.s32.totalorder %s5731_s3, %s4880_s24  ;;  %s269_s25 = int_to_ptr.vmem [resolvable:$true] %s268_s25 }
  0x8d   : > { %p4887_p5 = scmp.lt.u32.totalorder %s4880_s24, %s5731_s3 }
  0x8e   : > { %p4883_p1 = pnand %p4881_p13, %p5226_p0 }
  0x90   : > { %p4884_p6 = pneg %p4883_p1 }
  0x92   : > { %p4889_p9 = pnand %p4887_p5, %p4884_p6 }
  0x94   : > { %4892 = shalt.err (!%p4889_p9)
}
  0x95   : > { %s4893_s19 = scalar_lea.vmem %s269_s25, 8192  ;;  %p4901_p4 = scmp.lt.s32.totalorder %s269_s25, %s269_s25 }
  0x96   : > { %p4894_p10 = scmp.ne.s32.totalorder %s269_s25, %s4893_s19  ;;  %p4902_p7 = scmp.lt.s32.totalorder %s4893_s19, %s4893_s19 }
  0x98   : > { %p4896_p2 = pnand %p4894_p10, %p5226_p0  ;;  %p4903_p8 = por %p4902_p7, %p4901_p4 }
  0x9a   : > { %p4897_p3 = pneg %p4896_p2 }
  0x9c   : > { %p4904_p11 = pnand %p4903_p8, %p4897_p3 }
  0x9e   : > { %4907 = shalt.err (!%p4904_p11)
}
  0x9f   : > { %s5063_s12 = smov 256   ;;  %s5064_s17 = smov 16  }
  0xa0   : > { %4515 = dma.hbm_to_vmem [thread:$0]  (!%p5210_p12), %s5731_s3, 8192, %s269_s25, [#allocation10], %s5063_s12, %s5063_s12, %s5064_s17  }
  0xa1   : > { %s5065_s28 = smov [#allocation14]   ;;  %s5066_s23 = smov [#allocation17]  }
  0xa2   : > { %s293_s26 = sshll.u32 %s5065_s28, 4  ;;  %s315_s30 = sshll.u32 %s5066_s23, 4  ;;  %s294_s26 = int_to_ptr.vmem [resolvable:$true] %s293_s26  ;;  %s316_s30 = int_to_ptr.vmem [resolvable:$true] %s315_s30 }
  0xa3   : > { %s4908_s14 = scalar_lea.hbm %s5734_s6, 96 }
  0xa4   : > { %p4909_p13 = scmp.ne.s32.totalorder %s5734_s6, %s4908_s14  ;;  %p4915_p5 = scmp.lt.u32.totalorder %s4908_s14, %s5734_s6 }
  0xa6   : > { %p4911_p1 = pnand %p4909_p13, %p5226_p0 }
  0xa8   : > { %p4912_p6 = pneg %p4911_p1 }
  0xaa   : > { %p4917_p9 = pnand %p4915_p5, %p4912_p6 }
  0xac   : > { %4920 = shalt.err (!%p4917_p9)
}
  0xad   : > { %s4921_s25 = scalar_lea.vmem %s294_s26, 96  ;;  %p4929_p4 = scmp.lt.s32.totalorder %s294_s26, %s294_s26 }
  0xae   : > { %p4922_p10 = scmp.ne.s32.totalorder %s294_s26, %s4921_s25  ;;  %p4930_p7 = scmp.lt.s32.totalorder %s4921_s25, %s4921_s25 }
  0xb0   : > { %p4924_p2 = pnand %p4922_p10, %p5226_p0  ;;  %p4931_p8 = por %p4930_p7, %p4929_p4 }
  0xb2   : > { %p4925_p3 = pneg %p4924_p2 }
  0xb4   : > { %p4932_p11 = pnand %p4931_p8, %p4925_p3 }
  0xb6   : > { %4935 = shalt.err (!%p4932_p11)
}
  0xb7   : > { %4521 = dma.hbm_to_vmem [thread:$0]  (!%p5210_p12), %s5734_s6, 96, %s294_s26, [#allocation13]  }
  0xb8   : > { %s4936_s2 = scalar_lea.hbm %s5738_s10, 112 }
  0xb9   : > { %p4937_p13 = scmp.ne.s32.totalorder %s5738_s10, %s4936_s2  ;;  %p4943_p5 = scmp.lt.u32.totalorder %s4936_s2, %s5738_s10 }
  0xbb   : > { %p4939_p1 = pnand %p4937_p13, %p5226_p0 }
  0xbd   : > { %p4940_p6 = pneg %p4939_p1 }
  0xbf   : > { %p4945_p9 = pnand %p4943_p5, %p4940_p6 }
  0xc1   : > { %4948 = shalt.err (!%p4945_p9)
}
  0xc2   : > { %s4949_s24 = scalar_lea.vmem %s316_s30, 112  ;;  %s4956_s26 = scalar_lea.vmem %s316_s30, 128 }
  0xc3   : > { %p4950_p10 = scmp.ne.s32.totalorder %s316_s30, %s4949_s24  ;;  %p4957_p4 = scmp.lt.s32.totalorder %s316_s30, %s316_s30 }
  0xc4   : > { %p4958_p7 = scmp.lt.s32.totalorder %s4956_s26, %s4949_s24 }
  0xc5   : > { %p4952_p2 = pnand %p4950_p10, %p5226_p0 }
  0xc6   : > { %p4959_p8 = por %p4958_p7, %p4957_p4 }
  0xc7   : > { %p4953_p3 = pneg %p4952_p2 }
  0xc9   : > { %p4960_p11 = pnand %p4959_p8, %p4953_p3 }
  0xcb   : > { %4963 = shalt.err (!%p4960_p11)
}
  0xcc   : > { %4527 = dma.hbm_to_vmem [thread:$0]  (!%p5210_p12), %s5738_s10, 112, %s316_s30, [#allocation16]  }
  0xcd   : > { %p5766_p13 = scmp.ne.s32.totalorder %s5759_s29, 0 }
  0xce   : > { %p5767_p1 = scmp.eq.s32.totalorder (!%p5766_p13), %s5174_s21, 0 }
  0xcf   : > { %337 = sbr.rel (%p5766_p13) target bundleno = 2602 (0xa2a), region = 52 }
  0xd6   : > { %5009 = dma.done.wait (%p5767_p1), [#allocation7], 2048   ;;  %p5768_p0 = pmov %p5767_p1 }
  0xd8   : > { %5011 = vsyncadd (%p5768_p0), [#allocation7], 4294965248  ;;  %p5769_p6 = pmov %p5768_p0 }
  0xd9   : > { %p5770_p5 = pmov %p5768_p0 }
  0xda   : > { %5013 = dma.done.wait (%p5769_p6), [#allocation10], 8224  }
  0xdb   : > { %5015 = vsyncadd (%p5770_p5), [#allocation10], 4294959072  ;;  %p5771_p9 = pmov %p5768_p0 }
  0xdc   : > { %p5772_p12 = pmov %p5768_p0 }
  0xdd   : > { %5017 = dma.done.wait (%p5771_p9), [#allocation13], 160  }
  0xde   : > { %5019 = vsyncadd (%p5772_p12), [#allocation13], 4294967136  ;;  %p5773_p10 = pmov %p5768_p0 }
  0xdf   : > { %p5774_p2 = pmov %p5768_p0 }
  0xe0   : > { %5021 = dma.done.wait (%p5773_p10), [#allocation16], 240  }
  0xe1   : > { %5023 = vsyncadd (%p5774_p2), [#allocation16], 4294967056  ;;  %s392_s29 = sand.u32 1, %s5046_s18   ;;  %s4127_s15 = sshll.u32 %s5174_s21, 1 }
  0xe2   : > { %s4436_s13 = smul.u32 112, %s392_s29  ;;  %p396_p3 = scmp.lt.s32.totalorder %s4127_s15, 3 }
  0xe4   : > { %s5819_s15 = smov (!%p396_p3, %s4127_s15), 3  ;;  %s5387_s17 = scalar_lea.vmem [#allocation18], %s4436_s13 }
  0xe5   : > { %s4128_s30 = sshll.u32 %s5819_s15, 2 }
  0xe6   : > { %s5385_s12 = scalar_lea.vmem %s5728_s0, %s4128_s30 }
  0xe7   : > { %p5775_p4 = pmov %p5768_p0  ;;  %s5067_s2 = smov [#allocation2]   ;;  %v5089_v2 = vmov 0  }
  0xe8   : > { %s419_s4 = sshll.u32 %s5067_s2, 4  ;;  %s5068_s28 = smov 768   ;;  %660 = vmatprep.mubr.bf16.mxu0 %v5089_v2  ;;  %s420_s4 = int_to_ptr.vmem [resolvable:$true] %s419_s4 }
  0xe9   : > { %s4467_s1 = scalar_select %p5775_p4, [#allocation0], [#allocation25] }
  0xea   : > { %p5776_p7 = pmov %p5768_p0  ;;  %p5777_p8 = pmov %p5768_p0 }
  0xeb   : > { %s411_s8 = sld [smem:[%s4467_s1]]   ;;  %s5069_s23 = smov 6  }
  0xec   : > { %4468 = sst [smem:[#allocation20]] (%p5776_p7), %s5068_s28  ;;  %p5778_p11 = pmov %p5768_p0 }
  0xed   : > { %4469 = sst [smem:[#allocation20 + $0x1]] (%p5777_p8), %s5068_s28  ;;  %s5070_s16 = smov 64  }
  0xee   : > { %4470 = sst [smem:[#allocation20 + $0x2]] (%p5778_p11), %s5069_s23  ;;  %p5779_p13 = pmov %p5768_p0 }
  0xef   : > { %s5071_s24 = smov 128   ;;  %p5780_p1 = pmov %p5768_p0 }
  0xf0   : > { %4471 = sst [smem:[#allocation20 + $0x3]] (%p5779_p13), %s5070_s16  ;;  %s5072_s14 = smov 2  }
  0xf1   : > { %4472 = sst [smem:[#allocation20 + $0x4]] (%p5780_p1), %s5071_s24  ;;  %s4130_s26 = sshll.u32 %s411_s8, 26 }
  0xf2   : > { %4473 = sst [smem:[#allocation20 + $0x5]] (%p5768_p0), %s5072_s14  ;;  %s5406_s22 = sadd.s32 134217728, %s4130_s26 }
  0xf3   : > { %s5073_s15 = smov 384   ;;  %p5781_p6 = pmov %p5768_p0 }
  0xf4   : > { %p5782_p5 = pmov %p5768_p0  ;;  %s5074_s13 = smov 4  }
  0xf5   : > { %4474 = sst [smem:[#allocation20 + $0x6]] (%p5781_p6), %s5073_s15  ;;  %p5783_p9 = pmov %p5768_p0 }
  0xf6   : > { %4475 = sst [smem:[#allocation20 + $0x7]] (%p5782_p5), %s5070_s16  ;;  %s5075_s30 = smov [#allocation5]  }
  0xf7   : > { %4476 = sst [smem:[#allocation20 + $0x8]] (%p5783_p9), %s5074_s13  ;;  %s5076_s19 = smov [#allocation19]  }
  0xf8   : > { %p5784_p12 = pmov %p5768_p0  ;;  %s5077_s8 = smov 1024  }
  0xf9   : > { %p5785_p10 = pmov %p5768_p0  ;;  %p5786_p2 = pmov %p5768_p0 }
  0xfa   : > { %4477 = dma.general (%p5784_p12), %s5733_s5, 24576, %s420_s4, %s5075_s30, %s5076_s19, [#allocation20], %s5406_s22, 0  }
  0xfb   : > { %4478 = sst [smem:[#allocation22]] (%p5785_p10), %s5077_s8  ;;  %s5078_s2 = smov 8  }
  0xfc   : > { %4479 = sst [smem:[#allocation22 + $0x1]] (%p5786_p2), %s5077_s8  ;;  %p5787_p3 = pmov %p5768_p0 }
  0xfd   : > { %s5079_s28 = smov [#allocation3]   ;;  %p5788_p4 = pmov %p5768_p0 }
  0xfe   : > { %4480 = sst [smem:[#allocation22 + $0x2]] (%p5787_p3), %s5078_s2  ;;  %s454_s23 = sshll.u32 %s5079_s28, 4  ;;  %s455_s23 = int_to_ptr.vmem [resolvable:$true] %s454_s23 }
  0xff   : > { %4481 = sst [smem:[#allocation22 + $0x3]] (%p5788_p4), %s5070_s16  ;;  %p5789_p7 = pmov %p5768_p0 }
 0x100   : > { %p5790_p8 = pmov %p5768_p0  ;;  %s5080_s4 = smov 512  }
 0x101   : > { %4482 = sst [smem:[#allocation22 + $0x4]] (%p5789_p7), %s5071_s24  ;;  %p5791_p11 = pmov %p5768_p0 }
 0x102   : > { %4483 = sst [smem:[#allocation22 + $0x5]] (%p5790_p8), %s5072_s14  ;;  %p5792_p13 = pmov %p5768_p0 }
 0x103   : > { %4484 = sst [smem:[#allocation22 + $0x6]] (%p5791_p11), %s5080_s4  ;;  %p5793_p1 = pmov %p5768_p0 }
 0x104   : > { %4485 = sst [smem:[#allocation22 + $0x7]] (%p5792_p13), %s5070_s16  ;;  %s5081_s26 = smov [#allocation5 + $0x1]  }
 0x105   : > { %4486 = sst [smem:[#allocation22 + $0x8]] (%p5793_p1), %s5074_s13  ;;  %s5082_s15 = smov [#allocation21]  }
 0x106   : > { %4487 = dma.general (%p5768_p0), %s5735_s7, 49152, %s455_s23, %s5081_s26, %s5082_s15, [#allocation22], %s5406_s22, 0  }
 0x107   : > { %s5083_s25 = smov 896   ;;  %p5794_p6 = pmov %p5768_p0 }
 0x108   : > { %p5795_p5 = pmov %p5768_p0  ;;  %s5084_s1 = smov [#allocation4]  }
 0x109   : > { %4488 = sst [smem:[#allocation24]] (%p5794_p6), %s5083_s25  ;;  %s489_s8 = sshll.u32 %s5084_s1, 4  ;;  %s490_s8 = int_to_ptr.vmem [resolvable:$true] %s489_s8 }
 0x10a   : > { %4489 = sst [smem:[#allocation24 + $0x1]] (%p5795_p5), %s5083_s25  ;;  %s5085_s2 = smov 7  }
 0x10b   : > { %p5796_p9 = pmov %p5768_p0  ;;  %p5797_p12 = pmov %p5768_p0 }
 0x10c   : > { %p5798_p10 = pmov %p5768_p0  ;;  %p5799_p2 = pmov %p5768_p0 }
 0x10d   : > { %4490 = sst [smem:[#allocation24 + $0x2]] (%p5796_p9), %s5085_s2  ;;  %s5086_s28 = smov 448  }
 0x10e   : > { %4491 = sst [smem:[#allocation24 + $0x3]] (%p5797_p12), %s5070_s16  ;;  %p5800_p3 = pmov %p5768_p0 }
 0x10f   : > { %4492 = sst [smem:[#allocation24 + $0x4]] (%p5798_p10), %s5071_s24  ;;  %p5801_p4 = pmov %p5768_p0 }
 0x110   : > { %4493 = sst [smem:[#allocation24 + $0x5]] (%p5799_p2), %s5072_s14  ;;  %p5802_p7 = pmov %p5768_p0 }
 0x111   : > { %4494 = sst [smem:[#allocation24 + $0x6]] (%p5800_p3), %s5086_s28  ;;  %s5087_s23 = smov [#allocation5 + $0x2]  }
 0x112   : > { %4495 = sst [smem:[#allocation24 + $0x7]] (%p5801_p4), %s5070_s16  ;;  %s5088_s4 = smov [#allocation23]  }
 0x113   : > { %4496 = sst [smem:[#allocation24 + $0x8]] (%p5802_p7), %s5074_s13  ;;  %p5803_p8 = pmov %p5768_p0 }
 0x114   : > { %p5804_p11 = pmov %p5768_p0 }
 0x115   : > { %4497 = dma.general (%p5803_p8), %s5737_s9, 57344, %s490_s8, %s5087_s23, %s5088_s4, [#allocation24], %s5406_s22, 0  }
 0x116   : > { %v4619_v0 = vld [vmem:[#allocation6 + $0x4] ss:$8 sps:$4 sm:$0xff]   ;;  %v4621_v1 = vld [vmem:[#allocation6] ss:$8 sps:$4 sm:$0xff]   ;;  %v4622_v3 = vld [vmem:[#allocation6 + $0x14] ss:$8 sps:$4 sm:$0xff]  }
 0x117   : > { %628 = vmatprep.subr.bf16.mxu0 %v4619_v0  ;;  %v4624_v4 = vld [vmem:[#allocation6 + $0x10] ss:$8 sps:$4 sm:$0xff]   ;;  %v4625_v5 = vld [vmem:[#allocation6 + $0x24] ss:$8 sps:$4 sm:$0xff]   ;;  %v4627_v6 = vld [vmem:[#allocation6 + $0x20] ss:$8 sps:$4 sm:$0xff]  }
 0x118   : > { %629 = vmatpush1.bf16.msra.mxu0 %v4621_v1  ;;  %v4628_v7 = vld [vmem:[#allocation6 + $0x34] ss:$8 sps:$4 sm:$0xff]   ;;  %v4630_v8 = vld [vmem:[#allocation6 + $0x30] ss:$8 sps:$4 sm:$0xff]   ;;  %v4631_v9 = vld [vmem:[#allocation6 + $0x44] ss:$8 sps:$4 sm:$0xff]  }
 0x119   : > { %630 = vmatprep.subr.bf16.mxu0 %v4622_v3  ;;  %v4644_v10 = vld [vmem:[#allocation11 + $0x4] ss:$16 sps:$4 sm:$0xff]   ;;  %v4649_v12 = vld [vmem:[#allocation11] ss:$16 sps:$4 sm:$0xff]   ;;  %v4648_v26 = vld [vmem:[#allocation11 + $0xc] ss:$16 sps:$4 sm:$0xff]  }
 0x11a   : > { %v4633_v11 = vld [vmem:[#allocation6 + $0x40] ss:$8 sps:$4 sm:$0xff]   ;;  %1091 = vmatprep.subr.bf16.mxu1 %v4644_v10  ;;  %v4634_v14 = vld [vmem:[#allocation6 + $0x54] ss:$8 sps:$4 sm:$0xff]   ;;  %v4636_v17 = vld [vmem:[#allocation6 + $0x50] ss:$8 sps:$4 sm:$0xff]  }
 0x11b   : > { %v4650_v13 = vld [vmem:[#allocation11 + $0x24] ss:$16 sps:$4 sm:$0xff]   ;;  %1092 = vmatpush1.bf16.msra.mxu1 %v4649_v12  ;;  %v4655_v15 = vld [vmem:[#allocation11 + $0x20] ss:$16 sps:$4 sm:$0xff]   ;;  %v4646_v30 = vld [vmem:[#allocation11 + $0x8] ss:$16 sps:$4 sm:$0xff]  }
 0x11c   : > { %631 = vmatpush1.bf16.msra.mxu0 %v4624_v4  ;;  %1093 = vmatprep.subr.bf16.mxu1 %v4650_v13  ;;  %v4656_v16 = vld [vmem:[#allocation11 + $0x44] ss:$16 sps:$4 sm:$0xff]   ;;  %v4661_v19 = vld [vmem:[#allocation11 + $0x40] ss:$16 sps:$4 sm:$0xff]   ;;  %v4654_v31 = vld [vmem:[#allocation11 + $0x2c] ss:$16 sps:$4 sm:$0xff]  }
 0x11d   : > { %632 = vmatprep.subr.bf16.mxu0 %v4625_v5  ;;  %v4637_v18 = vld [vmem:[#allocation6 + $0x64] ss:$8 sps:$4 sm:$0xff]   ;;  %v4639_v21 = vld [vmem:[#allocation6 + $0x60] ss:$8 sps:$4 sm:$0xff]   ;;  %v4640_v22 = vld [vmem:[#allocation6 + $0x74] ss:$8 sps:$4 sm:$0xff]  }
 0x11e   : > { %v4662_v20 = vld [vmem:[#allocation11 + $0x64] ss:$16 sps:$4 sm:$0xff]   ;;  %v4667_v23 = vld [vmem:[#allocation11 + $0x60] ss:$16 sps:$4 sm:$0xff]   ;;  %v4652_v34 = vld [vmem:[#allocation11 + $0x28] ss:$16 sps:$4 sm:$0xff]  }
 0x11f   : > { %1094 = vmatpush1.bf16.msra.mxu1 %v4655_v15  ;;  %v4668_v24 = vld [vmem:[#allocation11 + $0x84] ss:$16 sps:$4 sm:$0xff]   ;;  %v4673_v27 = vld [vmem:[#allocation11 + $0x80] ss:$16 sps:$4 sm:$0xff]   ;;  %v4660_v35 = vld [vmem:[#allocation11 + $0x4c] ss:$16 sps:$4 sm:$0xff]  }
 0x120   : > { %633 = vmatpush1.bf16.msra.mxu0 %v4627_v6  ;;  %1095 = vmatprep.subr.bf16.mxu1 %v4656_v16  ;;  %v4642_v25 = vld [vmem:[#allocation6 + $0x70] ss:$8 sps:$4 sm:$0xff]   ;;  %v4643_v29 = vld [vmem:[%s5385_s12] sm:$0xff]  }
 0x121   : > { %634 = vmatprep.subr.bf16.mxu0 %v4628_v7  ;;  %v4674_v28 = vld [vmem:[#allocation11 + $0xa4] ss:$16 sps:$4 sm:$0xff]   ;;  %v4679_v32 = vld [vmem:[#allocation11 + $0xa0] ss:$16 sps:$4 sm:$0xff]   ;;  %v4658_v38 = vld [vmem:[#allocation11 + $0x48] ss:$16 sps:$4 sm:$0xff]  }
 0x122   : > { %v4680_v33 = vld [vmem:[#allocation11 + $0xc4] ss:$16 sps:$4 sm:$0xff]   ;;  %v4685_v36 = vld [vmem:[#allocation11 + $0xc0] ss:$16 sps:$4 sm:$0xff]   ;;  %v4666_v39 = vld [vmem:[#allocation11 + $0x6c] ss:$16 sps:$4 sm:$0xff]  }
 0x123   : > { %1096 = vmatpush1.bf16.msra.mxu1 %v4661_v19  ;;  %v4686_v37 = vld [vmem:[#allocation11 + $0xe4] ss:$16 sps:$4 sm:$0xff]   ;;  %v4691_v40 = vld [vmem:[#allocation11 + $0xe0] ss:$16 sps:$4 sm:$0xff]   ;;  %v4664_v42 = vld [vmem:[#allocation11 + $0x68] ss:$16 sps:$4 sm:$0xff]  }
 0x124   : > { %635 = vmatpush1.bf16.msra.mxu0 %v4630_v8  ;;  %1097 = vmatprep.subr.bf16.mxu1 %v4662_v20  ;;  %v4692_v41 = vld [vmem:[#allocation11 + $0x104] ss:$16 sps:$4 sm:$0xff]   ;;  %v4672_v43 = vld [vmem:[#allocation11 + $0x8c] ss:$16 sps:$4 sm:$0xff]   ;;  %v4697_v44 = vld [vmem:[#allocation11 + $0x100] ss:$16 sps:$4 sm:$0xff]  }
 0x125   : > { %636 = vmatprep.subr.bf16.mxu0 %v4631_v9  ;;  %v4670_v45 = vld [vmem:[#allocation11 + $0x88] ss:$16 sps:$4 sm:$0xff]   ;;  %v4698_v46 = vld [vmem:[#allocation11 + $0x124] ss:$16 sps:$4 sm:$0xff]   ;;  %v4678_v47 = vld [vmem:[#allocation11 + $0xac] ss:$16 sps:$4 sm:$0xff]  }
 0x126   : > { %v4703_v48 = vld [vmem:[#allocation11 + $0x120] ss:$16 sps:$4 sm:$0xff]   ;;  %v4704_v49 = vld [vmem:[#allocation11 + $0x144] ss:$16 sps:$4 sm:$0xff]   ;;  %v4676_v50 = vld [vmem:[#allocation11 + $0xa8] ss:$16 sps:$4 sm:$0xff]  }
 0x127   : > { %1098 = vmatpush1.bf16.msra.mxu1 %v4667_v23  ;;  %v4684_v51 = vld [vmem:[#allocation11 + $0xcc] ss:$16 sps:$4 sm:$0xff]   ;;  %v4709_v52 = vld [vmem:[#allocation11 + $0x140] ss:$16 sps:$4 sm:$0xff]   ;;  %v4710_v53 = vld [vmem:[#allocation11 + $0x164] ss:$16 sps:$4 sm:$0xff]  }
 0x128   : > { %637 = vmatpush1.bf16.msra.mxu0 %v4633_v11  ;;  %1099 = vmatprep.subr.bf16.mxu1 %v4668_v24  ;;  %v4682_v54 = vld [vmem:[#allocation11 + $0xc8] ss:$16 sps:$4 sm:$0xff]   ;;  %v4690_v55 = vld [vmem:[#allocation11 + $0xec] ss:$16 sps:$4 sm:$0xff]   ;;  %v4715_v56 = vld [vmem:[#allocation11 + $0x160] ss:$16 sps:$4 sm:$0xff]  }
 0x129   : > { %638 = vmatprep.subr.bf16.mxu0 %v4634_v14  ;;  %v4716_v57 = vld [vmem:[#allocation11 + $0x184] ss:$16 sps:$4 sm:$0xff]   ;;  %v4688_v58 = vld [vmem:[#allocation11 + $0xe8] ss:$16 sps:$4 sm:$0xff]   ;;  %v4696_v59 = vld [vmem:[#allocation11 + $0x10c] ss:$16 sps:$4 sm:$0xff]  }
 0x12a   : > { %v4721_v60 = vld [vmem:[#allocation11 + $0x180] ss:$16 sps:$4 sm:$0xff]   ;;  %v4694_v61 = vld [vmem:[#allocation11 + $0x108] ss:$16 sps:$4 sm:$0xff]   ;;  %v4702_v62 = vld [vmem:[#allocation11 + $0x12c] ss:$16 sps:$4 sm:$0xff]  }
 0x12b   : > { %1100 = vmatpush1.bf16.msra.mxu1 %v4673_v27  ;;  %v4700_v63 = vld [vmem:[#allocation11 + $0x128] ss:$16 sps:$4 sm:$0xff]   ;;  %v4708_v0 = vld [vmem:[#allocation11 + $0x14c] ss:$16 sps:$4 sm:$0xff]   ;;  %v4722_v6 = vld [vmem:[#allocation11 + $0x1a4] ss:$16 sps:$4 sm:$0xff]  }
 0x12c   : > { %639 = vmatpush1.bf16.msra.mxu0 %v4636_v17  ;;  %1101 = vmatprep.subr.bf16.mxu1 %v4674_v28  ;;  %v4706_v1 = vld [vmem:[#allocation11 + $0x148] ss:$16 sps:$4 sm:$0xff]   ;;  %v4714_v2 = vld [vmem:[#allocation11 + $0x16c] ss:$16 sps:$4 sm:$0xff]   ;;  %v4727_v9 = vld [vmem:[#allocation11 + $0x1a0] ss:$16 sps:$4 sm:$0xff]  }
 0x12d   : > { %640 = vmatprep.subr.bf16.mxu0 %v4637_v18  ;;  %v4712_v3 = vld [vmem:[#allocation11 + $0x168] ss:$16 sps:$4 sm:$0xff]   ;;  %v4720_v4 = vld [vmem:[#allocation11 + $0x18c] ss:$16 sps:$4 sm:$0xff]   ;;  %v4728_v10 = vld [vmem:[#allocation11 + $0x1c4] ss:$16 sps:$4 sm:$0xff]   ;;  %v532_v18 = vlaneseq }
 0x12e   : > { %v4718_v5 = vld [vmem:[#allocation11 + $0x188] ss:$16 sps:$4 sm:$0xff]   ;;  %v4726_v7 = vld [vmem:[#allocation11 + $0x1ac] ss:$16 sps:$4 sm:$0xff]   ;;  %v4733_v13 = vld [vmem:[#allocation11 + $0x1c0] ss:$16 sps:$4 sm:$0xff]  }
 0x12f   : > { %1102 = vmatpush1.bf16.msra.mxu1 %v4679_v32  ;;  %v4724_v8 = vld [vmem:[#allocation11 + $0x1a8] ss:$16 sps:$4 sm:$0xff]   ;;  %v4732_v11 = vld [vmem:[#allocation11 + $0x1cc] ss:$16 sps:$4 sm:$0xff]   ;;  %v4734_v14 = vld [vmem:[#allocation11 + $0x1e4] ss:$16 sps:$4 sm:$0xff]  }
 0x130   : > { %641 = vmatpush1.bf16.msra.mxu0 %v4639_v21  ;;  %1103 = vmatprep.subr.bf16.mxu1 %v4680_v33  ;;  %v4730_v12 = vld [vmem:[#allocation11 + $0x1c8] ss:$16 sps:$4 sm:$0xff]   ;;  %v4738_v16 = vld [vmem:[#allocation11 + $0x1ec] ss:$16 sps:$4 sm:$0xff]   ;;  %v4739_v17 = vld [vmem:[#allocation11 + $0x1e0] ss:$16 sps:$4 sm:$0xff]  }
 0x131   : > { %642 = vmatprep.subr.bf16.mxu0 %v4640_v22  ;;  %v4736_v15 = vld [vmem:[#allocation11 + $0x1e8] ss:$16 sps:$4 sm:$0xff]   ;;  %v5481_v19 = vshrl.u32 %v532_v18, 7  ;;  %v530_v21 = vld [vmem:[#allocation9] sm:$0x3] }
 0x133   : > { %1104 = vmatpush1.bf16.msra.mxu1 %v4685_v36  ;;  %v5484_v20 = vsub.s32 0, %v5481_v19  ;;  %v5487_v22 = vsub.s32 1, %v5481_v19 }
 0x134   : > { %643 = vmatpush1.bf16.msra.mxu0 %v4642_v25  ;;  %1105 = vmatprep.subr.bf16.mxu1 %v4686_v37 }
 0x135   : > { %1134 = vmatprep.subr.bf16.mxu0 %v4648_v26  ;;  %v535_v23 = vrot.slane %v530_v21, %v5484_v20  ;;  %v539_v24 = vrot.slane %v530_v21, %v5487_v22 }
 0x137   : > { %661 = vmatmul.mubr.bf16.vlgmr.msra.gmra.mrb[0].mxu0 %v4643_v29  ;;  %1106 = vmatpush1.bf16.msra.mxu1 %v4691_v40 }
 0x138   : > { %1135 = vmatpush1.bf16.msra.mxu0 %v4646_v30  ;;  %1107 = vmatprep.subr.bf16.mxu1 %v4692_v41 }
 0x139   : > { %1136 = vmatprep.subr.bf16.mxu0 %v4654_v31 }
 0x13b   : > { %1108 = vmatpush1.bf16.msra.mxu1 %v4697_v44  ;;  %v749_v44 = vld [vmem:[#allocation12] sm:$0xf] }
 0x13c   : > { %1137 = vmatpush1.bf16.msra.mxu0 %v4652_v34  ;;  %1109 = vmatprep.subr.bf16.mxu1 %v4698_v46  ;;  %v754_v46 = vrot.slane %v749_v44, %v5484_v20 }
 0x13d   : > { %1138 = vmatprep.subr.bf16.mxu0 %v4660_v35 }
 0x13f   : > { %1110 = vmatpush1.bf16.msra.mxu1 %v4703_v48  ;;  %v758_v48 = vrot.slane %v749_v44, %v5487_v22 }
 0x140   : > { %1139 = vmatpush1.bf16.msra.mxu0 %v4658_v38  ;;  %1111 = vmatprep.subr.bf16.mxu1 %v4704_v49 }
 0x141   : > { %1140 = vmatprep.subr.bf16.mxu0 %v4666_v39 }
 0x143   : > { %1112 = vmatpush1.bf16.msra.mxu1 %v4709_v52 }
 0x144   : > { %1141 = vmatpush1.bf16.msra.mxu0 %v4664_v42  ;;  %1113 = vmatprep.subr.bf16.mxu1 %v4710_v53 }
 0x145   : > { %1142 = vmatprep.subr.bf16.mxu0 %v4672_v43  ;;  %v5492_v43 = vsub.s32 2, %v5481_v19 }
 0x147   : > { %1114 = vmatpush1.bf16.msra.mxu1 %v4715_v56 }
 0x148   : > { %1143 = vmatpush1.bf16.msra.mxu0 %v4670_v45  ;;  %1115 = vmatprep.subr.bf16.mxu1 %v4716_v57  ;;  %v5495_v45 = vsub.s32 3, %v5481_v19 }
 0x149   : > { %1144 = vmatprep.subr.bf16.mxu0 %v4678_v47  ;;  %v762_v47 = vrot.slane %v749_v44, %v5492_v43 }
 0x14a   : > { %v766_v49 = vrot.slane %v749_v44, %v5495_v45 }
 0x14b   : > { %1116 = vmatpush1.bf16.msra.mxu1 %v4721_v60 }
 0x14c   : > { %1145 = vmatpush1.bf16.msra.mxu0 %v4676_v50  ;;  %1117 = vmatprep.subr.bf16.mxu1 %v4722_v6 }
 0x14d   : > { %1146 = vmatprep.subr.bf16.mxu0 %v4684_v51 }
 0x14f   : > { %1118 = vmatpush1.bf16.msra.mxu1 %v4727_v9 }
 0x150   : > { %1147 = vmatpush1.bf16.msra.mxu0 %v4682_v54  ;;  %1119 = vmatprep.subr.bf16.mxu1 %v4728_v10 }
 0x151   : > { %1148 = vmatprep.subr.bf16.mxu0 %v4690_v55 }
 0x153   : > { %1120 = vmatpush1.bf16.msra.mxu1 %v4733_v13 }
 0x154   : > { %1149 = vmatpush1.bf16.msra.mxu0 %v4688_v58  ;;  %1121 = vmatprep.subr.bf16.mxu1 %v4734_v14 }
 0x155   : > { %1150 = vmatprep.subr.bf16.mxu0 %v4696_v59 }
 0x157   : > { %1122 = vmatpush1.bf16.msra.mxu1 %v4739_v17 }
 0x158   : > { %1151 = vmatpush1.bf16.msra.mxu0 %v4694_v61 }
 0x159   : > { %1152 = vmatprep.subr.bf16.mxu0 %v4702_v62 }
 0x15c   : > { %1153 = vmatpush1.bf16.msra.mxu0 %v4700_v63 }
 0x15d   : > { %1154 = vmatprep.subr.bf16.mxu0 %v4708_v0 }
 0x160   : > { %1155 = vmatpush1.bf16.msra.mxu0 %v4706_v1 }
 0x161   : > { %1156 = vmatprep.subr.bf16.mxu0 %v4714_v2 }
 0x164   : > { %1157 = vmatpush1.bf16.msra.mxu0 %v4712_v3 }
 0x165   : > { %1158 = vmatprep.subr.bf16.mxu0 %v4720_v4 }
 0x168   : > { %1159 = vmatpush1.bf16.msra.mxu0 %v4718_v5 }
 0x169   : > { %1160 = vmatprep.subr.bf16.mxu0 %v4726_v7 }
 0x16c   : > { %1161 = vmatpush1.bf16.msra.mxu0 %v4724_v8 }
 0x16d   : > { %1162 = vmatprep.subr.bf16.mxu0 %v4732_v11 }
 0x170   : > { %1163 = vmatpush1.bf16.msra.mxu0 %v4730_v12 }
 0x171   : > { %1164 = vmatprep.subr.bf16.mxu0 %v4738_v16 }
 0x174   : > { %1165 = vmatpush1.bf16.msra.mxu0 %v4736_v15 }
 0x20a   : > { %v662_v25 = vpop.f32.mrb[0].mxu0 }
 0x20b   : > { %v663_v26 = vadd.f32 %v662_v25, %v535_v23  ;;  %v664_v27 = vpop.f32.mrb[1].mxu0 }
 0x20c   : > { %v665_v28 = vadd.f32 %v664_v27, %v539_v24  ;;  %v666_v29 = vpop.f32.mrb[2].mxu0 }
 0x20d   : > { %v675_v30 = vmul.f32 0.2, %v663_v26  ;;  %v667_v31 = vadd.f32 %v666_v29, %v535_v23  ;;  %v668_v32 = vpop.f32.mrb[3].mxu0  ;;  %vm671_vm0 = vcmp.gt.f32.partialorder %v663_v26, 0.0 }
 0x20e   : > { %v676_v33 = vmul.f32 0.2, %v665_v28  ;;  %v669_v34 = vadd.f32 %v668_v32, %v539_v24  ;;  %vm672_vm2 = vcmp.gt.f32.partialorder %v665_v28, 0.0 }
 0x20f   : > { %vm673_vm1 = vcmp.gt.f32.partialorder %v667_v31, 0.0  ;;  %v677_v35 = vmul.f32 0.2, %v667_v31  ;;  %v679_v37 = vsel %vm671_vm0, %v663_v26, %v675_v30 }
 0x210   : > { %v678_v36 = vmul.f32 0.2, %v669_v34  ;;  %vm674_vm3 = vcmp.gt.f32.partialorder %v669_v34, 0.0  ;;  %v680_v39 = vsel %vm672_vm2, %v665_v28, %v676_v33 }
 0x211   : > { %v681_v38 = vsel %vm673_vm1, %v667_v31, %v677_v35 }
 0x212   : > { %v682_v40 = vsel %vm674_vm3, %v669_v34, %v678_v36  ;;  %v683_v41 = vpack.c.bf16 %v681_v38, %v679_v37 }
 0x213   : > { %v684_v42 = vpack.c.bf16 %v682_v40, %v680_v39 }
 0x215   : > { %1123 = vmatprep.mubr.bf16.mxu1 %v684_v42  ;;  %1166 = vmatprep.mubr.bf16.mxu0 %v684_v42 }
 0x216   : > { %1124 = vmatmul.mubr.bf16.vlgmr.msra.gmra.mrb[0].mxu1 %v683_v41  ;;  %1167 = vmatmul.mubr.bf16.vlgmr.msra.gmra.mrb[4].mxu0 %v683_v41 }
 0x2e9   : > { %v1125_v50 = vpop.f32.mrb[0].mxu1  ;;  %v1168_v51 = vpop.f32.mrb[4].mxu0 }
 0x2ea   : > { %v1126_v52 = vadd.f32 %v1125_v50, %v754_v46  ;;  %v1169_v53 = vadd.f32 %v1168_v51, %v762_v47  ;;  %v1127_v54 = vpop.f32.mrb[1].mxu1  ;;  %v1170_v55 = vpop.f32.mrb[5].mxu0 }
 0x2eb   : > { %v1128_v56 = vadd.f32 %v1127_v54, %v758_v48  ;;  %v1171_v57 = vadd.f32 %v1170_v55, %v766_v49  ;;  %v1129_v58 = vpop.f32.mrb[2].mxu1  ;;  %v1172_v59 = vpop.f32.mrb[6].mxu0 }
 0x2ec   : > { %vm1177_vm4 = vcmp.gt.f32.partialorder %v1126_v52, 0.0  ;;  %v1185_v60 = vmul.f32 0.2, %v1126_v52  ;;  %vm1179_vm5 = vcmp.gt.f32.partialorder %v1169_v53, 0.0  ;;  %v1187_v61 = vmul.f32 0.2, %v1169_v53 }
 0x2ed   : > { %vm1178_vm6 = vcmp.gt.f32.partialorder %v1128_v56, 0.0  ;;  %v1186_v62 = vmul.f32 0.2, %v1128_v56  ;;  %vm1180_vm7 = vcmp.gt.f32.partialorder %v1171_v57, 0.0  ;;  %v1188_v63 = vmul.f32 0.2, %v1171_v57 }
 0x2ee   : > { %v1130_v0 = vadd.f32 %v1129_v58, %v754_v46  ;;  %v1173_v1 = vadd.f32 %v1172_v59, %v762_v47  ;;  %v1131_v2 = vpop.f32.mrb[3].mxu1  ;;  %v1174_v3 = vpop.f32.mrb[7].mxu0  ;;  %v1193_v4 = vsel %vm1177_vm4, %v1126_v52, %v1185_v60  ;;  %v1195_v5 = vsel %vm1179_vm5, %v1169_v53, %v1187_v61 }
 0x2ef   : > { %v1132_v6 = vadd.f32 %v1131_v2, %v758_v48  ;;  %v1175_v7 = vadd.f32 %v1174_v3, %v766_v49  ;;  %v1194_v12 = vsel %vm1178_vm6, %v1128_v56, %v1186_v62  ;;  %v1196_v13 = vsel %vm1180_vm7, %v1171_v57, %v1188_v63 }
 0x2f0   : > { %vm1181_vm8 = vcmp.gt.f32.partialorder %v1130_v0, 0.0  ;;  %v1189_v8 = vmul.f32 0.2, %v1130_v0  ;;  %vm1183_vm9 = vcmp.gt.f32.partialorder %v1173_v1, 0.0  ;;  %v1191_v9 = vmul.f32 0.2, %v1173_v1 }
 0x2f1   : > { %vm1182_vm10 = vcmp.gt.f32.partialorder %v1132_v6, 0.0  ;;  %v1190_v10 = vmul.f32 0.2, %v1132_v6  ;;  %vm1184_vm11 = vcmp.gt.f32.partialorder %v1175_v7, 0.0  ;;  %v1192_v11 = vmul.f32 0.2, %v1175_v7 }
 0x2f2   : > { %v1197_v14 = vsel %vm1181_vm8, %v1130_v0, %v1189_v8  ;;  %v1199_v15 = vsel %vm1183_vm9, %v1173_v1, %v1191_v9 }
 0x2f3   : > { %v5503_v16 = vpack.c.bf16 %v1197_v14, %v1193_v4  ;;  %v5505_v17 = vpack.c.bf16 %v1199_v15, %v1195_v5  ;;  %v1198_v18 = vsel %vm1182_vm10, %v1132_v6, %v1190_v10  ;;  %v1200_v21 = vsel %vm1184_vm11, %v1175_v7, %v1192_v11 }
 0x2f4   : > { %v5507_v23 = vpack.c.bf16 %v1198_v18, %v1194_v12  ;;  %v5509_v24 = vpack.c.bf16 %v1200_v21, %v1196_v13 }
 0x2f5   : > { %5025 = dma.done.wait (%p5804_p11), [#allocation5], 24576  ;;  %p5805_p13 = pmov %p5768_p0 }
 0x2f6   : > { %1468 = vmatprep.mubr.bf16.mxu1 %v5507_v23  ;;  %1554 = vmatprep.mubr.bf16.mxu0 %v5507_v23  ;;  %v1213_v25 = vld [vmem:[#allocation2 + $0x8] sm:$0xff]  ;;  %v1212_v26 = vld [vmem:[#allocation2] sm:$0xff]  ;;  %v1219_v27 = vld [vmem:[#allocation2 + $0x38] sm:$0xff]  ;;  %p5806_p1 = pmov %p5768_p0 }
 0x2f7   : > { %5027 = vsyncadd (%p5805_p13), [#allocation5], 4294942720  ;;  %1436 = vmatprep.subr.bf16.mxu1 %v1213_v25  ;;  %v1218_v28 = vld [vmem:[#allocation2 + $0x30] sm:$0xff]  ;;  %v1225_v29 = vld [vmem:[#allocation2 + $0x68] sm:$0xff] }
 0x2f8   : > { %1437 = vmatpush1.bf16.msra.mxu1 %v1212_v26  ;;  %v1224_v30 = vld [vmem:[#allocation2 + $0x60] sm:$0xff]  ;;  %v1231_v31 = vld [vmem:[#allocation2 + $0x98] sm:$0xff]  ;;  %v1230_v33 = vld [vmem:[#allocation2 + $0x90] sm:$0xff] }
 0x2f9   : > { %1438 = vmatprep.subr.bf16.mxu1 %v1219_v27  ;;  %v1215_v32 = vld [vmem:[#allocation2 + $0x18] sm:$0xff]  ;;  %v1214_v34 = vld [vmem:[#allocation2 + $0x10] sm:$0xff]  ;;  %v1221_v35 = vld [vmem:[#allocation2 + $0x48] sm:$0xff] }
 0x2fa   : > { %1522 = vmatprep.subr.bf16.mxu0 %v1215_v32  ;;  %v1237_v36 = vld [vmem:[#allocation2 + $0xc8] sm:$0xff]  ;;  %v1220_v37 = vld [vmem:[#allocation2 + $0x40] sm:$0xff]  ;;  %v1227_v38 = vld [vmem:[#allocation2 + $0x78] sm:$0xff] }
 0x2fb   : > { %1523 = vmatpush1.bf16.msra.mxu0 %v1214_v34  ;;  %v1236_v39 = vld [vmem:[#allocation2 + $0xc0] sm:$0xff]  ;;  %v1243_v40 = vld [vmem:[#allocation2 + $0xf8] sm:$0xff]  ;;  %v1226_v41 = vld [vmem:[#allocation2 + $0x70] sm:$0xff] }
 0x2fc   : > { %1439 = vmatpush1.bf16.msra.mxu1 %v1218_v28  ;;  %1524 = vmatprep.subr.bf16.mxu0 %v1221_v35  ;;  %v1233_v42 = vld [vmem:[#allocation2 + $0xa8] sm:$0xff]  ;;  %v1242_v44 = vld [vmem:[#allocation2 + $0xf0] sm:$0xff]  ;;  %v1232_v47 = vld [vmem:[#allocation2 + $0xa0] sm:$0xff] }
 0x2fd   : > { %1440 = vmatprep.subr.bf16.mxu1 %v1225_v29  ;;  %v1249_v46 = vld [vmem:[#allocation2 + $0x128] sm:$0xff]  ;;  %v1239_v48 = vld [vmem:[#allocation2 + $0xd8] sm:$0xff]  ;;  %v1248_v49 = vld [vmem:[#allocation2 + $0x120] sm:$0xff] }
 0x2fe   : > { %v1255_v50 = vld [vmem:[#allocation2 + $0x158] sm:$0xff]  ;;  %v1238_v51 = vld [vmem:[#allocation2 + $0xd0] sm:$0xff]  ;;  %v1245_v52 = vld [vmem:[#allocation2 + $0x108] sm:$0xff] }
 0x2ff   : > { %1525 = vmatpush1.bf16.msra.mxu0 %v1220_v37  ;;  %v1254_v53 = vld [vmem:[#allocation2 + $0x150] sm:$0xff]  ;;  %v1261_v54 = vld [vmem:[#allocation2 + $0x188] sm:$0xff]  ;;  %v1244_v55 = vld [vmem:[#allocation2 + $0x100] sm:$0xff] }
 0x300   : > { %1441 = vmatpush1.bf16.msra.mxu1 %v1224_v30  ;;  %1526 = vmatprep.subr.bf16.mxu0 %v1227_v38  ;;  %v1251_v56 = vld [vmem:[#allocation2 + $0x138] sm:$0xff]  ;;  %v1260_v57 = vld [vmem:[#allocation2 + $0x180] sm:$0xff]  ;;  %v1250_v59 = vld [vmem:[#allocation2 + $0x130] sm:$0xff] }
 0x301   : > { %1442 = vmatprep.subr.bf16.mxu1 %v1231_v31  ;;  %v1267_v58 = vld [vmem:[#allocation2 + $0x1b8] sm:$0xff]  ;;  %v1257_v60 = vld [vmem:[#allocation2 + $0x168] sm:$0xff]  ;;  %v1266_v61 = vld [vmem:[#allocation2 + $0x1b0] sm:$0xff] }
 0x302   : > { %v1273_v62 = vld [vmem:[#allocation2 + $0x1e8] sm:$0xff]  ;;  %v1256_v63 = vld [vmem:[#allocation2 + $0x160] sm:$0xff]  ;;  %v1263_v0 = vld [vmem:[#allocation2 + $0x198] sm:$0xff] }
 0x303   : > { %1527 = vmatpush1.bf16.msra.mxu0 %v1226_v41  ;;  %v1272_v1 = vld [vmem:[#allocation2 + $0x1e0] sm:$0xff]  ;;  %v1279_v2 = vld [vmem:[#allocation2 + $0x218] sm:$0xff]  ;;  %v1262_v3 = vld [vmem:[#allocation2 + $0x190] sm:$0xff] }
 0x304   : > { %1443 = vmatpush1.bf16.msra.mxu1 %v1230_v33  ;;  %1528 = vmatprep.subr.bf16.mxu0 %v1233_v42  ;;  %v1269_v4 = vld [vmem:[#allocation2 + $0x1c8] sm:$0xff]  ;;  %v1278_v5 = vld [vmem:[#allocation2 + $0x210] sm:$0xff]  ;;  %v1268_v7 = vld [vmem:[#allocation2 + $0x1c0] sm:$0xff] }
 0x305   : > { %1444 = vmatprep.subr.bf16.mxu1 %v1237_v36  ;;  %v1285_v6 = vld [vmem:[#allocation2 + $0x248] sm:$0xff]  ;;  %v1275_v8 = vld [vmem:[#allocation2 + $0x1f8] sm:$0xff]  ;;  %v1284_v9 = vld [vmem:[#allocation2 + $0x240] sm:$0xff] }
 0x306   : > { %v1291_v10 = vld [vmem:[#allocation2 + $0x278] sm:$0xff]  ;;  %v1274_v11 = vld [vmem:[#allocation2 + $0x1f0] sm:$0xff]  ;;  %v1281_v12 = vld [vmem:[#allocation2 + $0x228] sm:$0xff] }
 0x307   : > { %1529 = vmatpush1.bf16.msra.mxu0 %v1232_v47  ;;  %v1290_v13 = vld [vmem:[#allocation2 + $0x270] sm:$0xff]  ;;  %v1297_v14 = vld [vmem:[#allocation2 + $0x2a8] sm:$0xff]  ;;  %v1280_v15 = vld [vmem:[#allocation2 + $0x220] sm:$0xff] }
 0x308   : > { %1445 = vmatpush1.bf16.msra.mxu1 %v1236_v39  ;;  %1530 = vmatprep.subr.bf16.mxu0 %v1239_v48  ;;  %v1287_v18 = vld [vmem:[#allocation2 + $0x258] sm:$0xff]  ;;  %v1296_v21 = vld [vmem:[#allocation2 + $0x2a0] sm:$0xff]  ;;  %v1286_v26 = vld [vmem:[#allocation2 + $0x250] sm:$0xff] }
 0x309   : > { %1446 = vmatprep.subr.bf16.mxu1 %v1243_v40  ;;  %v1303_v25 = vld [vmem:[#allocation2 + $0x2d8] sm:$0xff]  ;;  %v1293_v27 = vld [vmem:[#allocation2 + $0x288] sm:$0xff]  ;;  %v1302_v28 = vld [vmem:[#allocation2 + $0x2d0] sm:$0xff] }
 0x30a   : > { %v1309_v29 = vld [vmem:[#allocation2 + $0x308] sm:$0xff]  ;;  %v1292_v30 = vld [vmem:[#allocation2 + $0x280] sm:$0xff]  ;;  %v1299_v31 = vld [vmem:[#allocation2 + $0x2b8] sm:$0xff] }
 0x30b   : > { %1531 = vmatpush1.bf16.msra.mxu0 %v1238_v51  ;;  %v1308_v32 = vld [vmem:[#allocation2 + $0x300] sm:$0xff]  ;;  %v1315_v33 = vld [vmem:[#allocation2 + $0x338] sm:$0xff]  ;;  %v1298_v34 = vld [vmem:[#allocation2 + $0x2b0] sm:$0xff] }
 0x30c   : > { %1447 = vmatpush1.bf16.msra.mxu1 %v1242_v44  ;;  %1532 = vmatprep.subr.bf16.mxu0 %v1245_v52  ;;  %v1305_v35 = vld [vmem:[#allocation2 + $0x2e8] sm:$0xff]  ;;  %v1314_v36 = vld [vmem:[#allocation2 + $0x330] sm:$0xff]  ;;  %v1304_v38 = vld [vmem:[#allocation2 + $0x2e0] sm:$0xff] }
 0x30d   : > { %1448 = vmatprep.subr.bf16.mxu1 %v1249_v46  ;;  %v1321_v37 = vld [vmem:[#allocation2 + $0x368] sm:$0xff]  ;;  %v1311_v39 = vld [vmem:[#allocation2 + $0x318] sm:$0xff]  ;;  %v1320_v40 = vld [vmem:[#allocation2 + $0x360] sm:$0xff] }
 0x30e   : > { %v1327_v41 = vld [vmem:[#allocation2 + $0x398] sm:$0xff]  ;;  %v1310_v42 = vld [vmem:[#allocation2 + $0x310] sm:$0xff]  ;;  %v1317_v44 = vld [vmem:[#allocation2 + $0x348] sm:$0xff] }
 0x30f   : > { %1533 = vmatpush1.bf16.msra.mxu0 %v1244_v55  ;;  %v1326_v46 = vld [vmem:[#allocation2 + $0x390] sm:$0xff]  ;;  %v1333_v47 = vld [vmem:[#allocation2 + $0x3c8] sm:$0xff]  ;;  %v1316_v48 = vld [vmem:[#allocation2 + $0x340] sm:$0xff] }
 0x310   : > { %1449 = vmatpush1.bf16.msra.mxu1 %v1248_v49  ;;  %1534 = vmatprep.subr.bf16.mxu0 %v1251_v56  ;;  %v1323_v49 = vld [vmem:[#allocation2 + $0x378] sm:$0xff]  ;;  %v1322_v52 = vld [vmem:[#allocation2 + $0x370] sm:$0xff]  ;;  %v1345_v55 = vld [vmem:[#allocation2 + $0x428] sm:$0xff] }
 0x311   : > { %1450 = vmatprep.subr.bf16.mxu1 %v1255_v50  ;;  %v1332_v50 = vld [vmem:[#allocation2 + $0x3c0] sm:$0xff]  ;;  %v1339_v51 = vld [vmem:[#allocation2 + $0x3f8] sm:$0xff] }
 0x312   : > { %v1328_v56 = vld [vmem:[#allocation2 + $0x3a0] sm:$0xff] }
 0x313   : > { %1535 = vmatpush1.bf16.msra.mxu0 %v1250_v59  ;;  %v1351_v59 = vld [vmem:[#allocation2 + $0x458] sm:$0xff] }
 0x314   : > { %1451 = vmatpush1.bf16.msra.mxu1 %v1254_v53  ;;  %1536 = vmatprep.subr.bf16.mxu0 %v1257_v60  ;;  %v1329_v53 = vld [vmem:[#allocation2 + $0x3a8] sm:$0xff]  ;;  %v1334_v60 = vld [vmem:[#allocation2 + $0x3d0] sm:$0xff] }
 0x315   : > { %1452 = vmatprep.subr.bf16.mxu1 %v1261_v54  ;;  %v1338_v54 = vld [vmem:[#allocation2 + $0x3f0] sm:$0xff] }
 0x317   : > { %1537 = vmatpush1.bf16.msra.mxu0 %v1256_v63  ;;  %v1357_v63 = vld [vmem:[#allocation2 + $0x488] sm:$0xff] }
 0x318   : > { %1453 = vmatpush1.bf16.msra.mxu1 %v1260_v57  ;;  %1538 = vmatprep.subr.bf16.mxu0 %v1263_v0  ;;  %v1335_v57 = vld [vmem:[#allocation2 + $0x3d8] sm:$0xff]  ;;  %v1340_v0 = vld [vmem:[#allocation2 + $0x400] sm:$0xff] }
 0x319   : > { %1454 = vmatprep.subr.bf16.mxu1 %v1267_v58  ;;  %v1344_v58 = vld [vmem:[#allocation2 + $0x420] sm:$0xff] }
 0x31b   : > { %1539 = vmatpush1.bf16.msra.mxu0 %v1262_v3  ;;  %v1363_v3 = vld [vmem:[#allocation2 + $0x4b8] sm:$0xff] }
 0x31c   : > { %1455 = vmatpush1.bf16.msra.mxu1 %v1266_v61  ;;  %1540 = vmatprep.subr.bf16.mxu0 %v1269_v4  ;;  %v1341_v61 = vld [vmem:[#allocation2 + $0x408] sm:$0xff]  ;;  %v1346_v4 = vld [vmem:[#allocation2 + $0x430] sm:$0xff] }
 0x31d   : > { %1456 = vmatprep.subr.bf16.mxu1 %v1273_v62  ;;  %v1350_v62 = vld [vmem:[#allocation2 + $0x450] sm:$0xff] }
 0x31f   : > { %1541 = vmatpush1.bf16.msra.mxu0 %v1268_v7  ;;  %v1369_v7 = vld [vmem:[#allocation2 + $0x4e8] sm:$0xff] }
 0x320   : > { %1457 = vmatpush1.bf16.msra.mxu1 %v1272_v1  ;;  %1542 = vmatprep.subr.bf16.mxu0 %v1275_v8  ;;  %v1347_v1 = vld [vmem:[#allocation2 + $0x438] sm:$0xff]  ;;  %v1352_v8 = vld [vmem:[#allocation2 + $0x460] sm:$0xff] }
 0x321   : > { %1458 = vmatprep.subr.bf16.mxu1 %v1279_v2  ;;  %v1356_v2 = vld [vmem:[#allocation2 + $0x480] sm:$0xff] }
 0x323   : > { %1543 = vmatpush1.bf16.msra.mxu0 %v1274_v11  ;;  %v1375_v11 = vld [vmem:[#allocation2 + $0x518] sm:$0xff] }
 0x324   : > { %1459 = vmatpush1.bf16.msra.mxu1 %v1278_v5  ;;  %1544 = vmatprep.subr.bf16.mxu0 %v1281_v12  ;;  %v1353_v5 = vld [vmem:[#allocation2 + $0x468] sm:$0xff]  ;;  %v1358_v12 = vld [vmem:[#allocation2 + $0x490] sm:$0xff] }
 0x325   : > { %1460 = vmatprep.subr.bf16.mxu1 %v1285_v6  ;;  %v1362_v6 = vld [vmem:[#allocation2 + $0x4b0] sm:$0xff] }
 0x327   : > { %1545 = vmatpush1.bf16.msra.mxu0 %v1280_v15  ;;  %v1381_v15 = vld [vmem:[#allocation2 + $0x548] sm:$0xff] }
 0x328   : > { %1461 = vmatpush1.bf16.msra.mxu1 %v1284_v9  ;;  %1546 = vmatprep.subr.bf16.mxu0 %v1287_v18  ;;  %v1359_v9 = vld [vmem:[#allocation2 + $0x498] sm:$0xff]  ;;  %v1364_v18 = vld [vmem:[#allocation2 + $0x4c0] sm:$0xff] }
 0x329   : > { %1462 = vmatprep.subr.bf16.mxu1 %v1291_v10  ;;  %v1368_v10 = vld [vmem:[#allocation2 + $0x4e0] sm:$0xff] }
 0x32b   : > { %1547 = vmatpush1.bf16.msra.mxu0 %v1286_v26  ;;  %v1387_v26 = vld [vmem:[#allocation2 + $0x578] sm:$0xff] }
 0x32c   : > { %1463 = vmatpush1.bf16.msra.mxu1 %v1290_v13  ;;  %1548 = vmatprep.subr.bf16.mxu0 %v1293_v27  ;;  %v1365_v13 = vld [vmem:[#allocation2 + $0x4c8] sm:$0xff]  ;;  %v1370_v27 = vld [vmem:[#allocation2 + $0x4f0] sm:$0xff] }
 0x32d   : > { %1464 = vmatprep.subr.bf16.mxu1 %v1297_v14  ;;  %v1374_v14 = vld [vmem:[#allocation2 + $0x510] sm:$0xff] }
 0x32f   : > { %1549 = vmatpush1.bf16.msra.mxu0 %v1292_v30  ;;  %v1393_v30 = vld [vmem:[#allocation2 + $0x5a8] sm:$0xff] }
 0x330   : > { %1465 = vmatpush1.bf16.msra.mxu1 %v1296_v21  ;;  %1550 = vmatprep.subr.bf16.mxu0 %v1299_v31  ;;  %v1371_v21 = vld [vmem:[#allocation2 + $0x4f8] sm:$0xff]  ;;  %v1376_v31 = vld [vmem:[#allocation2 + $0x520] sm:$0xff] }
 0x331   : > { %1466 = vmatprep.subr.bf16.mxu1 %v1303_v25  ;;  %v1380_v25 = vld [vmem:[#allocation2 + $0x540] sm:$0xff] }
 0x333   : > { %1551 = vmatpush1.bf16.msra.mxu0 %v1298_v34  ;;  %v1399_v34 = vld [vmem:[#allocation2 + $0x5d8] sm:$0xff] }
 0x334   : > { %1467 = vmatpush1.bf16.msra.mxu1 %v1302_v28  ;;  %1552 = vmatprep.subr.bf16.mxu0 %v1305_v35  ;;  %v1377_v28 = vld [vmem:[#allocation2 + $0x528] sm:$0xff]  ;;  %v1382_v35 = vld [vmem:[#allocation2 + $0x550] sm:$0xff] }
 0x335   : > { %1479 = vmatprep.subr.bf16.mxu1 %v1309_v29  ;;  %v1386_v29 = vld [vmem:[#allocation2 + $0x570] sm:$0xff] }
 0x337   : > { %1469 = vmatmul.mubr.bf16.vlgmr.msra.gmra.mrb[4].mxu1 %v5503_v16  ;;  %1553 = vmatpush1.bf16.msra.mxu0 %v1304_v38  ;;  %v1217_v38 = vld [vmem:[#allocation2 + $0x28] sm:$0xff] }
 0x338   : > { %1480 = vmatpush1.bf16.msra.mxu1 %v1308_v32  ;;  %1511 = vmatprep.mubr.bf16.mxu1 %v5509_v24  ;;  %v1383_v32 = vld [vmem:[#allocation2 + $0x558] sm:$0xff] }
 0x339   : > { %1481 = vmatprep.subr.bf16.mxu1 %v1315_v33  ;;  %1565 = vmatprep.subr.bf16.mxu0 %v1311_v39  ;;  %v1392_v33 = vld [vmem:[#allocation2 + $0x5a0] sm:$0xff] }
 0x33a   : > { %1555 = vmatmul.mubr.bf16.vlgmr.msra.gmra.mrb[8].mxu0 %v5503_v16  ;;  %v1388_v39 = vld [vmem:[#allocation2 + $0x580] sm:$0xff] }
 0x33b   : > { %1566 = vmatpush1.bf16.msra.mxu0 %v1310_v42  ;;  %1597 = vmatprep.mubr.bf16.mxu0 %v5509_v24  ;;  %v1223_v42 = vld [vmem:[#allocation2 + $0x58] sm:$0xff] }
 0x33c   : > { %1482 = vmatpush1.bf16.msra.mxu1 %v1314_v36  ;;  %1567 = vmatprep.subr.bf16.mxu0 %v1317_v44  ;;  %v1389_v36 = vld [vmem:[#allocation2 + $0x588] sm:$0xff]  ;;  %v1394_v44 = vld [vmem:[#allocation2 + $0x5b0] sm:$0xff] }
 0x33d   : > { %1483 = vmatprep.subr.bf16.mxu1 %v1321_v37  ;;  %v1398_v37 = vld [vmem:[#allocation2 + $0x5d0] sm:$0xff] }
 0x33f   : > { %1568 = vmatpush1.bf16.msra.mxu0 %v1316_v48  ;;  %v1229_v48 = vld [vmem:[#allocation2 + $0x88] sm:$0xff] }
 0x340   : > { %1484 = vmatpush1.bf16.msra.mxu1 %v1320_v40  ;;  %1569 = vmatprep.subr.bf16.mxu0 %v1323_v49  ;;  %v1395_v40 = vld [vmem:[#allocation2 + $0x5b8] sm:$0xff]  ;;  %v1400_v49 = vld [vmem:[#allocation2 + $0x5e0] sm:$0xff] }
 0x341   : > { %1485 = vmatprep.subr.bf16.mxu1 %v1327_v41  ;;  %v1216_v41 = vld [vmem:[#allocation2 + $0x20] sm:$0xff] }
 0x343   : > { %1570 = vmatpush1.bf16.msra.mxu0 %v1322_v52  ;;  %v1234_v52 = vld [vmem:[#allocation2 + $0xb0] sm:$0xff] }
 0x344   : > { %1486 = vmatpush1.bf16.msra.mxu1 %v1326_v46  ;;  %1571 = vmatprep.subr.bf16.mxu0 %v1329_v53  ;;  %v1401_v46 = vld [vmem:[#allocation2 + $0x5e8] sm:$0xff] }
 0x345   : > { %1487 = vmatprep.subr.bf16.mxu1 %v1333_v47  ;;  %v1222_v47 = vld [vmem:[#allocation2 + $0x50] sm:$0xff]  ;;  %v1241_v53 = vld [vmem:[#allocation2 + $0xe8] sm:$0xff] }
 0x347   : > { %1572 = vmatpush1.bf16.msra.mxu0 %v1328_v56  ;;  %v1253_v56 = vld [vmem:[#allocation2 + $0x148] sm:$0xff] }
 0x348   : > { %1488 = vmatpush1.bf16.msra.mxu1 %v1332_v50  ;;  %1573 = vmatprep.subr.bf16.mxu0 %v1335_v57  ;;  %v1228_v50 = vld [vmem:[#allocation2 + $0x80] sm:$0xff] }
 0x349   : > { %1489 = vmatprep.subr.bf16.mxu1 %v1339_v51  ;;  %v1235_v51 = vld [vmem:[#allocation2 + $0xb8] sm:$0xff]  ;;  %v1252_v57 = vld [vmem:[#allocation2 + $0x140] sm:$0xff] }
 0x34b   : > { %1574 = vmatpush1.bf16.msra.mxu0 %v1334_v60  ;;  %v1265_v60 = vld [vmem:[#allocation2 + $0x1a8] sm:$0xff] }
 0x34c   : > { %1490 = vmatpush1.bf16.msra.mxu1 %v1338_v54  ;;  %1575 = vmatprep.subr.bf16.mxu0 %v1341_v61  ;;  %v1247_v54 = vld [vmem:[#allocation2 + $0x118] sm:$0xff]  ;;  %v1264_v61 = vld [vmem:[#allocation2 + $0x1a0] sm:$0xff] }
 0x34d   : > { %1491 = vmatprep.subr.bf16.mxu1 %v1345_v55  ;;  %v1246_v55 = vld [vmem:[#allocation2 + $0x110] sm:$0xff] }
 0x34f   : > { %1576 = vmatpush1.bf16.msra.mxu0 %v1340_v0  ;;  %v1277_v0 = vld [vmem:[#allocation2 + $0x208] sm:$0xff] }
 0x350   : > { %1492 = vmatpush1.bf16.msra.mxu1 %v1344_v58  ;;  %1577 = vmatprep.subr.bf16.mxu0 %v1347_v1  ;;  %v1259_v58 = vld [vmem:[#allocation2 + $0x178] sm:$0xff]  ;;  %v1276_v1 = vld [vmem:[#allocation2 + $0x200] sm:$0xff] }
 0x351   : > { %1493 = vmatprep.subr.bf16.mxu1 %v1351_v59  ;;  %v1258_v59 = vld [vmem:[#allocation2 + $0x170] sm:$0xff] }
 0x353   : > { %1578 = vmatpush1.bf16.msra.mxu0 %v1346_v4  ;;  %v1289_v4 = vld [vmem:[#allocation2 + $0x268] sm:$0xff] }
 0x354   : > { %1494 = vmatpush1.bf16.msra.mxu1 %v1350_v62  ;;  %1579 = vmatprep.subr.bf16.mxu0 %v1353_v5  ;;  %v1271_v62 = vld [vmem:[#allocation2 + $0x1d8] sm:$0xff]  ;;  %v1288_v5 = vld [vmem:[#allocation2 + $0x260] sm:$0xff] }
 0x355   : > { %1495 = vmatprep.subr.bf16.mxu1 %v1357_v63  ;;  %v1270_v63 = vld [vmem:[#allocation2 + $0x1d0] sm:$0xff] }
 0x357   : > { %1580 = vmatpush1.bf16.msra.mxu0 %v1352_v8  ;;  %v1301_v8 = vld [vmem:[#allocation2 + $0x2c8] sm:$0xff] }
 0x358   : > { %1496 = vmatpush1.bf16.msra.mxu1 %v1356_v2  ;;  %1581 = vmatprep.subr.bf16.mxu0 %v1359_v9  ;;  %v1283_v2 = vld [vmem:[#allocation2 + $0x238] sm:$0xff]  ;;  %v1300_v9 = vld [vmem:[#allocation2 + $0x2c0] sm:$0xff] }
 0x359   : > { %1497 = vmatprep.subr.bf16.mxu1 %v1363_v3  ;;  %v1282_v3 = vld [vmem:[#allocation2 + $0x230] sm:$0xff] }
 0x35b   : > { %1582 = vmatpush1.bf16.msra.mxu0 %v1358_v12  ;;  %v1313_v12 = vld [vmem:[#allocation2 + $0x328] sm:$0xff] }
 0x35c   : > { %1498 = vmatpush1.bf16.msra.mxu1 %v1362_v6  ;;  %1583 = vmatprep.subr.bf16.mxu0 %v1365_v13  ;;  %v1295_v6 = vld [vmem:[#allocation2 + $0x298] sm:$0xff]  ;;  %v1312_v13 = vld [vmem:[#allocation2 + $0x320] sm:$0xff] }
 0x35d   : > { %1499 = vmatprep.subr.bf16.mxu1 %v1369_v7  ;;  %v1294_v7 = vld [vmem:[#allocation2 + $0x290] sm:$0xff] }
 0x35f   : > { %1584 = vmatpush1.bf16.msra.mxu0 %v1364_v18  ;;  %v1325_v18 = vld [vmem:[#allocation2 + $0x388] sm:$0xff] }
 0x360   : > { %1500 = vmatpush1.bf16.msra.mxu1 %v1368_v10  ;;  %1585 = vmatprep.subr.bf16.mxu0 %v1371_v21  ;;  %v1307_v10 = vld [vmem:[#allocation2 + $0x2f8] sm:$0xff]  ;;  %v1324_v21 = vld [vmem:[#allocation2 + $0x380] sm:$0xff] }
 0x361   : > { %1501 = vmatprep.subr.bf16.mxu1 %v1375_v11  ;;  %v1306_v11 = vld [vmem:[#allocation2 + $0x2f0] sm:$0xff] }
 0x363   : > { %1586 = vmatpush1.bf16.msra.mxu0 %v1370_v27  ;;  %v1337_v27 = vld [vmem:[#allocation2 + $0x3e8] sm:$0xff] }
 0x364   : > { %1502 = vmatpush1.bf16.msra.mxu1 %v1374_v14  ;;  %1587 = vmatprep.subr.bf16.mxu0 %v1377_v28  ;;  %v1319_v14 = vld [vmem:[#allocation2 + $0x358] sm:$0xff]  ;;  %v1336_v28 = vld [vmem:[#allocation2 + $0x3e0] sm:$0xff] }
 0x365   : > { %1503 = vmatprep.subr.bf16.mxu1 %v1381_v15  ;;  %v1318_v15 = vld [vmem:[#allocation2 + $0x350] sm:$0xff] }
 0x367   : > { %1588 = vmatpush1.bf16.msra.mxu0 %v1376_v31  ;;  %v1355_v31 = vld [vmem:[#allocation2 + $0x478] sm:$0xff] }
 0x368   : > { %1504 = vmatpush1.bf16.msra.mxu1 %v1380_v25  ;;  %1589 = vmatprep.subr.bf16.mxu0 %v1383_v32  ;;  %v1331_v25 = vld [vmem:[#allocation2 + $0x3b8] sm:$0xff]  ;;  %v1354_v32 = vld [vmem:[#allocation2 + $0x470] sm:$0xff] }
 0x369   : > { %1505 = vmatprep.subr.bf16.mxu1 %v1387_v26  ;;  %v1330_v26 = vld [vmem:[#allocation2 + $0x3b0] sm:$0xff] }
 0x36b   : > { %1590 = vmatpush1.bf16.msra.mxu0 %v1382_v35  ;;  %v1367_v35 = vld [vmem:[#allocation2 + $0x4d8] sm:$0xff] }
 0x36c   : > { %1506 = vmatpush1.bf16.msra.mxu1 %v1386_v29  ;;  %1591 = vmatprep.subr.bf16.mxu0 %v1389_v36  ;;  %v1343_v29 = vld [vmem:[#allocation2 + $0x418] sm:$0xff]  ;;  %v1366_v36 = vld [vmem:[#allocation2 + $0x4d0] sm:$0xff] }
 0x36d   : > { %1507 = vmatprep.subr.bf16.mxu1 %v1393_v30  ;;  %v1349_v30 = vld [vmem:[#allocation2 + $0x448] sm:$0xff] }
 0x36f   : > { %1592 = vmatpush1.bf16.msra.mxu0 %v1388_v39  ;;  %v1379_v39 = vld [vmem:[#allocation2 + $0x538] sm:$0xff] }
 0x370   : > { %1508 = vmatpush1.bf16.msra.mxu1 %v1392_v33  ;;  %1593 = vmatprep.subr.bf16.mxu0 %v1395_v40  ;;  %v1361_v33 = vld [vmem:[#allocation2 + $0x4a8] sm:$0xff]  ;;  %v1378_v40 = vld [vmem:[#allocation2 + $0x530] sm:$0xff] }
 0x371   : > { %1509 = vmatprep.subr.bf16.mxu1 %v1399_v34  ;;  %v1360_v34 = vld [vmem:[#allocation2 + $0x4a0] sm:$0xff] }
 0x373   : > { %1594 = vmatpush1.bf16.msra.mxu0 %v1394_v44  ;;  %v1391_v44 = vld [vmem:[#allocation2 + $0x598] sm:$0xff] }
 0x374   : > { %1510 = vmatpush1.bf16.msra.mxu1 %v1398_v37  ;;  %1595 = vmatprep.subr.bf16.mxu0 %v1401_v46  ;;  %v1373_v37 = vld [vmem:[#allocation2 + $0x508] sm:$0xff]  ;;  %v1390_v46 = vld [vmem:[#allocation2 + $0x590] sm:$0xff] }
 0x375   : > { %1608 = vmatprep.subr.bf16.mxu1 %v1217_v38  ;;  %v1372_v38 = vld [vmem:[#allocation2 + $0x500] sm:$0xff] }
 0x377   : > { %1512 = vmatmul.mubr.bf16.vlgmr.msra.gmra.mrb[4].mxu1 %v5505_v17  ;;  %1596 = vmatpush1.bf16.msra.mxu0 %v1400_v49  ;;  %v1403_v49 = vld [vmem:[#allocation2 + $0x5f8] sm:$0xff] }
 0x378   : > { %1609 = vmatpush1.bf16.msra.mxu1 %v1216_v41  ;;  %1640 = vmatprep.mubr.bf16.mxu1 %v5507_v23  ;;  %v1240_v23 = vld [vmem:[#allocation2 + $0xe0] sm:$0xff]  ;;  %v1385_v41 = vld [vmem:[#allocation2 + $0x568] sm:$0xff] }
 0x379   : > { %1610 = vmatprep.subr.bf16.mxu1 %v1223_v42  ;;  %v1384_v42 = vld [vmem:[#allocation2 + $0x560] sm:$0xff] }
 0x37a   : > { %1598 = vmatmul.mubr.bf16.vlgmr.msra.gmra.mrb[8].mxu0 %v5505_v17 }
 0x37c   : > { %1611 = vmatpush1.bf16.msra.mxu1 %v1222_v47  ;;  %v1397_v47 = vld [vmem:[#allocation2 + $0x5c8] sm:$0xff] }
 0x37d   : > { %1612 = vmatprep.subr.bf16.mxu1 %v1229_v48  ;;  %v1396_v48 = vld [vmem:[#allocation2 + $0x5c0] sm:$0xff] }
 0x380   : > { %1613 = vmatpush1.bf16.msra.mxu1 %v1228_v50  ;;  %v1402_v50 = vld [vmem:[#allocation2 + $0x5f0] sm:$0xff] }
 0x381   : > { %1614 = vmatprep.subr.bf16.mxu1 %v1235_v51  ;;  %v1404_v51 = vld [vmem:[#allocation14] sm:$0x3f] }
 0x384   : > { %1615 = vmatpush1.bf16.msra.mxu1 %v1234_v52  ;;  %v1409_v52 = vrot.slane %v1404_v51, %v5484_v20 }
 0x385   : > { %1616 = vmatprep.subr.bf16.mxu1 %v1241_v53  ;;  %v1413_v53 = vrot.slane %v1404_v51, %v5487_v22 }
 0x388   : > { %1617 = vmatpush1.bf16.msra.mxu1 %v1240_v23 }
 0x389   : > { %1618 = vmatprep.subr.bf16.mxu1 %v1247_v54 }
 0x38c   : > { %1619 = vmatpush1.bf16.msra.mxu1 %v1246_v55 }
 0x38d   : > { %1620 = vmatprep.subr.bf16.mxu1 %v1253_v56 }
 0x390   : > { %1621 = vmatpush1.bf16.msra.mxu1 %v1252_v57 }
 0x391   : > { %1622 = vmatprep.subr.bf16.mxu1 %v1259_v58 }
 0x394   : > { %1623 = vmatpush1.bf16.msra.mxu1 %v1258_v59 }
 0x395   : > { %1624 = vmatprep.subr.bf16.mxu1 %v1265_v60 }
 0x398   : > { %1625 = vmatpush1.bf16.msra.mxu1 %v1264_v61 }
 0x399   : > { %1626 = vmatprep.subr.bf16.mxu1 %v1271_v62 }
 0x39c   : > { %1627 = vmatpush1.bf16.msra.mxu1 %v1270_v63 }
 0x39d   : > { %1628 = vmatprep.subr.bf16.mxu1 %v1277_v0 }
 0x3a0   : > { %1629 = vmatpush1.bf16.msra.mxu1 %v1276_v1 }
 0x3a1   : > { %1630 = vmatprep.subr.bf16.mxu1 %v1283_v2  ;;  %v1417_v2 = vrot.slane %v1404_v51, %v5492_v43 }
 0x3a4   : > { %1631 = vmatpush1.bf16.msra.mxu1 %v1282_v3 }
 0x3a5   : > { %1632 = vmatprep.subr.bf16.mxu1 %v1289_v4 }
 0x3a8   : > { %1633 = vmatpush1.bf16.msra.mxu1 %v1288_v5 }
 0x3a9   : > { %1634 = vmatprep.subr.bf16.mxu1 %v1295_v6  ;;  %v1421_v6 = vrot.slane %v1404_v51, %v5495_v45 }
 0x3ac   : > { %1635 = vmatpush1.bf16.msra.mxu1 %v1294_v7 }
 0x3ad   : > { %1636 = vmatprep.subr.bf16.mxu1 %v1301_v8 }
 0x3b0   : > { %1637 = vmatpush1.bf16.msra.mxu1 %v1300_v9 }
 0x3b1   : > { %1638 = vmatprep.subr.bf16.mxu1 %v1307_v10 }
 0x3b4   : > { %1639 = vmatpush1.bf16.msra.mxu1 %v1306_v11 }
 0x3b5   : > { %1651 = vmatprep.subr.bf16.mxu1 %v1313_v12 }
 0x3b7   : > { %1641 = vmatmul.mubr.bf16.vlgmr.msra.gmra.mrb[8].mxu1 %v5503_v16  ;;  %v1342_v16 = vld [vmem:[#allocation2 + $0x410] sm:$0xff] }
 0x3b8   : > { %1652 = vmatpush1.bf16.msra.mxu1 %v1312_v13  ;;  %1683 = vmatprep.mubr.bf16.mxu1 %v5509_v24  ;;  %v1348_v24 = vld [vmem:[#allocation2 + $0x440] sm:$0xff] }
 0x3b9   : > { %1653 = vmatprep.subr.bf16.mxu1 %v1319_v14 }
 0x3bc   : > { %1654 = vmatpush1.bf16.msra.mxu1 %v1318_v15 }
 0x3bd   : > { %1655 = vmatprep.subr.bf16.mxu1 %v1325_v18 }
 0x3c0   : > { %1656 = vmatpush1.bf16.msra.mxu1 %v1324_v21 }
 0x3c1   : > { %1657 = vmatprep.subr.bf16.mxu1 %v1331_v25 }
 0x3c4   : > { %1658 = vmatpush1.bf16.msra.mxu1 %v1330_v26 }
 0x3c5   : > { %1659 = vmatprep.subr.bf16.mxu1 %v1337_v27 }
 0x3c8   : > { %1660 = vmatpush1.bf16.msra.mxu1 %v1336_v28 }
 0x3c9   : > { %1661 = vmatprep.subr.bf16.mxu1 %v1343_v29 }
 0x3cc   : > { %1662 = vmatpush1.bf16.msra.mxu1 %v1342_v16 }
 0x3cd   : > { %1663 = vmatprep.subr.bf16.mxu1 %v1349_v30 }
 0x3d0   : > { %1664 = vmatpush1.bf16.msra.mxu1 %v1348_v24 }
 0x3d1   : > { %1665 = vmatprep.subr.bf16.mxu1 %v1355_v31  ;;  %v5540_v31 = vsub.s32 4, %v5481_v19 }
 0x3d4   : > { %1666 = vmatpush1.bf16.msra.mxu1 %v1354_v32  ;;  %v5543_v32 = vsub.s32 5, %v5481_v19 }
 0x3d5   : > { %1667 = vmatprep.subr.bf16.mxu1 %v1361_v33  ;;  %v1425_v33 = vrot.slane %v1404_v51, %v5540_v31 }
 0x3d8   : > { %1668 = vmatpush1.bf16.msra.mxu1 %v1360_v34  ;;  %v1429_v34 = vrot.slane %v1404_v51, %v5543_v32 }
 0x3d9   : > { %1669 = vmatprep.subr.bf16.mxu1 %v1367_v35 }
 0x3dc   : > { %1670 = vmatpush1.bf16.msra.mxu1 %v1366_v36 }
 0x3dd   : > { %1671 = vmatprep.subr.bf16.mxu1 %v1373_v37 }
 0x3e0   : > { %1672 = vmatpush1.bf16.msra.mxu1 %v1372_v38 }
 0x3e1   : > { %1673 = vmatprep.subr.bf16.mxu1 %v1379_v39 }
 0x3e4   : > { %1674 = vmatpush1.bf16.msra.mxu1 %v1378_v40 }
 0x3e5   : > { %1675 = vmatprep.subr.bf16.mxu1 %v1385_v41 }
 0x3e8   : > { %1676 = vmatpush1.bf16.msra.mxu1 %v1384_v42 }
 0x3e9   : > { %1677 = vmatprep.subr.bf16.mxu1 %v1391_v44 }
 0x3ec   : > { %1678 = vmatpush1.bf16.msra.mxu1 %v1390_v46 }
 0x3ed   : > { %1679 = vmatprep.subr.bf16.mxu1 %v1397_v47 }
 0x3f0   : > { %1680 = vmatpush1.bf16.msra.mxu1 %v1396_v48 }
 0x3f1   : > { %1681 = vmatprep.subr.bf16.mxu1 %v1403_v49 }
 0x3f4   : > { %1682 = vmatpush1.bf16.msra.mxu1 %v1402_v50 }
 0x3f7   : > { %1684 = vmatmul.mubr.bf16.vlgmr.msra.gmra.mrb[8].mxu1 %v5505_v17 }
 0x44a   : > { %v1513_v23 = vpop.f32.mrb[4].mxu1 }
 0x44b   : > { %v4316_v54 = vadd.f32 %v1513_v23, %v1409_v52  ;;  %v1515_v55 = vpop.f32.mrb[5].mxu1 }
 0x44c   : > { %v4317_v56 = vadd.f32 %v1515_v55, %v1413_v53  ;;  %v1517_v57 = vpop.f32.mrb[6].mxu1 }
 0x44d   : > { %v1706_v58 = vmul.f32 0.2, %v4316_v54  ;;  %v4318_v59 = vadd.f32 %v1517_v57, %v1409_v52  ;;  %v1519_v60 = vpop.f32.mrb[7].mxu1  ;;  %vm1694_vm12 = vcmp.gt.f32.partialorder %v4316_v54, 0.0  ;;  %v1599_v8 = vpop.f32.mrb[8].mxu0 }
 0x44e   : > { %v1707_v61 = vmul.f32 0.2, %v4317_v56  ;;  %v4319_v62 = vadd.f32 %v1519_v60, %v1413_v53  ;;  %vm1695_vm13 = vcmp.gt.f32.partialorder %v4317_v56, 0.0  ;;  %v4320_v9 = vadd.f32 %v1599_v8, %v1417_v2  ;;  %v1601_v10 = vpop.f32.mrb[9].mxu0 }
 0x44f   : > { %vm1700_vm14 = vcmp.gt.f32.partialorder %v4318_v59, 0.0  ;;  %v1712_v63 = vmul.f32 0.2, %v4318_v59  ;;  %v1718_v0 = vsel %vm1694_vm12, %v4316_v54, %v1706_v58  ;;  %v4321_v11 = vadd.f32 %v1601_v10, %v1421_v6  ;;  %v1603_v12 = vpop.f32.mrb[10].mxu0 }
 0x450   : > { %vm1701_vm15 = vcmp.gt.f32.partialorder %v4319_v62, 0.0  ;;  %v1713_v17 = vmul.f32 0.2, %v4319_v62  ;;  %v1719_v3 = vsel %vm1695_vm13, %v4317_v56, %v1707_v61  ;;  %vm1696_vm0 = vcmp.gt.f32.partialorder %v4320_v9, 0.0  ;;  %v1605_v15 = vpop.f32.mrb[11].mxu0 }
 0x451   : > { %v1724_v1 = vsel %vm1700_vm14, %v4318_v59, %v1712_v63  ;;  %v1708_v13 = vmul.f32 0.2, %v4320_v9  ;;  %v4322_v14 = vadd.f32 %v1603_v12, %v1417_v2  ;;  %vm1697_vm1 = vcmp.gt.f32.partialorder %v4321_v11, 0.0 }
 0x452   : > { %v5530_v4 = vpack.c.bf16 %v1724_v1, %v1718_v0  ;;  %v1725_v5 = vsel %vm1701_vm15, %v4319_v62, %v1713_v17  ;;  %v1709_v18 = vmul.f32 0.2, %v4321_v11  ;;  %v4323_v21 = vadd.f32 %v1605_v15, %v1421_v6 }
 0x453   : > { %v5533_v7 = vpack.c.bf16 %v1725_v5, %v1719_v3  ;;  %v1720_v25 = vsel %vm1696_vm0, %v4320_v9, %v1708_v13  ;;  %vm1702_vm2 = vcmp.gt.f32.partialorder %v4322_v14, 0.0  ;;  %v1714_v26 = vmul.f32 0.2, %v4322_v14 }
 0x454   : > { %v1721_v27 = vsel %vm1697_vm1, %v4321_v11, %v1709_v18  ;;  %vm1703_vm3 = vcmp.gt.f32.partialorder %v4323_v21, 0.0  ;;  %v1715_v28 = vmul.f32 0.2, %v4323_v21 }
 0x455   : > { %v1726_v29 = vsel %vm1702_vm2, %v4322_v14, %v1714_v26 }
 0x456   : > { %v5535_v16 = vpack.c.bf16 %v1726_v29, %v1720_v25  ;;  %v1727_v30 = vsel %vm1703_vm3, %v4323_v21, %v1715_v28 }
 0x457   : > { %v5537_v24 = vpack.c.bf16 %v1727_v30, %v1721_v27 }
 0x4ca   : > { %v1685_v35 = vpop.f32.mrb[8].mxu1 }
 0x4cb   : > { %v4324_v36 = vadd.f32 %v1685_v35, %v1425_v33  ;;  %v1687_v37 = vpop.f32.mrb[9].mxu1 }
 0x4cc   : > { %v4325_v38 = vadd.f32 %v1687_v37, %v1429_v34  ;;  %v1689_v39 = vpop.f32.mrb[10].mxu1 }
 0x4cd   : > { %v1710_v40 = vmul.f32 0.2, %v4324_v36  ;;  %v4326_v41 = vadd.f32 %v1689_v39, %v1425_v33  ;;  %v1691_v42 = vpop.f32.mrb[11].mxu1  ;;  %vm1698_vm4 = vcmp.gt.f32.partialorder %v4324_v36, 0.0 }
 0x4ce   : > { %v1711_v44 = vmul.f32 0.2, %v4325_v38  ;;  %v4327_v46 = vadd.f32 %v1691_v42, %v1429_v34  ;;  %vm1699_vm5 = vcmp.gt.f32.partialorder %v4325_v38, 0.0 }
 0x4cf   : > { %vm1704_vm6 = vcmp.gt.f32.partialorder %v4326_v41, 0.0  ;;  %v1716_v47 = vmul.f32 0.2, %v4326_v41  ;;  %v1722_v49 = vsel %vm1698_vm4, %v4324_v36, %v1710_v40 }
 0x4d0   : > { %vm1705_vm7 = vcmp.gt.f32.partialorder %v4327_v46, 0.0  ;;  %v1717_v48 = vmul.f32 0.2, %v4327_v46  ;;  %v1723_v51 = vsel %vm1699_vm5, %v4325_v38, %v1711_v44 }
 0x4d1   : > { %v1728_v50 = vsel %vm1704_vm6, %v4326_v41, %v1716_v47 }
 0x4d2   : > { %v5547_v52 = vpack.c.bf16 %v1728_v50, %v1722_v49  ;;  %v1729_v53 = vsel %vm1705_vm7, %v4327_v46, %v1717_v48 }
 0x4d3   : > { %v5549_v23 = vpack.c.bf16 %v1729_v53, %v1723_v51 }
 0x4d4   : > { %5029 = dma.done.wait (%p5806_p1), [#allocation5 + $0x1], 49152 }
 0x4d5   : > { %5031 = vsyncadd (%p5768_p0), [#allocation5 + $0x1], 4294918144  ;;  %2202 = vmatprep.mubr.bf16.mxu0 %v5533_v7  ;;  %2331 = vmatprep.mubr.bf16.mxu1 %v5533_v7  ;;  %v1745_v54 = vld [vmem:[#allocation3 + $0x8] sm:$0xff]  ;;  %v1747_v55 = vld [vmem:[#allocation3 + $0x18] sm:$0xff]  ;;  %p5807_p6 = pmov %p5768_p0 }
 0x4d6   : > { %v1744_v56 = vld [vmem:[#allocation3] sm:$0xff]  ;;  %2170 = vmatprep.subr.bf16.mxu0 %v1745_v54  ;;  %2299 = vmatprep.subr.bf16.mxu1 %v1747_v55  ;;  %v1746_v57 = vld [vmem:[#allocation3 + $0x10] sm:$0xff]  ;;  %v1753_v58 = vld [vmem:[#allocation3 + $0x48] sm:$0xff] }
 0x4d7   : > { %v1755_v59 = vld [vmem:[#allocation3 + $0x58] sm:$0xff]  ;;  %2171 = vmatpush1.bf16.msra.mxu0 %v1744_v56  ;;  %2300 = vmatpush1.bf16.msra.mxu1 %v1746_v57  ;;  %v1752_v60 = vld [vmem:[#allocation3 + $0x40] sm:$0xff]  ;;  %v1754_v61 = vld [vmem:[#allocation3 + $0x50] sm:$0xff] }
 0x4d8   : > { %2172 = vmatprep.subr.bf16.mxu0 %v1753_v58  ;;  %2301 = vmatprep.subr.bf16.mxu1 %v1755_v59  ;;  %v1761_v62 = vld [vmem:[#allocation3 + $0x88] sm:$0xff]  ;;  %v1763_v63 = vld [vmem:[#allocation3 + $0x98] sm:$0xff]  ;;  %v1760_v17 = vld [vmem:[#allocation3 + $0x80] sm:$0xff] }
 0x4d9   : > { %v1762_v0 = vld [vmem:[#allocation3 + $0x90] sm:$0xff]  ;;  %v1769_v1 = vld [vmem:[#allocation3 + $0xc8] sm:$0xff]  ;;  %v1771_v2 = vld [vmem:[#allocation3 + $0xd8] sm:$0xff] }
 0x4da   : > { %v1768_v3 = vld [vmem:[#allocation3 + $0xc0] sm:$0xff]  ;;  %v1770_v5 = vld [vmem:[#allocation3 + $0xd0] sm:$0xff]  ;;  %v1777_v6 = vld [vmem:[#allocation3 + $0x108] sm:$0xff] }
 0x4db   : > { %2173 = vmatpush1.bf16.msra.mxu0 %v1752_v60  ;;  %2302 = vmatpush1.bf16.msra.mxu1 %v1754_v61  ;;  %v1779_v8 = vld [vmem:[#allocation3 + $0x118] sm:$0xff]  ;;  %v1776_v9 = vld [vmem:[#allocation3 + $0x100] sm:$0xff]  ;;  %v1778_v10 = vld [vmem:[#allocation3 + $0x110] sm:$0xff] }
 0x4dc   : > { %2174 = vmatprep.subr.bf16.mxu0 %v1761_v62  ;;  %2303 = vmatprep.subr.bf16.mxu1 %v1763_v63  ;;  %v1785_v11 = vld [vmem:[#allocation3 + $0x148] sm:$0xff]  ;;  %v1787_v12 = vld [vmem:[#allocation3 + $0x158] sm:$0xff]  ;;  %v1784_v13 = vld [vmem:[#allocation3 + $0x140] sm:$0xff] }
 0x4dd   : > { %v1786_v14 = vld [vmem:[#allocation3 + $0x150] sm:$0xff]  ;;  %v1793_v15 = vld [vmem:[#allocation3 + $0x188] sm:$0xff]  ;;  %v1795_v18 = vld [vmem:[#allocation3 + $0x198] sm:$0xff] }
 0x4de   : > { %v1792_v21 = vld [vmem:[#allocation3 + $0x180] sm:$0xff]  ;;  %v1794_v25 = vld [vmem:[#allocation3 + $0x190] sm:$0xff]  ;;  %v1801_v26 = vld [vmem:[#allocation3 + $0x1c8] sm:$0xff] }
 0x4df   : > { %2175 = vmatpush1.bf16.msra.mxu0 %v1760_v17  ;;  %2304 = vmatpush1.bf16.msra.mxu1 %v1762_v0  ;;  %v1803_v27 = vld [vmem:[#allocation3 + $0x1d8] sm:$0xff]  ;;  %v1800_v28 = vld [vmem:[#allocation3 + $0x1c0] sm:$0xff]  ;;  %v1802_v29 = vld [vmem:[#allocation3 + $0x1d0] sm:$0xff] }
 0x4e0   : > { %2176 = vmatprep.subr.bf16.mxu0 %v1769_v1  ;;  %2305 = vmatprep.subr.bf16.mxu1 %v1771_v2  ;;  %v1809_v30 = vld [vmem:[#allocation3 + $0x208] sm:$0xff]  ;;  %v1811_v33 = vld [vmem:[#allocation3 + $0x218] sm:$0xff]  ;;  %v1808_v34 = vld [vmem:[#allocation3 + $0x200] sm:$0xff] }
 0x4e1   : > { %v1810_v35 = vld [vmem:[#allocation3 + $0x210] sm:$0xff]  ;;  %v1817_v36 = vld [vmem:[#allocation3 + $0x248] sm:$0xff]  ;;  %v1819_v37 = vld [vmem:[#allocation3 + $0x258] sm:$0xff] }
 0x4e2   : > { %v1816_v38 = vld [vmem:[#allocation3 + $0x240] sm:$0xff]  ;;  %v1818_v39 = vld [vmem:[#allocation3 + $0x250] sm:$0xff]  ;;  %v1825_v40 = vld [vmem:[#allocation3 + $0x288] sm:$0xff] }
 0x4e3   : > { %2177 = vmatpush1.bf16.msra.mxu0 %v1768_v3  ;;  %2306 = vmatpush1.bf16.msra.mxu1 %v1770_v5  ;;  %v1827_v41 = vld [vmem:[#allocation3 + $0x298] sm:$0xff]  ;;  %v1824_v42 = vld [vmem:[#allocation3 + $0x280] sm:$0xff]  ;;  %v1826_v44 = vld [vmem:[#allocation3 + $0x290] sm:$0xff] }
 0x4e4   : > { %2178 = vmatprep.subr.bf16.mxu0 %v1777_v6  ;;  %2307 = vmatprep.subr.bf16.mxu1 %v1779_v8  ;;  %v1833_v46 = vld [vmem:[#allocation3 + $0x2c8] sm:$0xff]  ;;  %v1835_v47 = vld [vmem:[#allocation3 + $0x2d8] sm:$0xff]  ;;  %v1832_v48 = vld [vmem:[#allocation3 + $0x2c0] sm:$0xff] }
 0x4e5   : > { %v1834_v49 = vld [vmem:[#allocation3 + $0x2d0] sm:$0xff]  ;;  %v1841_v50 = vld [vmem:[#allocation3 + $0x308] sm:$0xff]  ;;  %v1843_v51 = vld [vmem:[#allocation3 + $0x318] sm:$0xff] }
 0x4e6   : > { %v1840_v53 = vld [vmem:[#allocation3 + $0x300] sm:$0xff]  ;;  %v1842_v54 = vld [vmem:[#allocation3 + $0x310] sm:$0xff]  ;;  %v1849_v55 = vld [vmem:[#allocation3 + $0x348] sm:$0xff] }
 0x4e7   : > { %2179 = vmatpush1.bf16.msra.mxu0 %v1776_v9  ;;  %2308 = vmatpush1.bf16.msra.mxu1 %v1778_v10  ;;  %v1851_v56 = vld [vmem:[#allocation3 + $0x358] sm:$0xff]  ;;  %v1848_v57 = vld [vmem:[#allocation3 + $0x340] sm:$0xff]  ;;  %v1850_v58 = vld [vmem:[#allocation3 + $0x350] sm:$0xff] }
 0x4e8   : > { %2180 = vmatprep.subr.bf16.mxu0 %v1785_v11  ;;  %2309 = vmatprep.subr.bf16.mxu1 %v1787_v12  ;;  %v1857_v59 = vld [vmem:[#allocation3 + $0x388] sm:$0xff]  ;;  %v1859_v60 = vld [vmem:[#allocation3 + $0x398] sm:$0xff]  ;;  %v1856_v61 = vld [vmem:[#allocation3 + $0x380] sm:$0xff] }
 0x4e9   : > { %v1858_v62 = vld [vmem:[#allocation3 + $0x390] sm:$0xff]  ;;  %v1865_v63 = vld [vmem:[#allocation3 + $0x3c8] sm:$0xff]  ;;  %v1867_v17 = vld [vmem:[#allocation3 + $0x3d8] sm:$0xff] }
 0x4ea   : > { %v1864_v0 = vld [vmem:[#allocation3 + $0x3c0] sm:$0xff]  ;;  %v1866_v1 = vld [vmem:[#allocation3 + $0x3d0] sm:$0xff]  ;;  %v1873_v2 = vld [vmem:[#allocation3 + $0x408] sm:$0xff] }
 0x4eb   : > { %2181 = vmatpush1.bf16.msra.mxu0 %v1784_v13  ;;  %2310 = vmatpush1.bf16.msra.mxu1 %v1786_v14  ;;  %v1875_v3 = vld [vmem:[#allocation3 + $0x418] sm:$0xff]  ;;  %v1872_v5 = vld [vmem:[#allocation3 + $0x400] sm:$0xff]  ;;  %v1874_v6 = vld [vmem:[#allocation3 + $0x410] sm:$0xff] }
 0x4ec   : > { %2182 = vmatprep.subr.bf16.mxu0 %v1793_v15  ;;  %2311 = vmatprep.subr.bf16.mxu1 %v1795_v18  ;;  %v1881_v8 = vld [vmem:[#allocation3 + $0x448] sm:$0xff]  ;;  %v1883_v9 = vld [vmem:[#allocation3 + $0x458] sm:$0xff]  ;;  %v1880_v10 = vld [vmem:[#allocation3 + $0x440] sm:$0xff] }
 0x4ed   : > { %v1882_v11 = vld [vmem:[#allocation3 + $0x450] sm:$0xff]  ;;  %v1889_v12 = vld [vmem:[#allocation3 + $0x488] sm:$0xff]  ;;  %v1891_v13 = vld [vmem:[#allocation3 + $0x498] sm:$0xff] }
 0x4ee   : > { %v1888_v14 = vld [vmem:[#allocation3 + $0x480] sm:$0xff]  ;;  %v1890_v15 = vld [vmem:[#allocation3 + $0x490] sm:$0xff]  ;;  %v1897_v18 = vld [vmem:[#allocation3 + $0x4c8] sm:$0xff] }
 0x4ef   : > { %2183 = vmatpush1.bf16.msra.mxu0 %v1792_v21  ;;  %2312 = vmatpush1.bf16.msra.mxu1 %v1794_v25  ;;  %v1899_v21 = vld [vmem:[#allocation3 + $0x4d8] sm:$0xff]  ;;  %v1896_v25 = vld [vmem:[#allocation3 + $0x4c0] sm:$0xff] }
 0x4f0   : > { %2184 = vmatprep.subr.bf16.mxu0 %v1801_v26  ;;  %2313 = vmatprep.subr.bf16.mxu1 %v1803_v27  ;;  %v1898_v26 = vld [vmem:[#allocation3 + $0x4d0] sm:$0xff]  ;;  %v1905_v27 = vld [vmem:[#allocation3 + $0x508] sm:$0xff] }
 0x4f3   : > { %2185 = vmatpush1.bf16.msra.mxu0 %v1800_v28  ;;  %2314 = vmatpush1.bf16.msra.mxu1 %v1802_v29  ;;  %v1907_v28 = vld [vmem:[#allocation3 + $0x518] sm:$0xff]  ;;  %v1904_v29 = vld [vmem:[#allocation3 + $0x500] sm:$0xff] }
 0x4f4   : > { %2186 = vmatprep.subr.bf16.mxu0 %v1809_v30  ;;  %2315 = vmatprep.subr.bf16.mxu1 %v1811_v33  ;;  %v1906_v30 = vld [vmem:[#allocation3 + $0x510] sm:$0xff]  ;;  %v1913_v33 = vld [vmem:[#allocation3 + $0x548] sm:$0xff] }
 0x4f7   : > { %2187 = vmatpush1.bf16.msra.mxu0 %v1808_v34  ;;  %2316 = vmatpush1.bf16.msra.mxu1 %v1810_v35  ;;  %v1915_v34 = vld [vmem:[#allocation3 + $0x558] sm:$0xff]  ;;  %v1912_v35 = vld [vmem:[#allocation3 + $0x540] sm:$0xff] }
 0x4f8   : > { %2188 = vmatprep.subr.bf16.mxu0 %v1817_v36  ;;  %2317 = vmatprep.subr.bf16.mxu1 %v1819_v37  ;;  %v1914_v36 = vld [vmem:[#allocation3 + $0x550] sm:$0xff]  ;;  %v1921_v37 = vld [vmem:[#allocation3 + $0x588] sm:$0xff] }
 0x4fb   : > { %2189 = vmatpush1.bf16.msra.mxu0 %v1816_v38  ;;  %2318 = vmatpush1.bf16.msra.mxu1 %v1818_v39  ;;  %v1923_v38 = vld [vmem:[#allocation3 + $0x598] sm:$0xff]  ;;  %v1920_v39 = vld [vmem:[#allocation3 + $0x580] sm:$0xff] }
 0x4fc   : > { %2190 = vmatprep.subr.bf16.mxu0 %v1825_v40  ;;  %2319 = vmatprep.subr.bf16.mxu1 %v1827_v41  ;;  %v1922_v40 = vld [vmem:[#allocation3 + $0x590] sm:$0xff]  ;;  %v1929_v41 = vld [vmem:[#allocation3 + $0x5c8] sm:$0xff] }
 0x4ff   : > { %2191 = vmatpush1.bf16.msra.mxu0 %v1824_v42  ;;  %2320 = vmatpush1.bf16.msra.mxu1 %v1826_v44  ;;  %v1931_v42 = vld [vmem:[#allocation3 + $0x5d8] sm:$0xff]  ;;  %v1928_v44 = vld [vmem:[#allocation3 + $0x5c0] sm:$0xff] }
 0x500   : > { %2192 = vmatprep.subr.bf16.mxu0 %v1833_v46  ;;  %2321 = vmatprep.subr.bf16.mxu1 %v1835_v47  ;;  %v1930_v46 = vld [vmem:[#allocation3 + $0x5d0] sm:$0xff]  ;;  %v1937_v47 = vld [vmem:[#allocation3 + $0x608] sm:$0xff] }
 0x503   : > { %2193 = vmatpush1.bf16.msra.mxu0 %v1832_v48  ;;  %2322 = vmatpush1.bf16.msra.mxu1 %v1834_v49  ;;  %v1939_v48 = vld [vmem:[#allocation3 + $0x618] sm:$0xff]  ;;  %v1936_v49 = vld [vmem:[#allocation3 + $0x600] sm:$0xff] }
 0x504   : > { %2194 = vmatprep.subr.bf16.mxu0 %v1841_v50  ;;  %2323 = vmatprep.subr.bf16.mxu1 %v1843_v51  ;;  %v1938_v50 = vld [vmem:[#allocation3 + $0x610] sm:$0xff]  ;;  %v1945_v51 = vld [vmem:[#allocation3 + $0x648] sm:$0xff] }
 0x507   : > { %2195 = vmatpush1.bf16.msra.mxu0 %v1840_v53  ;;  %2324 = vmatpush1.bf16.msra.mxu1 %v1842_v54  ;;  %v1947_v53 = vld [vmem:[#allocation3 + $0x658] sm:$0xff]  ;;  %v1944_v54 = vld [vmem:[#allocation3 + $0x640] sm:$0xff] }
 0x508   : > { %2196 = vmatprep.subr.bf16.mxu0 %v1849_v55  ;;  %2325 = vmatprep.subr.bf16.mxu1 %v1851_v56  ;;  %v1946_v55 = vld [vmem:[#allocation3 + $0x650] sm:$0xff]  ;;  %v1953_v56 = vld [vmem:[#allocation3 + $0x688] sm:$0xff] }
 0x50b   : > { %2197 = vmatpush1.bf16.msra.mxu0 %v1848_v57  ;;  %2326 = vmatpush1.bf16.msra.mxu1 %v1850_v58  ;;  %v1955_v57 = vld [vmem:[#allocation3 + $0x698] sm:$0xff]  ;;  %v1952_v58 = vld [vmem:[#allocation3 + $0x680] sm:$0xff] }
 0x50c   : > { %2198 = vmatprep.subr.bf16.mxu0 %v1857_v59  ;;  %2327 = vmatprep.subr.bf16.mxu1 %v1859_v60  ;;  %v1954_v59 = vld [vmem:[#allocation3 + $0x690] sm:$0xff]  ;;  %v1961_v60 = vld [vmem:[#allocation3 + $0x6c8] sm:$0xff] }
 0x50f   : > { %2199 = vmatpush1.bf16.msra.mxu0 %v1856_v61  ;;  %2328 = vmatpush1.bf16.msra.mxu1 %v1858_v62  ;;  %v1963_v61 = vld [vmem:[#allocation3 + $0x6d8] sm:$0xff]  ;;  %v1960_v62 = vld [vmem:[#allocation3 + $0x6c0] sm:$0xff] }
 0x510   : > { %2200 = vmatprep.subr.bf16.mxu0 %v1865_v63  ;;  %2329 = vmatprep.subr.bf16.mxu1 %v1867_v17  ;;  %v1962_v63 = vld [vmem:[#allocation3 + $0x6d0] sm:$0xff]  ;;  %v1969_v17 = vld [vmem:[#allocation3 + $0x708] sm:$0xff] }
 0x513   : > { %2201 = vmatpush1.bf16.msra.mxu0 %v1864_v0  ;;  %2330 = vmatpush1.bf16.msra.mxu1 %v1866_v1  ;;  %v1971_v0 = vld [vmem:[#allocation3 + $0x718] sm:$0xff]  ;;  %v1968_v1 = vld [vmem:[#allocation3 + $0x700] sm:$0xff] }
 0x514   : > { %2213 = vmatprep.subr.bf16.mxu0 %v1873_v2  ;;  %2342 = vmatprep.subr.bf16.mxu1 %v1875_v3  ;;  %v1970_v2 = vld [vmem:[#allocation3 + $0x710] sm:$0xff]  ;;  %v1977_v3 = vld [vmem:[#allocation3 + $0x748] sm:$0xff] }
 0x516   : > { %2203 = vmatmul.mubr.bf16.vlgmr.msra.gmra.mrb[12].mxu0 %v5530_v4  ;;  %2332 = vmatmul.mubr.bf16.vlgmr.msra.gmra.mrb[12].mxu1 %v5530_v4 }
 0x517   : > { %2214 = vmatpush1.bf16.msra.mxu0 %v1872_v5  ;;  %2343 = vmatpush1.bf16.msra.mxu1 %v1874_v6  ;;  %v1979_v5 = vld [vmem:[#allocation3 + $0x758] sm:$0xff]  ;;  %v1976_v6 = vld [vmem:[#allocation3 + $0x740] sm:$0xff] }
 0x518   : > { %2215 = vmatprep.subr.bf16.mxu0 %v1881_v8  ;;  %2344 = vmatprep.subr.bf16.mxu1 %v1883_v9  ;;  %v1978_v8 = vld [vmem:[#allocation3 + $0x750] sm:$0xff]  ;;  %v1985_v9 = vld [vmem:[#allocation3 + $0x788] sm:$0xff] }
 0x519   : > { %2245 = vmatprep.mubr.bf16.mxu0 %v5537_v24  ;;  %2374 = vmatprep.mubr.bf16.mxu1 %v5537_v24 }
 0x51b   : > { %2216 = vmatpush1.bf16.msra.mxu0 %v1880_v10  ;;  %2345 = vmatpush1.bf16.msra.mxu1 %v1882_v11  ;;  %v1987_v10 = vld [vmem:[#allocation3 + $0x798] sm:$0xff]  ;;  %v1984_v11 = vld [vmem:[#allocation3 + $0x780] sm:$0xff] }
 0x51c   : > { %2217 = vmatprep.subr.bf16.mxu0 %v1889_v12  ;;  %2346 = vmatprep.subr.bf16.mxu1 %v1891_v13  ;;  %v1986_v12 = vld [vmem:[#allocation3 + $0x790] sm:$0xff]  ;;  %v1993_v13 = vld [vmem:[#allocation3 + $0x7c8] sm:$0xff] }
 0x51f   : > { %2218 = vmatpush1.bf16.msra.mxu0 %v1888_v14  ;;  %2347 = vmatpush1.bf16.msra.mxu1 %v1890_v15  ;;  %v1995_v14 = vld [vmem:[#allocation3 + $0x7d8] sm:$0xff]  ;;  %v1992_v15 = vld [vmem:[#allocation3 + $0x7c0] sm:$0xff] }
 0x520   : > { %2219 = vmatprep.subr.bf16.mxu0 %v1897_v18  ;;  %2348 = vmatprep.subr.bf16.mxu1 %v1899_v21  ;;  %v1994_v18 = vld [vmem:[#allocation3 + $0x7d0] sm:$0xff]  ;;  %v2001_v21 = vld [vmem:[#allocation3 + $0x808] sm:$0xff] }
 0x523   : > { %2220 = vmatpush1.bf16.msra.mxu0 %v1896_v25  ;;  %2349 = vmatpush1.bf16.msra.mxu1 %v1898_v26  ;;  %v2003_v25 = vld [vmem:[#allocation3 + $0x818] sm:$0xff]  ;;  %v2000_v26 = vld [vmem:[#allocation3 + $0x800] sm:$0xff] }
 0x524   : > { %2221 = vmatprep.subr.bf16.mxu0 %v1905_v27  ;;  %2350 = vmatprep.subr.bf16.mxu1 %v1907_v28  ;;  %v2002_v27 = vld [vmem:[#allocation3 + $0x810] sm:$0xff]  ;;  %v2009_v28 = vld [vmem:[#allocation3 + $0x848] sm:$0xff] }
 0x527   : > { %2222 = vmatpush1.bf16.msra.mxu0 %v1904_v29  ;;  %2351 = vmatpush1.bf16.msra.mxu1 %v1906_v30  ;;  %v2011_v29 = vld [vmem:[#allocation3 + $0x858] sm:$0xff]  ;;  %v2008_v30 = vld [vmem:[#allocation3 + $0x840] sm:$0xff] }
 0x528   : > { %2223 = vmatprep.subr.bf16.mxu0 %v1913_v33  ;;  %2352 = vmatprep.subr.bf16.mxu1 %v1915_v34  ;;  %v2010_v33 = vld [vmem:[#allocation3 + $0x850] sm:$0xff]  ;;  %v2017_v34 = vld [vmem:[#allocation3 + $0x888] sm:$0xff] }
 0x52b   : > { %2224 = vmatpush1.bf16.msra.mxu0 %v1912_v35  ;;  %2353 = vmatpush1.bf16.msra.mxu1 %v1914_v36  ;;  %v2019_v35 = vld [vmem:[#allocation3 + $0x898] sm:$0xff]  ;;  %v2016_v36 = vld [vmem:[#allocation3 + $0x880] sm:$0xff] }
 0x52c   : > { %2225 = vmatprep.subr.bf16.mxu0 %v1921_v37  ;;  %2354 = vmatprep.subr.bf16.mxu1 %v1923_v38  ;;  %v2018_v37 = vld [vmem:[#allocation3 + $0x890] sm:$0xff]  ;;  %v2025_v38 = vld [vmem:[#allocation3 + $0x8c8] sm:$0xff] }
 0x52f   : > { %2226 = vmatpush1.bf16.msra.mxu0 %v1920_v39  ;;  %2355 = vmatpush1.bf16.msra.mxu1 %v1922_v40  ;;  %v2027_v39 = vld [vmem:[#allocation3 + $0x8d8] sm:$0xff]  ;;  %v2024_v40 = vld [vmem:[#allocation3 + $0x8c0] sm:$0xff] }
 0x530   : > { %2227 = vmatprep.subr.bf16.mxu0 %v1929_v41  ;;  %2356 = vmatprep.subr.bf16.mxu1 %v1931_v42  ;;  %v2026_v41 = vld [vmem:[#allocation3 + $0x8d0] sm:$0xff]  ;;  %v2033_v42 = vld [vmem:[#allocation3 + $0x908] sm:$0xff] }
 0x533   : > { %2228 = vmatpush1.bf16.msra.mxu0 %v1928_v44  ;;  %2357 = vmatpush1.bf16.msra.mxu1 %v1930_v46  ;;  %v2035_v44 = vld [vmem:[#allocation3 + $0x918] sm:$0xff]  ;;  %v2032_v46 = vld [vmem:[#allocation3 + $0x900] sm:$0xff] }
 0x534   : > { %2229 = vmatprep.subr.bf16.mxu0 %v1937_v47  ;;  %2358 = vmatprep.subr.bf16.mxu1 %v1939_v48  ;;  %v2034_v47 = vld [vmem:[#allocation3 + $0x910] sm:$0xff]  ;;  %v2041_v48 = vld [vmem:[#allocation3 + $0x948] sm:$0xff] }
 0x537   : > { %2230 = vmatpush1.bf16.msra.mxu0 %v1936_v49  ;;  %2359 = vmatpush1.bf16.msra.mxu1 %v1938_v50  ;;  %v2043_v49 = vld [vmem:[#allocation3 + $0x958] sm:$0xff]  ;;  %v2040_v50 = vld [vmem:[#allocation3 + $0x940] sm:$0xff] }
 0x538   : > { %2231 = vmatprep.subr.bf16.mxu0 %v1945_v51  ;;  %2360 = vmatprep.subr.bf16.mxu1 %v1947_v53  ;;  %v2042_v51 = vld [vmem:[#allocation3 + $0x950] sm:$0xff]  ;;  %v2049_v53 = vld [vmem:[#allocation3 + $0x988] sm:$0xff] }
 0x53b   : > { %2232 = vmatpush1.bf16.msra.mxu0 %v1944_v54  ;;  %2361 = vmatpush1.bf16.msra.mxu1 %v1946_v55  ;;  %v2051_v54 = vld [vmem:[#allocation3 + $0x998] sm:$0xff]  ;;  %v2048_v55 = vld [vmem:[#allocation3 + $0x980] sm:$0xff] }
 0x53c   : > { %2233 = vmatprep.subr.bf16.mxu0 %v1953_v56  ;;  %2362 = vmatprep.subr.bf16.mxu1 %v1955_v57  ;;  %v2050_v56 = vld [vmem:[#allocation3 + $0x990] sm:$0xff]  ;;  %v2057_v57 = vld [vmem:[#allocation3 + $0x9c8] sm:$0xff] }
 0x53f   : > { %2234 = vmatpush1.bf16.msra.mxu0 %v1952_v58  ;;  %2363 = vmatpush1.bf16.msra.mxu1 %v1954_v59  ;;  %v2059_v58 = vld [vmem:[#allocation3 + $0x9d8] sm:$0xff]  ;;  %v2056_v59 = vld [vmem:[#allocation3 + $0x9c0] sm:$0xff] }
 0x540   : > { %2235 = vmatprep.subr.bf16.mxu0 %v1961_v60  ;;  %2364 = vmatprep.subr.bf16.mxu1 %v1963_v61  ;;  %v2058_v60 = vld [vmem:[#allocation3 + $0x9d0] sm:$0xff]  ;;  %v2065_v61 = vld [vmem:[#allocation3 + $0xa08] sm:$0xff] }
 0x543   : > { %2236 = vmatpush1.bf16.msra.mxu0 %v1960_v62  ;;  %2365 = vmatpush1.bf16.msra.mxu1 %v1962_v63  ;;  %v2067_v62 = vld [vmem:[#allocation3 + $0xa18] sm:$0xff]  ;;  %v2064_v63 = vld [vmem:[#allocation3 + $0xa00] sm:$0xff] }
 0x544   : > { %2237 = vmatprep.subr.bf16.mxu0 %v1969_v17  ;;  %2366 = vmatprep.subr.bf16.mxu1 %v1971_v0  ;;  %v2066_v17 = vld [vmem:[#allocation3 + $0xa10] sm:$0xff]  ;;  %v2073_v0 = vld [vmem:[#allocation3 + $0xa48] sm:$0xff] }
 0x547   : > { %2238 = vmatpush1.bf16.msra.mxu0 %v1968_v1  ;;  %2367 = vmatpush1.bf16.msra.mxu1 %v1970_v2  ;;  %v2075_v1 = vld [vmem:[#allocation3 + $0xa58] sm:$0xff]  ;;  %v2072_v2 = vld [vmem:[#allocation3 + $0xa40] sm:$0xff] }
 0x548   : > { %2239 = vmatprep.subr.bf16.mxu0 %v1977_v3  ;;  %2368 = vmatprep.subr.bf16.mxu1 %v1979_v5  ;;  %v2074_v3 = vld [vmem:[#allocation3 + $0xa50] sm:$0xff]  ;;  %v2081_v5 = vld [vmem:[#allocation3 + $0xa88] sm:$0xff] }
 0x54b   : > { %2240 = vmatpush1.bf16.msra.mxu0 %v1976_v6  ;;  %2369 = vmatpush1.bf16.msra.mxu1 %v1978_v8  ;;  %v2083_v6 = vld [vmem:[#allocation3 + $0xa98] sm:$0xff]  ;;  %v2080_v8 = vld [vmem:[#allocation3 + $0xa80] sm:$0xff] }
 0x54c   : > { %2241 = vmatprep.subr.bf16.mxu0 %v1985_v9  ;;  %2370 = vmatprep.subr.bf16.mxu1 %v1987_v10  ;;  %v2082_v9 = vld [vmem:[#allocation3 + $0xa90] sm:$0xff]  ;;  %v2089_v10 = vld [vmem:[#allocation3 + $0xac8] sm:$0xff] }
 0x54f   : > { %2242 = vmatpush1.bf16.msra.mxu0 %v1984_v11  ;;  %2371 = vmatpush1.bf16.msra.mxu1 %v1986_v12  ;;  %v2091_v11 = vld [vmem:[#allocation3 + $0xad8] sm:$0xff]  ;;  %v2088_v12 = vld [vmem:[#allocation3 + $0xac0] sm:$0xff] }
 0x550   : > { %2243 = vmatprep.subr.bf16.mxu0 %v1993_v13  ;;  %2372 = vmatprep.subr.bf16.mxu1 %v1995_v14  ;;  %v2090_v13 = vld [vmem:[#allocation3 + $0xad0] sm:$0xff]  ;;  %v2097_v14 = vld [vmem:[#allocation3 + $0xb08] sm:$0xff] }
 0x553   : > { %2244 = vmatpush1.bf16.msra.mxu0 %v1992_v15  ;;  %2373 = vmatpush1.bf16.msra.mxu1 %v1994_v18  ;;  %v2099_v15 = vld [vmem:[#allocation3 + $0xb18] sm:$0xff]  ;;  %v2096_v18 = vld [vmem:[#allocation3 + $0xb00] sm:$0xff] }
 0x554   : > { %2256 = vmatprep.subr.bf16.mxu0 %v2001_v21  ;;  %2385 = vmatprep.subr.bf16.mxu1 %v2003_v25  ;;  %v2098_v21 = vld [vmem:[#allocation3 + $0xb10] sm:$0xff]  ;;  %v2105_v25 = vld [vmem:[#allocation3 + $0xb48] sm:$0xff] }
 0x556   : > { %2246 = vmatmul.mubr.bf16.vlgmr.msra.gmra.mrb[12].mxu0 %v5535_v16  ;;  %2375 = vmatmul.mubr.bf16.vlgmr.msra.gmra.mrb[12].mxu1 %v5535_v16 }
 0x557   : > { %2257 = vmatpush1.bf16.msra.mxu0 %v2000_v26  ;;  %2386 = vmatpush1.bf16.msra.mxu1 %v2002_v27  ;;  %v2107_v26 = vld [vmem:[#allocation3 + $0xb58] sm:$0xff]  ;;  %v2104_v27 = vld [vmem:[#allocation3 + $0xb40] sm:$0xff] }
 0x558   : > { %2258 = vmatprep.subr.bf16.mxu0 %v2009_v28  ;;  %2387 = vmatprep.subr.bf16.mxu1 %v2011_v29  ;;  %v2106_v28 = vld [vmem:[#allocation3 + $0xb50] sm:$0xff]  ;;  %v2113_v29 = vld [vmem:[#allocation3 + $0xb88] sm:$0xff] }
 0x559   : > { %2288 = vmatprep.mubr.bf16.mxu0 %v5549_v23  ;;  %2417 = vmatprep.mubr.bf16.mxu1 %v5549_v23 }
 0x55b   : > { %2259 = vmatpush1.bf16.msra.mxu0 %v2008_v30  ;;  %2388 = vmatpush1.bf16.msra.mxu1 %v2010_v33  ;;  %v2115_v30 = vld [vmem:[#allocation3 + $0xb98] sm:$0xff]  ;;  %v2112_v33 = vld [vmem:[#allocation3 + $0xb80] sm:$0xff] }
 0x55c   : > { %2260 = vmatprep.subr.bf16.mxu0 %v2017_v34  ;;  %2389 = vmatprep.subr.bf16.mxu1 %v2019_v35  ;;  %v2114_v34 = vld [vmem:[#allocation3 + $0xb90] sm:$0xff]  ;;  %v2121_v35 = vld [vmem:[#allocation3 + $0xbc8] sm:$0xff] }
 0x55f   : > { %2261 = vmatpush1.bf16.msra.mxu0 %v2016_v36  ;;  %2390 = vmatpush1.bf16.msra.mxu1 %v2018_v37  ;;  %v2123_v36 = vld [vmem:[#allocation3 + $0xbd8] sm:$0xff]  ;;  %v2120_v37 = vld [vmem:[#allocation3 + $0xbc0] sm:$0xff] }
 0x560   : > { %2262 = vmatprep.subr.bf16.mxu0 %v2025_v38  ;;  %2391 = vmatprep.subr.bf16.mxu1 %v2027_v39  ;;  %v2122_v38 = vld [vmem:[#allocation3 + $0xbd0] sm:$0xff]  ;;  %v1749_v39 = vld [vmem:[#allocation3 + $0x28] sm:$0xff] }
 0x563   : > { %2263 = vmatpush1.bf16.msra.mxu0 %v2024_v40  ;;  %2392 = vmatpush1.bf16.msra.mxu1 %v2026_v41  ;;  %v1751_v40 = vld [vmem:[#allocation3 + $0x38] sm:$0xff]  ;;  %v1748_v41 = vld [vmem:[#allocation3 + $0x20] sm:$0xff] }
 0x564   : > { %2264 = vmatprep.subr.bf16.mxu0 %v2033_v42  ;;  %2393 = vmatprep.subr.bf16.mxu1 %v2035_v44  ;;  %v1750_v42 = vld [vmem:[#allocation3 + $0x30] sm:$0xff]  ;;  %v1757_v44 = vld [vmem:[#allocation3 + $0x68] sm:$0xff] }
 0x567   : > { %2265 = vmatpush1.bf16.msra.mxu0 %v2032_v46  ;;  %2394 = vmatpush1.bf16.msra.mxu1 %v2034_v47  ;;  %v1759_v46 = vld [vmem:[#allocation3 + $0x78] sm:$0xff]  ;;  %v1756_v47 = vld [vmem:[#allocation3 + $0x60] sm:$0xff] }
 0x568   : > { %2266 = vmatprep.subr.bf16.mxu0 %v2041_v48  ;;  %2395 = vmatprep.subr.bf16.mxu1 %v2043_v49  ;;  %v1758_v48 = vld [vmem:[#allocation3 + $0x70] sm:$0xff]  ;;  %v1765_v49 = vld [vmem:[#allocation3 + $0xa8] sm:$0xff] }
 0x56b   : > { %2267 = vmatpush1.bf16.msra.mxu0 %v2040_v50  ;;  %2396 = vmatpush1.bf16.msra.mxu1 %v2042_v51  ;;  %v1767_v50 = vld [vmem:[#allocation3 + $0xb8] sm:$0xff]  ;;  %v1764_v51 = vld [vmem:[#allocation3 + $0xa0] sm:$0xff] }
 0x56c   : > { %2268 = vmatprep.subr.bf16.mxu0 %v2049_v53  ;;  %2397 = vmatprep.subr.bf16.mxu1 %v2051_v54  ;;  %v1766_v53 = vld [vmem:[#allocation3 + $0xb0] sm:$0xff]  ;;  %v1773_v54 = vld [vmem:[#allocation3 + $0xe8] sm:$0xff] }
 0x56f   : > { %2269 = vmatpush1.bf16.msra.mxu0 %v2048_v55  ;;  %2398 = vmatpush1.bf16.msra.mxu1 %v2050_v56  ;;  %v1775_v55 = vld [vmem:[#allocation3 + $0xf8] sm:$0xff]  ;;  %v1772_v56 = vld [vmem:[#allocation3 + $0xe0] sm:$0xff] }
 0x570   : > { %2270 = vmatprep.subr.bf16.mxu0 %v2057_v57  ;;  %2399 = vmatprep.subr.bf16.mxu1 %v2059_v58  ;;  %v1774_v57 = vld [vmem:[#allocation3 + $0xf0] sm:$0xff]  ;;  %v1781_v58 = vld [vmem:[#allocation3 + $0x128] sm:$0xff] }
 0x573   : > { %2271 = vmatpush1.bf16.msra.mxu0 %v2056_v59  ;;  %2400 = vmatpush1.bf16.msra.mxu1 %v2058_v60  ;;  %v1783_v59 = vld [vmem:[#allocation3 + $0x138] sm:$0xff]  ;;  %v1782_v60 = vld [vmem:[#allocation3 + $0x130] sm:$0xff] }
 0x574   : > { %2272 = vmatprep.subr.bf16.mxu0 %v2065_v61  ;;  %2401 = vmatprep.subr.bf16.mxu1 %v2067_v62  ;;  %v1789_v61 = vld [vmem:[#allocation3 + $0x168] sm:$0xff]  ;;  %v1791_v62 = vld [vmem:[#allocation3 + $0x178] sm:$0xff] }
 0x577   : > { %2273 = vmatpush1.bf16.msra.mxu0 %v2064_v63  ;;  %2402 = vmatpush1.bf16.msra.mxu1 %v2066_v17  ;;  %v1788_v63 = vld [vmem:[#allocation3 + $0x160] sm:$0xff]  ;;  %v1790_v17 = vld [vmem:[#allocation3 + $0x170] sm:$0xff] }
 0x578   : > { %2274 = vmatprep.subr.bf16.mxu0 %v2073_v0  ;;  %2403 = vmatprep.subr.bf16.mxu1 %v2075_v1  ;;  %v1797_v0 = vld [vmem:[#allocation3 + $0x1a8] sm:$0xff]  ;;  %v1799_v1 = vld [vmem:[#allocation3 + $0x1b8] sm:$0xff] }
 0x57b   : > { %2275 = vmatpush1.bf16.msra.mxu0 %v2072_v2  ;;  %2404 = vmatpush1.bf16.msra.mxu1 %v2074_v3  ;;  %v1796_v2 = vld [vmem:[#allocation3 + $0x1a0] sm:$0xff]  ;;  %v1798_v3 = vld [vmem:[#allocation3 + $0x1b0] sm:$0xff] }
 0x57c   : > { %2276 = vmatprep.subr.bf16.mxu0 %v2081_v5  ;;  %2405 = vmatprep.subr.bf16.mxu1 %v2083_v6  ;;  %v1805_v5 = vld [vmem:[#allocation3 + $0x1e8] sm:$0xff]  ;;  %v1807_v6 = vld [vmem:[#allocation3 + $0x1f8] sm:$0xff] }
 0x57f   : > { %2277 = vmatpush1.bf16.msra.mxu0 %v2080_v8  ;;  %2406 = vmatpush1.bf16.msra.mxu1 %v2082_v9  ;;  %v1804_v8 = vld [vmem:[#allocation3 + $0x1e0] sm:$0xff]  ;;  %v1806_v9 = vld [vmem:[#allocation3 + $0x1f0] sm:$0xff] }
 0x580   : > { %2278 = vmatprep.subr.bf16.mxu0 %v2089_v10  ;;  %2407 = vmatprep.subr.bf16.mxu1 %v2091_v11  ;;  %v1813_v10 = vld [vmem:[#allocation3 + $0x228] sm:$0xff]  ;;  %v1815_v11 = vld [vmem:[#allocation3 + $0x238] sm:$0xff] }
 0x583   : > { %2279 = vmatpush1.bf16.msra.mxu0 %v2088_v12  ;;  %2408 = vmatpush1.bf16.msra.mxu1 %v2090_v13  ;;  %v1812_v12 = vld [vmem:[#allocation3 + $0x220] sm:$0xff]  ;;  %v1814_v13 = vld [vmem:[#allocation3 + $0x230] sm:$0xff] }
 0x584   : > { %2280 = vmatprep.subr.bf16.mxu0 %v2097_v14  ;;  %2409 = vmatprep.subr.bf16.mxu1 %v2099_v15  ;;  %v1821_v14 = vld [vmem:[#allocation3 + $0x268] sm:$0xff]  ;;  %v1823_v15 = vld [vmem:[#allocation3 + $0x278] sm:$0xff] }
 0x587   : > { %2281 = vmatpush1.bf16.msra.mxu0 %v2096_v18  ;;  %2410 = vmatpush1.bf16.msra.mxu1 %v2098_v21  ;;  %v1820_v18 = vld [vmem:[#allocation3 + $0x260] sm:$0xff]  ;;  %v1822_v21 = vld [vmem:[#allocation3 + $0x270] sm:$0xff] }
 0x588   : > { %2282 = vmatprep.subr.bf16.mxu0 %v2105_v25  ;;  %2411 = vmatprep.subr.bf16.mxu1 %v2107_v26  ;;  %v1829_v25 = vld [vmem:[#allocation3 + $0x2a8] sm:$0xff]  ;;  %v1831_v26 = vld [vmem:[#allocation3 + $0x2b8] sm:$0xff] }
 0x58b   : > { %2283 = vmatpush1.bf16.msra.mxu0 %v2104_v27  ;;  %2412 = vmatpush1.bf16.msra.mxu1 %v2106_v28  ;;  %v1828_v27 = vld [vmem:[#allocation3 + $0x2a0] sm:$0xff]  ;;  %v1830_v28 = vld [vmem:[#allocation3 + $0x2b0] sm:$0xff] }
 0x58c   : > { %2284 = vmatprep.subr.bf16.mxu0 %v2113_v29  ;;  %2413 = vmatprep.subr.bf16.mxu1 %v2115_v30  ;;  %v1837_v29 = vld [vmem:[#allocation3 + $0x2e8] sm:$0xff]  ;;  %v1839_v30 = vld [vmem:[#allocation3 + $0x2f8] sm:$0xff] }
 0x58f   : > { %2285 = vmatpush1.bf16.msra.mxu0 %v2112_v33  ;;  %2414 = vmatpush1.bf16.msra.mxu1 %v2114_v34  ;;  %v1836_v33 = vld [vmem:[#allocation3 + $0x2e0] sm:$0xff]  ;;  %v1838_v34 = vld [vmem:[#allocation3 + $0x2f0] sm:$0xff] }
 0x590   : > { %2286 = vmatprep.subr.bf16.mxu0 %v2121_v35  ;;  %2415 = vmatprep.subr.bf16.mxu1 %v2123_v36  ;;  %v1845_v35 = vld [vmem:[#allocation3 + $0x328] sm:$0xff]  ;;  %v1847_v36 = vld [vmem:[#allocation3 + $0x338] sm:$0xff] }
 0x593   : > { %2287 = vmatpush1.bf16.msra.mxu0 %v2120_v37  ;;  %2416 = vmatpush1.bf16.msra.mxu1 %v2122_v38  ;;  %v1844_v37 = vld [vmem:[#allocation3 + $0x320] sm:$0xff]  ;;  %v1846_v38 = vld [vmem:[#allocation3 + $0x330] sm:$0xff] }
 0x594   : > { %2428 = vmatprep.subr.bf16.mxu0 %v1749_v39  ;;  %2557 = vmatprep.subr.bf16.mxu1 %v1751_v40  ;;  %v1853_v39 = vld [vmem:[#allocation3 + $0x368] sm:$0xff]  ;;  %v1855_v40 = vld [vmem:[#allocation3 + $0x378] sm:$0xff] }
 0x596   : > { %2289 = vmatmul.mubr.bf16.vlgmr.msra.gmra.mrb[12].mxu0 %v5547_v52  ;;  %2418 = vmatmul.mubr.bf16.vlgmr.msra.gmra.mrb[12].mxu1 %v5547_v52 }
 0x597   : > { %2429 = vmatpush1.bf16.msra.mxu0 %v1748_v41  ;;  %2558 = vmatpush1.bf16.msra.mxu1 %v1750_v42  ;;  %v1852_v41 = vld [vmem:[#allocation3 + $0x360] sm:$0xff]  ;;  %v1854_v42 = vld [vmem:[#allocation3 + $0x370] sm:$0xff] }
 0x598   : > { %2430 = vmatprep.subr.bf16.mxu0 %v1757_v44  ;;  %2559 = vmatprep.subr.bf16.mxu1 %v1759_v46  ;;  %v1861_v44 = vld [vmem:[#allocation3 + $0x3a8] sm:$0xff]  ;;  %v1863_v46 = vld [vmem:[#allocation3 + $0x3b8] sm:$0xff] }
 0x599   : > { %2460 = vmatprep.mubr.bf16.mxu0 %v5533_v7  ;;  %2589 = vmatprep.mubr.bf16.mxu1 %v5533_v7  ;;  %v1780_v7 = vld [vmem:[#allocation3 + $0x120] sm:$0xff] }
 0x59b   : > { %2431 = vmatpush1.bf16.msra.mxu0 %v1756_v47  ;;  %2560 = vmatpush1.bf16.msra.mxu1 %v1758_v48  ;;  %v1860_v47 = vld [vmem:[#allocation3 + $0x3a0] sm:$0xff]  ;;  %v1862_v48 = vld [vmem:[#allocation3 + $0x3b0] sm:$0xff] }
 0x59c   : > { %2432 = vmatprep.subr.bf16.mxu0 %v1765_v49  ;;  %2561 = vmatprep.subr.bf16.mxu1 %v1767_v50  ;;  %v1869_v49 = vld [vmem:[#allocation3 + $0x3e8] sm:$0xff]  ;;  %v1871_v50 = vld [vmem:[#allocation3 + $0x3f8] sm:$0xff] }
 0x59f   : > { %2433 = vmatpush1.bf16.msra.mxu0 %v1764_v51  ;;  %2562 = vmatpush1.bf16.msra.mxu1 %v1766_v53  ;;  %v1868_v51 = vld [vmem:[#allocation3 + $0x3e0] sm:$0xff]  ;;  %v1870_v53 = vld [vmem:[#allocation3 + $0x3f0] sm:$0xff] }
 0x5a0   : > { %2434 = vmatprep.subr.bf16.mxu0 %v1773_v54  ;;  %2563 = vmatprep.subr.bf16.mxu1 %v1775_v55  ;;  %v1877_v54 = vld [vmem:[#allocation3 + $0x428] sm:$0xff]  ;;  %v1879_v55 = vld [vmem:[#allocation3 + $0x438] sm:$0xff] }
 0x5a3   : > { %2435 = vmatpush1.bf16.msra.mxu0 %v1772_v56  ;;  %2564 = vmatpush1.bf16.msra.mxu1 %v1774_v57  ;;  %v1876_v56 = vld [vmem:[#allocation3 + $0x420] sm:$0xff]  ;;  %v1878_v57 = vld [vmem:[#allocation3 + $0x430] sm:$0xff] }
 0x5a4   : > { %2436 = vmatprep.subr.bf16.mxu0 %v1781_v58  ;;  %2565 = vmatprep.subr.bf16.mxu1 %v1783_v59  ;;  %v1885_v58 = vld [vmem:[#allocation3 + $0x468] sm:$0xff]  ;;  %v1887_v59 = vld [vmem:[#allocation3 + $0x478] sm:$0xff] }
 0x5a7   : > { %2437 = vmatpush1.bf16.msra.mxu0 %v1780_v7  ;;  %2566 = vmatpush1.bf16.msra.mxu1 %v1782_v60  ;;  %v1884_v7 = vld [vmem:[#allocation3 + $0x460] sm:$0xff]  ;;  %v1886_v60 = vld [vmem:[#allocation3 + $0x470] sm:$0xff] }
 0x5a8   : > { %2438 = vmatprep.subr.bf16.mxu0 %v1789_v61  ;;  %2567 = vmatprep.subr.bf16.mxu1 %v1791_v62  ;;  %v1893_v61 = vld [vmem:[#allocation3 + $0x4a8] sm:$0xff]  ;;  %v1895_v62 = vld [vmem:[#allocation3 + $0x4b8] sm:$0xff] }
 0x5ab   : > { %2439 = vmatpush1.bf16.msra.mxu0 %v1788_v63  ;;  %2568 = vmatpush1.bf16.msra.mxu1 %v1790_v17  ;;  %v1892_v63 = vld [vmem:[#allocation3 + $0x4a0] sm:$0xff]  ;;  %v1894_v17 = vld [vmem:[#allocation3 + $0x4b0] sm:$0xff] }
 0x5ac   : > { %2440 = vmatprep.subr.bf16.mxu0 %v1797_v0  ;;  %2569 = vmatprep.subr.bf16.mxu1 %v1799_v1  ;;  %v1901_v0 = vld [vmem:[#allocation3 + $0x4e8] sm:$0xff]  ;;  %v1900_v1 = vld [vmem:[#allocation3 + $0x4e0] sm:$0xff] }
 0x5af   : > { %2441 = vmatpush1.bf16.msra.mxu0 %v1796_v2  ;;  %2570 = vmatpush1.bf16.msra.mxu1 %v1798_v3  ;;  %v1902_v2 = vld [vmem:[#allocation3 + $0x4f0] sm:$0xff]  ;;  %v1909_v3 = vld [vmem:[#allocation3 + $0x528] sm:$0xff] }
 0x5b0   : > { %2442 = vmatprep.subr.bf16.mxu0 %v1805_v5  ;;  %2571 = vmatprep.subr.bf16.mxu1 %v1807_v6  ;;  %v1911_v5 = vld [vmem:[#allocation3 + $0x538] sm:$0xff]  ;;  %v1910_v6 = vld [vmem:[#allocation3 + $0x530] sm:$0xff] }
 0x5b3   : > { %2443 = vmatpush1.bf16.msra.mxu0 %v1804_v8  ;;  %2572 = vmatpush1.bf16.msra.mxu1 %v1806_v9  ;;  %v1917_v8 = vld [vmem:[#allocation3 + $0x568] sm:$0xff]  ;;  %v1919_v9 = vld [vmem:[#allocation3 + $0x578] sm:$0xff] }
 0x5b4   : > { %2444 = vmatprep.subr.bf16.mxu0 %v1813_v10  ;;  %2573 = vmatprep.subr.bf16.mxu1 %v1815_v11  ;;  %v1916_v10 = vld [vmem:[#allocation3 + $0x560] sm:$0xff]  ;;  %v1918_v11 = vld [vmem:[#allocation3 + $0x570] sm:$0xff] }
 0x5b7   : > { %2445 = vmatpush1.bf16.msra.mxu0 %v1812_v12  ;;  %2574 = vmatpush1.bf16.msra.mxu1 %v1814_v13  ;;  %v1925_v12 = vld [vmem:[#allocation3 + $0x5a8] sm:$0xff]  ;;  %v1927_v13 = vld [vmem:[#allocation3 + $0x5b8] sm:$0xff] }
 0x5b8   : > { %2446 = vmatprep.subr.bf16.mxu0 %v1821_v14  ;;  %2575 = vmatprep.subr.bf16.mxu1 %v1823_v15  ;;  %v1924_v14 = vld [vmem:[#allocation3 + $0x5a0] sm:$0xff]  ;;  %v1926_v15 = vld [vmem:[#allocation3 + $0x5b0] sm:$0xff] }
 0x5bb   : > { %2447 = vmatpush1.bf16.msra.mxu0 %v1820_v18  ;;  %2576 = vmatpush1.bf16.msra.mxu1 %v1822_v21  ;;  %v1933_v18 = vld [vmem:[#allocation3 + $0x5e8] sm:$0xff]  ;;  %v1935_v21 = vld [vmem:[#allocation3 + $0x5f8] sm:$0xff] }
 0x5bc   : > { %2448 = vmatprep.subr.bf16.mxu0 %v1829_v25  ;;  %2577 = vmatprep.subr.bf16.mxu1 %v1831_v26  ;;  %v1932_v25 = vld [vmem:[#allocation3 + $0x5e0] sm:$0xff]  ;;  %v1934_v26 = vld [vmem:[#allocation3 + $0x5f0] sm:$0xff] }
 0x5bf   : > { %2449 = vmatpush1.bf16.msra.mxu0 %v1828_v27  ;;  %2578 = vmatpush1.bf16.msra.mxu1 %v1830_v28  ;;  %v1941_v27 = vld [vmem:[#allocation3 + $0x628] sm:$0xff]  ;;  %v1943_v28 = vld [vmem:[#allocation3 + $0x638] sm:$0xff] }
 0x5c0   : > { %2450 = vmatprep.subr.bf16.mxu0 %v1837_v29  ;;  %2579 = vmatprep.subr.bf16.mxu1 %v1839_v30  ;;  %v1940_v29 = vld [vmem:[#allocation3 + $0x620] sm:$0xff]  ;;  %v1942_v30 = vld [vmem:[#allocation3 + $0x630] sm:$0xff] }
 0x5c3   : > { %2451 = vmatpush1.bf16.msra.mxu0 %v1836_v33  ;;  %2580 = vmatpush1.bf16.msra.mxu1 %v1838_v34  ;;  %v1949_v33 = vld [vmem:[#allocation3 + $0x668] sm:$0xff]  ;;  %v1951_v34 = vld [vmem:[#allocation3 + $0x678] sm:$0xff] }
 0x5c4   : > { %2452 = vmatprep.subr.bf16.mxu0 %v1845_v35  ;;  %2581 = vmatprep.subr.bf16.mxu1 %v1847_v36  ;;  %v1948_v35 = vld [vmem:[#allocation3 + $0x660] sm:$0xff]  ;;  %v1950_v36 = vld [vmem:[#allocation3 + $0x670] sm:$0xff] }
 0x5c7   : > { %2453 = vmatpush1.bf16.msra.mxu0 %v1844_v37  ;;  %2582 = vmatpush1.bf16.msra.mxu1 %v1846_v38  ;;  %v1957_v37 = vld [vmem:[#allocation3 + $0x6a8] sm:$0xff]  ;;  %v1959_v38 = vld [vmem:[#allocation3 + $0x6b8] sm:$0xff] }
 0x5c8   : > { %2454 = vmatprep.subr.bf16.mxu0 %v1853_v39  ;;  %2583 = vmatprep.subr.bf16.mxu1 %v1855_v40  ;;  %v1956_v39 = vld [vmem:[#allocation3 + $0x6a0] sm:$0xff]  ;;  %v1958_v40 = vld [vmem:[#allocation3 + $0x6b0] sm:$0xff] }
 0x5cb   : > { %2455 = vmatpush1.bf16.msra.mxu0 %v1852_v41  ;;  %2584 = vmatpush1.bf16.msra.mxu1 %v1854_v42  ;;  %v1965_v41 = vld [vmem:[#allocation3 + $0x6e8] sm:$0xff]  ;;  %v1967_v42 = vld [vmem:[#allocation3 + $0x6f8] sm:$0xff] }
 0x5cc   : > { %2456 = vmatprep.subr.bf16.mxu0 %v1861_v44  ;;  %2585 = vmatprep.subr.bf16.mxu1 %v1863_v46  ;;  %v1964_v44 = vld [vmem:[#allocation3 + $0x6e0] sm:$0xff]  ;;  %v1966_v46 = vld [vmem:[#allocation3 + $0x6f0] sm:$0xff] }
 0x5cf   : > { %2457 = vmatpush1.bf16.msra.mxu0 %v1860_v47  ;;  %2586 = vmatpush1.bf16.msra.mxu1 %v1862_v48  ;;  %v1973_v47 = vld [vmem:[#allocation3 + $0x728] sm:$0xff]  ;;  %v1975_v48 = vld [vmem:[#allocation3 + $0x738] sm:$0xff] }
 0x5d0   : > { %2458 = vmatprep.subr.bf16.mxu0 %v1869_v49  ;;  %2587 = vmatprep.subr.bf16.mxu1 %v1871_v50  ;;  %v1972_v49 = vld [vmem:[#allocation3 + $0x720] sm:$0xff]  ;;  %v1974_v50 = vld [vmem:[#allocation3 + $0x730] sm:$0xff] }
 0x5d3   : > { %2459 = vmatpush1.bf16.msra.mxu0 %v1868_v51  ;;  %2588 = vmatpush1.bf16.msra.mxu1 %v1870_v53  ;;  %v1981_v51 = vld [vmem:[#allocation3 + $0x768] sm:$0xff]  ;;  %v1983_v53 = vld [vmem:[#allocation3 + $0x778] sm:$0xff] }
 0x5d4   : > { %2471 = vmatprep.subr.bf16.mxu0 %v1877_v54  ;;  %2600 = vmatprep.subr.bf16.mxu1 %v1879_v55  ;;  %v1980_v54 = vld [vmem:[#allocation3 + $0x760] sm:$0xff]  ;;  %v1982_v55 = vld [vmem:[#allocation3 + $0x770] sm:$0xff] }
 0x5d6   : > { %2461 = vmatmul.mubr.bf16.vlgmr.msra.gmra.mrb[16].mxu0 %v5530_v4  ;;  %2590 = vmatmul.mubr.bf16.vlgmr.msra.gmra.mrb[16].mxu1 %v5530_v4  ;;  %v1903_v4 = vld [vmem:[#allocation3 + $0x4f8] sm:$0xff] }
 0x5d7   : > { %2472 = vmatpush1.bf16.msra.mxu0 %v1876_v56  ;;  %2601 = vmatpush1.bf16.msra.mxu1 %v1878_v57  ;;  %v1989_v56 = vld [vmem:[#allocation3 + $0x7a8] sm:$0xff]  ;;  %v1991_v57 = vld [vmem:[#allocation3 + $0x7b8] sm:$0xff] }
 0x5d8   : > { %2473 = vmatprep.subr.bf16.mxu0 %v1885_v58  ;;  %2602 = vmatprep.subr.bf16.mxu1 %v1887_v59  ;;  %v1988_v58 = vld [vmem:[#allocation3 + $0x7a0] sm:$0xff]  ;;  %v1990_v59 = vld [vmem:[#allocation3 + $0x7b0] sm:$0xff] }
 0x5d9   : > { %2503 = vmatprep.mubr.bf16.mxu0 %v5537_v24  ;;  %2632 = vmatprep.mubr.bf16.mxu1 %v5537_v24  ;;  %v1908_v24 = vld [vmem:[#allocation3 + $0x520] sm:$0xff] }
 0x5db   : > { %2474 = vmatpush1.bf16.msra.mxu0 %v1884_v7  ;;  %2603 = vmatpush1.bf16.msra.mxu1 %v1886_v60  ;;  %v1997_v7 = vld [vmem:[#allocation3 + $0x7e8] sm:$0xff]  ;;  %v1999_v60 = vld [vmem:[#allocation3 + $0x7f8] sm:$0xff] }
 0x5dc   : > { %2475 = vmatprep.subr.bf16.mxu0 %v1893_v61  ;;  %2604 = vmatprep.subr.bf16.mxu1 %v1895_v62  ;;  %v1996_v61 = vld [vmem:[#allocation3 + $0x7e0] sm:$0xff]  ;;  %v1998_v62 = vld [vmem:[#allocation3 + $0x7f0] sm:$0xff] }
 0x5df   : > { %2476 = vmatpush1.bf16.msra.mxu0 %v1892_v63  ;;  %2605 = vmatpush1.bf16.msra.mxu1 %v1894_v17  ;;  %v2005_v63 = vld [vmem:[#allocation3 + $0x828] sm:$0xff]  ;;  %v2007_v17 = vld [vmem:[#allocation3 + $0x838] sm:$0xff] }
 0x5e0   : > { %2477 = vmatprep.subr.bf16.mxu0 %v1901_v0  ;;  %2606 = vmatprep.subr.bf16.mxu1 %v1903_v4  ;;  %v2004_v0 = vld [vmem:[#allocation3 + $0x820] sm:$0xff]  ;;  %v2006_v4 = vld [vmem:[#allocation3 + $0x830] sm:$0xff] }
 0x5e3   : > { %2478 = vmatpush1.bf16.msra.mxu0 %v1900_v1  ;;  %2607 = vmatpush1.bf16.msra.mxu1 %v1902_v2  ;;  %v2013_v1 = vld [vmem:[#allocation3 + $0x868] sm:$0xff]  ;;  %v2015_v2 = vld [vmem:[#allocation3 + $0x878] sm:$0xff] }
 0x5e4   : > { %2479 = vmatprep.subr.bf16.mxu0 %v1909_v3  ;;  %2608 = vmatprep.subr.bf16.mxu1 %v1911_v5  ;;  %v2012_v3 = vld [vmem:[#allocation3 + $0x860] sm:$0xff]  ;;  %v2014_v5 = vld [vmem:[#allocation3 + $0x870] sm:$0xff] }
 0x5e7   : > { %2480 = vmatpush1.bf16.msra.mxu0 %v1908_v24  ;;  %2609 = vmatpush1.bf16.msra.mxu1 %v1910_v6  ;;  %v2021_v24 = vld [vmem:[#allocation3 + $0x8a8] sm:$0xff]  ;;  %v2023_v6 = vld [vmem:[#allocation3 + $0x8b8] sm:$0xff] }
 0x5e8   : > { %2481 = vmatprep.subr.bf16.mxu0 %v1917_v8  ;;  %2610 = vmatprep.subr.bf16.mxu1 %v1919_v9  ;;  %v2020_v8 = vld [vmem:[#allocation3 + $0x8a0] sm:$0xff]  ;;  %v2022_v9 = vld [vmem:[#allocation3 + $0x8b0] sm:$0xff] }
 0x5eb   : > { %2482 = vmatpush1.bf16.msra.mxu0 %v1916_v10  ;;  %2611 = vmatpush1.bf16.msra.mxu1 %v1918_v11  ;;  %v2029_v10 = vld [vmem:[#allocation3 + $0x8e8] sm:$0xff]  ;;  %v2028_v11 = vld [vmem:[#allocation3 + $0x8e0] sm:$0xff] }
 0x5ec   : > { %2483 = vmatprep.subr.bf16.mxu0 %v1925_v12  ;;  %2612 = vmatprep.subr.bf16.mxu1 %v1927_v13  ;;  %v2030_v12 = vld [vmem:[#allocation3 + $0x8f0] sm:$0xff]  ;;  %v2037_v13 = vld [vmem:[#allocation3 + $0x928] sm:$0xff] }
 0x5ef   : > { %2484 = vmatpush1.bf16.msra.mxu0 %v1924_v14  ;;  %2613 = vmatpush1.bf16.msra.mxu1 %v1926_v15  ;;  %v2039_v14 = vld [vmem:[#allocation3 + $0x938] sm:$0xff]  ;;  %v2038_v15 = vld [vmem:[#allocation3 + $0x930] sm:$0xff] }
 0x5f0   : > { %2485 = vmatprep.subr.bf16.mxu0 %v1933_v18  ;;  %2614 = vmatprep.subr.bf16.mxu1 %v1935_v21  ;;  %v2045_v18 = vld [vmem:[#allocation3 + $0x968] sm:$0xff]  ;;  %v2047_v21 = vld [vmem:[#allocation3 + $0x978] sm:$0xff] }
 0x5f3   : > { %2486 = vmatpush1.bf16.msra.mxu0 %v1932_v25  ;;  %2615 = vmatpush1.bf16.msra.mxu1 %v1934_v26  ;;  %v2044_v25 = vld [vmem:[#allocation3 + $0x960] sm:$0xff]  ;;  %v2046_v26 = vld [vmem:[#allocation3 + $0x970] sm:$0xff] }
 0x5f4   : > { %2487 = vmatprep.subr.bf16.mxu0 %v1941_v27  ;;  %2616 = vmatprep.subr.bf16.mxu1 %v1943_v28  ;;  %v2053_v27 = vld [vmem:[#allocation3 + $0x9a8] sm:$0xff]  ;;  %v2055_v28 = vld [vmem:[#allocation3 + $0x9b8] sm:$0xff] }
 0x5f7   : > { %2488 = vmatpush1.bf16.msra.mxu0 %v1940_v29  ;;  %2617 = vmatpush1.bf16.msra.mxu1 %v1942_v30  ;;  %v2052_v29 = vld [vmem:[#allocation3 + $0x9a0] sm:$0xff]  ;;  %v2054_v30 = vld [vmem:[#allocation3 + $0x9b0] sm:$0xff] }
 0x5f8   : > { %2489 = vmatprep.subr.bf16.mxu0 %v1949_v33  ;;  %2618 = vmatprep.subr.bf16.mxu1 %v1951_v34  ;;  %v2061_v33 = vld [vmem:[#allocation3 + $0x9e8] sm:$0xff]  ;;  %v2063_v34 = vld [vmem:[#allocation3 + $0x9f8] sm:$0xff] }
 0x5fb   : > { %2490 = vmatpush1.bf16.msra.mxu0 %v1948_v35  ;;  %2619 = vmatpush1.bf16.msra.mxu1 %v1950_v36  ;;  %v2060_v35 = vld [vmem:[#allocation3 + $0x9e0] sm:$0xff]  ;;  %v2062_v36 = vld [vmem:[#allocation3 + $0x9f0] sm:$0xff] }
 0x5fc   : > { %2491 = vmatprep.subr.bf16.mxu0 %v1957_v37  ;;  %2620 = vmatprep.subr.bf16.mxu1 %v1959_v38  ;;  %v2069_v37 = vld [vmem:[#allocation3 + $0xa28] sm:$0xff]  ;;  %v2071_v38 = vld [vmem:[#allocation3 + $0xa38] sm:$0xff] }
 0x5ff   : > { %2492 = vmatpush1.bf16.msra.mxu0 %v1956_v39  ;;  %2621 = vmatpush1.bf16.msra.mxu1 %v1958_v40  ;;  %v2068_v39 = vld [vmem:[#allocation3 + $0xa20] sm:$0xff]  ;;  %v2070_v40 = vld [vmem:[#allocation3 + $0xa30] sm:$0xff] }
 0x600   : > { %2493 = vmatprep.subr.bf16.mxu0 %v1965_v41  ;;  %2622 = vmatprep.subr.bf16.mxu1 %v1967_v42  ;;  %v2077_v41 = vld [vmem:[#allocation3 + $0xa68] sm:$0xff]  ;;  %v2079_v42 = vld [vmem:[#allocation3 + $0xa78] sm:$0xff] }
 0x603   : > { %2494 = vmatpush1.bf16.msra.mxu0 %v1964_v44  ;;  %2623 = vmatpush1.bf16.msra.mxu1 %v1966_v46  ;;  %v2076_v44 = vld [vmem:[#allocation3 + $0xa60] sm:$0xff]  ;;  %v2078_v46 = vld [vmem:[#allocation3 + $0xa70] sm:$0xff] }
 0x604   : > { %2495 = vmatprep.subr.bf16.mxu0 %v1973_v47  ;;  %2624 = vmatprep.subr.bf16.mxu1 %v1975_v48  ;;  %v2085_v47 = vld [vmem:[#allocation3 + $0xaa8] sm:$0xff]  ;;  %v2087_v48 = vld [vmem:[#allocation3 + $0xab8] sm:$0xff] }
 0x607   : > { %2496 = vmatpush1.bf16.msra.mxu0 %v1972_v49  ;;  %2625 = vmatpush1.bf16.msra.mxu1 %v1974_v50  ;;  %v2084_v49 = vld [vmem:[#allocation3 + $0xaa0] sm:$0xff]  ;;  %v2086_v50 = vld [vmem:[#allocation3 + $0xab0] sm:$0xff] }
 0x608   : > { %2497 = vmatprep.subr.bf16.mxu0 %v1981_v51  ;;  %2626 = vmatprep.subr.bf16.mxu1 %v1983_v53  ;;  %v2093_v51 = vld [vmem:[#allocation3 + $0xae8] sm:$0xff]  ;;  %v2095_v53 = vld [vmem:[#allocation3 + $0xaf8] sm:$0xff] }
 0x60b   : > { %2498 = vmatpush1.bf16.msra.mxu0 %v1980_v54  ;;  %2627 = vmatpush1.bf16.msra.mxu1 %v1982_v55  ;;  %v2092_v54 = vld [vmem:[#allocation3 + $0xae0] sm:$0xff]  ;;  %v2094_v55 = vld [vmem:[#allocation3 + $0xaf0] sm:$0xff] }
 0x60c   : > { %2499 = vmatprep.subr.bf16.mxu0 %v1989_v56  ;;  %2628 = vmatprep.subr.bf16.mxu1 %v1991_v57  ;;  %v2101_v56 = vld [vmem:[#allocation3 + $0xb28] sm:$0xff]  ;;  %v2103_v57 = vld [vmem:[#allocation3 + $0xb38] sm:$0xff] }
 0x60f   : > { %2500 = vmatpush1.bf16.msra.mxu0 %v1988_v58  ;;  %2629 = vmatpush1.bf16.msra.mxu1 %v1990_v59  ;;  %v2100_v58 = vld [vmem:[#allocation3 + $0xb20] sm:$0xff]  ;;  %v2102_v59 = vld [vmem:[#allocation3 + $0xb30] sm:$0xff] }
 0x610   : > { %2501 = vmatprep.subr.bf16.mxu0 %v1997_v7  ;;  %2630 = vmatprep.subr.bf16.mxu1 %v1999_v60  ;;  %v2109_v7 = vld [vmem:[#allocation3 + $0xb68] sm:$0xff]  ;;  %v2111_v60 = vld [vmem:[#allocation3 + $0xb78] sm:$0xff] }
 0x613   : > { %2502 = vmatpush1.bf16.msra.mxu0 %v1996_v61  ;;  %2631 = vmatpush1.bf16.msra.mxu1 %v1998_v62  ;;  %v2108_v61 = vld [vmem:[#allocation3 + $0xb60] sm:$0xff]  ;;  %v2110_v62 = vld [vmem:[#allocation3 + $0xb70] sm:$0xff] }
 0x614   : > { %2514 = vmatprep.subr.bf16.mxu0 %v2005_v63  ;;  %2643 = vmatprep.subr.bf16.mxu1 %v2007_v17  ;;  %v2117_v63 = vld [vmem:[#allocation3 + $0xba8] sm:$0xff]  ;;  %v2119_v17 = vld [vmem:[#allocation3 + $0xbb8] sm:$0xff] }
 0x616   : > { %2504 = vmatmul.mubr.bf16.vlgmr.msra.gmra.mrb[16].mxu0 %v5535_v16  ;;  %2633 = vmatmul.mubr.bf16.vlgmr.msra.gmra.mrb[16].mxu1 %v5535_v16  ;;  %v2031_v16 = vld [vmem:[#allocation3 + $0x8f8] sm:$0xff] }
 0x617   : > { %2515 = vmatpush1.bf16.msra.mxu0 %v2004_v0  ;;  %2644 = vmatpush1.bf16.msra.mxu1 %v2006_v4  ;;  %v2116_v0 = vld [vmem:[#allocation3 + $0xba0] sm:$0xff]  ;;  %v2118_v4 = vld [vmem:[#allocation3 + $0xbb0] sm:$0xff] }
 0x618   : > { %2516 = vmatprep.subr.bf16.mxu0 %v2013_v1  ;;  %2645 = vmatprep.subr.bf16.mxu1 %v2015_v2  ;;  %v2125_v1 = vld [vmem:[#allocation3 + $0xbe8] sm:$0xff]  ;;  %v2127_v2 = vld [vmem:[#allocation3 + $0xbf8] sm:$0xff] }
 0x619   : > { %2546 = vmatprep.mubr.bf16.mxu0 %v5549_v23  ;;  %2675 = vmatprep.mubr.bf16.mxu1 %v5549_v23  ;;  %v2036_v23 = vld [vmem:[#allocation3 + $0x920] sm:$0xff] }
 0x61b   : > { %2517 = vmatpush1.bf16.msra.mxu0 %v2012_v3  ;;  %2646 = vmatpush1.bf16.msra.mxu1 %v2014_v5  ;;  %v2124_v3 = vld [vmem:[#allocation3 + $0xbe0] sm:$0xff]  ;;  %v2126_v5 = vld [vmem:[#allocation3 + $0xbf0] sm:$0xff] }
 0x61c   : > { %2518 = vmatprep.subr.bf16.mxu0 %v2021_v24  ;;  %2647 = vmatprep.subr.bf16.mxu1 %v2023_v6  ;;  %v2128_v24 = vld [vmem:[#allocation15] sm:$0xff] }
 0x61d   : > { %v2133_v6 = vrot.slane %v2128_v24, %v5484_v20 }
 0x61f   : > { %2519 = vmatpush1.bf16.msra.mxu0 %v2020_v8  ;;  %2648 = vmatpush1.bf16.msra.mxu1 %v2022_v9  ;;  %v2141_v8 = vrot.slane %v2128_v24, %v5492_v43  ;;  %v2137_v9 = vrot.slane %v2128_v24, %v5487_v22 }
 0x620   : > { %2520 = vmatprep.subr.bf16.mxu0 %v2029_v10  ;;  %2649 = vmatprep.subr.bf16.mxu1 %v2031_v16  ;;  %v2145_v10 = vrot.slane %v2128_v24, %v5495_v45 }
 0x623   : > { %2521 = vmatpush1.bf16.msra.mxu0 %v2028_v11  ;;  %2650 = vmatpush1.bf16.msra.mxu1 %v2030_v12 }
 0x624   : > { %2522 = vmatprep.subr.bf16.mxu0 %v2037_v13  ;;  %2651 = vmatprep.subr.bf16.mxu1 %v2039_v14 }
 0x627   : > { %2523 = vmatpush1.bf16.msra.mxu0 %v2036_v23  ;;  %2652 = vmatpush1.bf16.msra.mxu1 %v2038_v15 }
 0x628   : > { %2524 = vmatprep.subr.bf16.mxu0 %v2045_v18  ;;  %2653 = vmatprep.subr.bf16.mxu1 %v2047_v21 }
 0x62b   : > { %2525 = vmatpush1.bf16.msra.mxu0 %v2044_v25  ;;  %2654 = vmatpush1.bf16.msra.mxu1 %v2046_v26 }
 0x62c   : > { %2526 = vmatprep.subr.bf16.mxu0 %v2053_v27  ;;  %2655 = vmatprep.subr.bf16.mxu1 %v2055_v28 }
 0x62f   : > { %2527 = vmatpush1.bf16.msra.mxu0 %v2052_v29  ;;  %2656 = vmatpush1.bf16.msra.mxu1 %v2054_v30 }
 0x630   : > { %2528 = vmatprep.subr.bf16.mxu0 %v2061_v33  ;;  %2657 = vmatprep.subr.bf16.mxu1 %v2063_v34 }
 0x633   : > { %2529 = vmatpush1.bf16.msra.mxu0 %v2060_v35  ;;  %2658 = vmatpush1.bf16.msra.mxu1 %v2062_v36 }
 0x634   : > { %2530 = vmatprep.subr.bf16.mxu0 %v2069_v37  ;;  %2659 = vmatprep.subr.bf16.mxu1 %v2071_v38 }
 0x637   : > { %2531 = vmatpush1.bf16.msra.mxu0 %v2068_v39  ;;  %2660 = vmatpush1.bf16.msra.mxu1 %v2070_v40 }
 0x638   : > { %2532 = vmatprep.subr.bf16.mxu0 %v2077_v41  ;;  %2661 = vmatprep.subr.bf16.mxu1 %v2079_v42 }
 0x63b   : > { %2533 = vmatpush1.bf16.msra.mxu0 %v2076_v44  ;;  %2662 = vmatpush1.bf16.msra.mxu1 %v2078_v46 }
 0x63c   : > { %2534 = vmatprep.subr.bf16.mxu0 %v2085_v47  ;;  %2663 = vmatprep.subr.bf16.mxu1 %v2087_v48 }
 0x63f   : > { %2535 = vmatpush1.bf16.msra.mxu0 %v2084_v49  ;;  %2664 = vmatpush1.bf16.msra.mxu1 %v2086_v50 }
 0x640   : > { %2536 = vmatprep.subr.bf16.mxu0 %v2093_v51  ;;  %2665 = vmatprep.subr.bf16.mxu1 %v2095_v53 }
 0x643   : > { %2537 = vmatpush1.bf16.msra.mxu0 %v2092_v54  ;;  %2666 = vmatpush1.bf16.msra.mxu1 %v2094_v55 }
 0x644   : > { %2538 = vmatprep.subr.bf16.mxu0 %v2101_v56  ;;  %2667 = vmatprep.subr.bf16.mxu1 %v2103_v57  ;;  %v2156_v56 = vsub.s32 6, %v5481_v19  ;;  %v2160_v57 = vsub.s32 7, %v5481_v19 }
 0x647   : > { %2539 = vmatpush1.bf16.msra.mxu0 %v2100_v58  ;;  %2668 = vmatpush1.bf16.msra.mxu1 %v2102_v59  ;;  %v2149_v58 = vrot.slane %v2128_v24, %v5540_v31  ;;  %v2157_v59 = vrot.slane %v2128_v24, %v2156_v56 }
 0x648   : > { %2540 = vmatprep.subr.bf16.mxu0 %v2109_v7  ;;  %2669 = vmatprep.subr.bf16.mxu1 %v2111_v60  ;;  %v2153_v7 = vrot.slane %v2128_v24, %v5543_v32  ;;  %v2161_v60 = vrot.slane %v2128_v24, %v2160_v57 }
 0x64b   : > { %2541 = vmatpush1.bf16.msra.mxu0 %v2108_v61  ;;  %2670 = vmatpush1.bf16.msra.mxu1 %v2110_v62 }
 0x64c   : > { %2542 = vmatprep.subr.bf16.mxu0 %v2117_v63  ;;  %2671 = vmatprep.subr.bf16.mxu1 %v2119_v17 }
 0x64f   : > { %2543 = vmatpush1.bf16.msra.mxu0 %v2116_v0  ;;  %2672 = vmatpush1.bf16.msra.mxu1 %v2118_v4 }
 0x650   : > { %2544 = vmatprep.subr.bf16.mxu0 %v2125_v1  ;;  %2673 = vmatprep.subr.bf16.mxu1 %v2127_v2 }
 0x653   : > { %2545 = vmatpush1.bf16.msra.mxu0 %v2124_v3  ;;  %2674 = vmatpush1.bf16.msra.mxu1 %v2126_v5 }
 0x656   : > { %2547 = vmatmul.mubr.bf16.vlgmr.msra.gmra.mrb[16].mxu0 %v5547_v52  ;;  %2676 = vmatmul.mubr.bf16.vlgmr.msra.gmra.mrb[16].mxu1 %v5547_v52 }
 0x669   : > { %v2290_v16 = vpop.f32.mrb[12].mxu0  ;;  %v2419_v11 = vpop.f32.mrb[12].mxu1 }
 0x66a   : > { %v4328_v12 = vadd.f32 %v2290_v16, %v2133_v6  ;;  %v4332_v13 = vadd.f32 %v2419_v11, %v2141_v8  ;;  %v2292_v14 = vpop.f32.mrb[13].mxu0  ;;  %v2421_v23 = vpop.f32.mrb[13].mxu1 }
 0x66b   : > { %v4329_v15 = vadd.f32 %v2292_v14, %v2137_v9  ;;  %v4333_v18 = vadd.f32 %v2421_v23, %v2145_v10  ;;  %v2294_v21 = vpop.f32.mrb[14].mxu0  ;;  %v2423_v25 = vpop.f32.mrb[14].mxu1 }
 0x66c   : > { %vm2686_vm8 = vcmp.gt.f32.partialorder %v4328_v12, 0.0  ;;  %v2702_v52 = vmul.f32 0.2, %v4328_v12  ;;  %vm2688_vm9 = vcmp.gt.f32.partialorder %v4332_v13, 0.0  ;;  %v2704_v26 = vmul.f32 0.2, %v4332_v13 }
 0x66d   : > { %vm2687_vm10 = vcmp.gt.f32.partialorder %v4329_v15, 0.0  ;;  %v2703_v27 = vmul.f32 0.2, %v4329_v15  ;;  %vm2689_vm11 = vcmp.gt.f32.partialorder %v4333_v18, 0.0  ;;  %v2705_v28 = vmul.f32 0.2, %v4333_v18 }
 0x66e   : > { %v4330_v29 = vadd.f32 %v2294_v21, %v2133_v6  ;;  %v4334_v30 = vadd.f32 %v2423_v25, %v2141_v8  ;;  %v2296_v33 = vpop.f32.mrb[15].mxu0  ;;  %v2425_v34 = vpop.f32.mrb[15].mxu1  ;;  %v2718_v35 = vsel %vm2686_vm8, %v4328_v12, %v2702_v52  ;;  %v2720_v36 = vsel %vm2688_vm9, %v4332_v13, %v2704_v26 }
 0x66f   : > { %v4331_v37 = vadd.f32 %v2296_v33, %v2137_v9  ;;  %v4335_v38 = vadd.f32 %v2425_v34, %v2145_v10  ;;  %v2719_v44 = vsel %vm2687_vm10, %v4329_v15, %v2703_v27  ;;  %v2721_v46 = vsel %vm2689_vm11, %v4333_v18, %v2705_v28 }
 0x670   : > { %vm2694_vm12 = vcmp.gt.f32.partialorder %v4330_v29, 0.0  ;;  %v2710_v39 = vmul.f32 0.2, %v4330_v29  ;;  %vm2696_vm13 = vcmp.gt.f32.partialorder %v4334_v30, 0.0  ;;  %v2712_v40 = vmul.f32 0.2, %v4334_v30 }
 0x671   : > { %vm2695_vm14 = vcmp.gt.f32.partialorder %v4331_v37, 0.0  ;;  %v2711_v41 = vmul.f32 0.2, %v4331_v37  ;;  %vm2697_vm15 = vcmp.gt.f32.partialorder %v4335_v38, 0.0  ;;  %v2713_v42 = vmul.f32 0.2, %v4335_v38 }
 0x672   : > { %v2726_v47 = vsel %vm2694_vm12, %v4330_v29, %v2710_v39  ;;  %v2728_v48 = vsel %vm2696_vm13, %v4334_v30, %v2712_v40 }
 0x673   : > { %v5585_v49 = vpack.c.bf16 %v2726_v47, %v2718_v35  ;;  %v5587_v50 = vpack.c.bf16 %v2728_v48, %v2720_v36  ;;  %v2727_v51 = vsel %vm2695_vm14, %v4331_v37, %v2711_v41  ;;  %v2729_v53 = vsel %vm2697_vm15, %v4335_v38, %v2713_v42 }
 0x674   : > { %v5589_v54 = vpack.c.bf16 %v2727_v51, %v2719_v44  ;;  %v5591_v55 = vpack.c.bf16 %v2729_v53, %v2721_v46 }
 0x729   : > { %v2548_v61 = vpop.f32.mrb[16].mxu0  ;;  %v2677_v62 = vpop.f32.mrb[16].mxu1 }
 0x72a   : > { %v4336_v63 = vadd.f32 %v2548_v61, %v2149_v58  ;;  %v4340_v17 = vadd.f32 %v2677_v62, %v2157_v59  ;;  %v2550_v0 = vpop.f32.mrb[17].mxu0  ;;  %v2679_v4 = vpop.f32.mrb[17].mxu1 }
 0x72b   : > { %v4337_v1 = vadd.f32 %v2550_v0, %v2153_v7  ;;  %v4341_v2 = vadd.f32 %v2679_v4, %v2161_v60  ;;  %v2552_v3 = vpop.f32.mrb[18].mxu0  ;;  %v2681_v5 = vpop.f32.mrb[18].mxu1 }
 0x72c   : > { %vm2690_vm0 = vcmp.gt.f32.partialorder %v4336_v63, 0.0  ;;  %v2706_v6 = vmul.f32 0.2, %v4336_v63  ;;  %vm2692_vm1 = vcmp.gt.f32.partialorder %v4340_v17, 0.0  ;;  %v2708_v8 = vmul.f32 0.2, %v4340_v17 }
 0x72d   : > { %vm2691_vm2 = vcmp.gt.f32.partialorder %v4337_v1, 0.0  ;;  %v2707_v9 = vmul.f32 0.2, %v4337_v1  ;;  %vm2693_vm3 = vcmp.gt.f32.partialorder %v4341_v2, 0.0  ;;  %v2709_v10 = vmul.f32 0.2, %v4341_v2 }
 0x72e   : > { %v4338_v16 = vadd.f32 %v2552_v3, %v2149_v58  ;;  %v4342_v24 = vadd.f32 %v2681_v5, %v2157_v59  ;;  %v2554_v11 = vpop.f32.mrb[19].mxu0  ;;  %v2683_v12 = vpop.f32.mrb[19].mxu1  ;;  %v2722_v13 = vsel %vm2690_vm0, %v4336_v63, %v2706_v6  ;;  %v2724_v14 = vsel %vm2692_vm1, %v4340_v17, %v2708_v8 }
 0x72f   : > { %v4339_v23 = vadd.f32 %v2554_v11, %v2153_v7  ;;  %v4343_v15 = vadd.f32 %v2683_v12, %v2161_v60  ;;  %v2723_v26 = vsel %vm2691_vm2, %v4337_v1, %v2707_v9  ;;  %v2725_v27 = vsel %vm2693_vm3, %v4341_v2, %v2709_v10 }
 0x730   : > { %vm2698_vm4 = vcmp.gt.f32.partialorder %v4338_v16, 0.0  ;;  %v2714_v18 = vmul.f32 0.2, %v4338_v16  ;;  %vm2700_vm5 = vcmp.gt.f32.partialorder %v4342_v24, 0.0  ;;  %v2716_v21 = vmul.f32 0.2, %v4342_v24 }
 0x731   : > { %vm2699_vm6 = vcmp.gt.f32.partialorder %v4339_v23, 0.0  ;;  %v2715_v25 = vmul.f32 0.2, %v4339_v23  ;;  %vm2701_vm7 = vcmp.gt.f32.partialorder %v4343_v15, 0.0  ;;  %v2717_v52 = vmul.f32 0.2, %v4343_v15 }
 0x732   : > { %v2730_v28 = vsel %vm2698_vm4, %v4338_v16, %v2714_v18  ;;  %v2732_v29 = vsel %vm2700_vm5, %v4342_v24, %v2716_v21 }
 0x733   : > { %v5601_v30 = vpack.c.bf16 %v2730_v28, %v2722_v13  ;;  %v5603_v33 = vpack.c.bf16 %v2732_v29, %v2724_v14  ;;  %v2731_v34 = vsel %vm2699_vm6, %v4339_v23, %v2715_v25  ;;  %v2733_v35 = vsel %vm2701_vm7, %v4343_v15, %v2717_v52 }
 0x734   : > { %v5605_v36 = vpack.c.bf16 %v2731_v34, %v2723_v26  ;;  %v5607_v37 = vpack.c.bf16 %v2733_v35, %v2725_v27 }
 0x735   : > { %5033 = dma.done.wait (%p5807_p6), [#allocation5 + $0x2], 57344  ;;  %p5808_p5 = pmov %p5768_p0 }
 0x736   : > { %3267 = vmatprep.mubr.bf16.mxu0 %v5589_v54  ;;  %3439 = vmatprep.mubr.bf16.mxu1 %v5589_v54  ;;  %v2751_v38 = vld [vmem:[#allocation4 + $0x8] sm:$0xff]  ;;  %v2753_v39 = vld [vmem:[#allocation4 + $0x18] sm:$0xff]  ;;  %v2750_v40 = vld [vmem:[#allocation4] sm:$0xff]  ;;  %s4437_s12 = smul.u32 1792, %s5174_s21  ;;  %s3958_s16 = sshll.u32 %s5387_s17, 4  ;;  %s5681_s16 = int_to_ptr.vmem [resolvable:$true] %s3958_s16 }
 0x737   : > { %5035 = vsyncadd (%p5808_p5), [#allocation5 + $0x2], 4294909952  ;;  %3235 = vmatprep.subr.bf16.mxu0 %v2751_v38  ;;  %3407 = vmatprep.subr.bf16.mxu1 %v2753_v39  ;;  %v2752_v41 = vld [vmem:[#allocation4 + $0x10] sm:$0xff]  ;;  %v2758_v42 = vld [vmem:[#allocation4 + $0x40] sm:$0xff]  ;;  %s5687_s21 = scalar_lea.sflag [#allocation8], %s392_s29  ;;  %s4964_s13 = scalar_lea.vmem %s5681_s16, 1792 }
 0x738   : > { %v2760_v44 = vld [vmem:[#allocation4 + $0x50] sm:$0xff]  ;;  %3236 = vmatpush1.bf16.msra.mxu0 %v2750_v40  ;;  %3408 = vmatpush1.bf16.msra.mxu1 %v2752_v41  ;;  %v2757_v46 = vld [vmem:[#allocation4 + $0x38] sm:$0xff]  ;;  %v2759_v47 = vld [vmem:[#allocation4 + $0x48] sm:$0xff]  ;;  %s5678_s22 = scalar_lea.hbm %s5739_s11, %s4437_s12  ;;  %p4965_p9 = scmp.ne.s32.totalorder %s5681_s16, %s4964_s13 }
 0x739   : > { %3237 = vmatprep.subr.bf16.mxu0 %v2758_v42  ;;  %3409 = vmatprep.subr.bf16.mxu1 %v2760_v44  ;;  %v2765_v48 = vld [vmem:[#allocation4 + $0x78] sm:$0xff]  ;;  %v2767_v51 = vld [vmem:[#allocation4 + $0x88] sm:$0xff]  ;;  %v2764_v53 = vld [vmem:[#allocation4 + $0x70] sm:$0xff]  ;;  %p5809_p12 = scmp.ne.s32.totalorder %s5756_s27, 0  ;;  %s5090_s30 = smov [#allocation18]  }
 0x73a   : > { %v2766_v57 = vld [vmem:[#allocation4 + $0x80] sm:$0xff]  ;;  %v2772_v58 = vld [vmem:[#allocation4 + $0xb0] sm:$0xff]  ;;  %v2771_v7 = vld [vmem:[#allocation4 + $0xa8] sm:$0xff]  ;;  %s4968_s19 = sshll.u32 %s5090_s30, 4  ;;  %s4969_s19 = int_to_ptr.vmem [resolvable:$false] %s4968_s19 }
 0x73b   : > { %v2774_v59 = vld [vmem:[#allocation4 + $0xc0] sm:$0xff]  ;;  %v2773_v60 = vld [vmem:[#allocation4 + $0xb8] sm:$0xff]  ;;  %v2779_v61 = vld [vmem:[#allocation4 + $0xe8] sm:$0xff]  ;;  %p4966_p10 = pnand %p4965_p9, %p5809_p12  ;;  %s4970_s25 = scalar_lea.vmem %s4969_s19, 3584 }
 0x73c   : > { %3238 = vmatpush1.bf16.msra.mxu0 %v2757_v46  ;;  %3410 = vmatpush1.bf16.msra.mxu1 %v2759_v47  ;;  %v2781_v62 = vld [vmem:[#allocation4 + $0xf8] sm:$0xff]  ;;  %v2778_v63 = vld [vmem:[#allocation4 + $0xe0] sm:$0xff]  ;;  %v2780_v17 = vld [vmem:[#allocation4 + $0xf0] sm:$0xff]  ;;  %p4971_p3 = scmp.lt.s32.totalorder %s5681_s16, %s4969_s19  ;;  %p4972_p4 = scmp.lt.s32.totalorder %s4970_s25, %s4964_s13 }
 0x73d   : > { %3239 = vmatprep.subr.bf16.mxu0 %v2765_v48  ;;  %3411 = vmatprep.subr.bf16.mxu1 %v2767_v51  ;;  %v2786_v0 = vld [vmem:[#allocation4 + $0x120] sm:$0xff]  ;;  %v2788_v4 = vld [vmem:[#allocation4 + $0x130] sm:$0xff]  ;;  %v2785_v1 = vld [vmem:[#allocation4 + $0x118] sm:$0xff]  ;;  %p4967_p2 = pneg %p4966_p10 }
 0x73e   : > { %v2787_v2 = vld [vmem:[#allocation4 + $0x128] sm:$0xff]  ;;  %v2793_v3 = vld [vmem:[#allocation4 + $0x158] sm:$0xff]  ;;  %v2792_v6 = vld [vmem:[#allocation4 + $0x150] sm:$0xff]  ;;  %p4973_p7 = por %p4972_p4, %p4971_p3 }
 0x73f   : > { %v2795_v5 = vld [vmem:[#allocation4 + $0x168] sm:$0xff]  ;;  %v2794_v8 = vld [vmem:[#allocation4 + $0x160] sm:$0xff]  ;;  %v2800_v9 = vld [vmem:[#allocation4 + $0x190] sm:$0xff] }
 0x740   : > { %3240 = vmatpush1.bf16.msra.mxu0 %v2764_v53  ;;  %3412 = vmatpush1.bf16.msra.mxu1 %v2766_v57  ;;  %v2802_v10 = vld [vmem:[#allocation4 + $0x1a0] sm:$0xff]  ;;  %v2799_v16 = vld [vmem:[#allocation4 + $0x188] sm:$0xff]  ;;  %v2801_v24 = vld [vmem:[#allocation4 + $0x198] sm:$0xff]  ;;  %p4974_p8 = pnand %p4973_p7, %p4967_p2 }
 0x741   : > { %3241 = vmatprep.subr.bf16.mxu0 %v2772_v58  ;;  %3413 = vmatprep.subr.bf16.mxu1 %v2774_v59  ;;  %v2807_v11 = vld [vmem:[#allocation4 + $0x1c8] sm:$0xff]  ;;  %v2809_v12 = vld [vmem:[#allocation4 + $0x1d8] sm:$0xff]  ;;  %v2806_v13 = vld [vmem:[#allocation4 + $0x1c0] sm:$0xff] }
 0x742   : > { %v2808_v14 = vld [vmem:[#allocation4 + $0x1d0] sm:$0xff]  ;;  %v2814_v23 = vld [vmem:[#allocation4 + $0x200] sm:$0xff]  ;;  %v2813_v18 = vld [vmem:[#allocation4 + $0x1f8] sm:$0xff] }
 0x743   : > { %v2816_v15 = vld [vmem:[#allocation4 + $0x210] sm:$0xff]  ;;  %v2815_v21 = vld [vmem:[#allocation4 + $0x208] sm:$0xff]  ;;  %v2821_v25 = vld [vmem:[#allocation4 + $0x238] sm:$0xff] }
 0x744   : > { %3242 = vmatpush1.bf16.msra.mxu0 %v2771_v7  ;;  %3414 = vmatpush1.bf16.msra.mxu1 %v2773_v60  ;;  %v2823_v52 = vld [vmem:[#allocation4 + $0x248] sm:$0xff]  ;;  %v2820_v26 = vld [vmem:[#allocation4 + $0x230] sm:$0xff]  ;;  %v2822_v27 = vld [vmem:[#allocation4 + $0x240] sm:$0xff] }
 0x745   : > { %3243 = vmatprep.subr.bf16.mxu0 %v2779_v61  ;;  %3415 = vmatprep.subr.bf16.mxu1 %v2781_v62  ;;  %v2828_v28 = vld [vmem:[#allocation4 + $0x270] sm:$0xff]  ;;  %v2830_v29 = vld [vmem:[#allocation4 + $0x280] sm:$0xff]  ;;  %v2827_v34 = vld [vmem:[#allocation4 + $0x268] sm:$0xff] }
 0x746   : > { %v2829_v35 = vld [vmem:[#allocation4 + $0x278] sm:$0xff]  ;;  %v2835_v38 = vld [vmem:[#allocation4 + $0x2a8] sm:$0xff]  ;;  %v2834_v40 = vld [vmem:[#allocation4 + $0x2a0] sm:$0xff] }
 0x747   : > { %v2837_v39 = vld [vmem:[#allocation4 + $0x2b8] sm:$0xff]  ;;  %v2836_v41 = vld [vmem:[#allocation4 + $0x2b0] sm:$0xff]  ;;  %v2842_v42 = vld [vmem:[#allocation4 + $0x2e0] sm:$0xff] }
 0x748   : > { %3244 = vmatpush1.bf16.msra.mxu0 %v2778_v63  ;;  %3416 = vmatpush1.bf16.msra.mxu1 %v2780_v17  ;;  %v2844_v44 = vld [vmem:[#allocation4 + $0x2f0] sm:$0xff]  ;;  %v2841_v46 = vld [vmem:[#allocation4 + $0x2d8] sm:$0xff]  ;;  %v2843_v47 = vld [vmem:[#allocation4 + $0x2e8] sm:$0xff] }
 0x749   : > { %3245 = vmatprep.subr.bf16.mxu0 %v2786_v0  ;;  %3417 = vmatprep.subr.bf16.mxu1 %v2788_v4  ;;  %v2849_v48 = vld [vmem:[#allocation4 + $0x318] sm:$0xff]  ;;  %v2851_v51 = vld [vmem:[#allocation4 + $0x328] sm:$0xff]  ;;  %v2848_v53 = vld [vmem:[#allocation4 + $0x310] sm:$0xff] }
 0x74a   : > { %v2850_v57 = vld [vmem:[#allocation4 + $0x320] sm:$0xff]  ;;  %v2856_v58 = vld [vmem:[#allocation4 + $0x350] sm:$0xff]  ;;  %v2855_v7 = vld [vmem:[#allocation4 + $0x348] sm:$0xff] }
 0x74b   : > { %v2858_v59 = vld [vmem:[#allocation4 + $0x360] sm:$0xff]  ;;  %v2857_v60 = vld [vmem:[#allocation4 + $0x358] sm:$0xff]  ;;  %v2863_v61 = vld [vmem:[#allocation4 + $0x388] sm:$0xff] }
 0x74c   : > { %3246 = vmatpush1.bf16.msra.mxu0 %v2785_v1  ;;  %3418 = vmatpush1.bf16.msra.mxu1 %v2787_v2  ;;  %v2865_v62 = vld [vmem:[#allocation4 + $0x398] sm:$0xff]  ;;  %v2862_v63 = vld [vmem:[#allocation4 + $0x380] sm:$0xff]  ;;  %v2864_v17 = vld [vmem:[#allocation4 + $0x390] sm:$0xff] }
 0x74d   : > { %3247 = vmatprep.subr.bf16.mxu0 %v2793_v3  ;;  %3419 = vmatprep.subr.bf16.mxu1 %v2795_v5  ;;  %v2870_v0 = vld [vmem:[#allocation4 + $0x3c0] sm:$0xff]  ;;  %v2872_v4 = vld [vmem:[#allocation4 + $0x3d0] sm:$0xff]  ;;  %v2869_v1 = vld [vmem:[#allocation4 + $0x3b8] sm:$0xff] }
 0x74e   : > { %v2871_v2 = vld [vmem:[#allocation4 + $0x3c8] sm:$0xff]  ;;  %v2877_v3 = vld [vmem:[#allocation4 + $0x3f8] sm:$0xff] }
 0x74f   : > { %v2879_v5 = vld [vmem:[#allocation4 + $0x408] sm:$0xff] }
 0x750   : > { %3248 = vmatpush1.bf16.msra.mxu0 %v2792_v6  ;;  %3420 = vmatpush1.bf16.msra.mxu1 %v2794_v8  ;;  %v2876_v6 = vld [vmem:[#allocation4 + $0x3f0] sm:$0xff]  ;;  %v2878_v8 = vld [vmem:[#allocation4 + $0x400] sm:$0xff] }
 0x751   : > { %3249 = vmatprep.subr.bf16.mxu0 %v2800_v9  ;;  %3421 = vmatprep.subr.bf16.mxu1 %v2802_v10  ;;  %v2884_v9 = vld [vmem:[#allocation4 + $0x430] sm:$0xff]  ;;  %v2886_v10 = vld [vmem:[#allocation4 + $0x440] sm:$0xff] }
 0x754   : > { %3250 = vmatpush1.bf16.msra.mxu0 %v2799_v16  ;;  %3422 = vmatpush1.bf16.msra.mxu1 %v2801_v24  ;;  %v2883_v16 = vld [vmem:[#allocation4 + $0x428] sm:$0xff]  ;;  %v2885_v24 = vld [vmem:[#allocation4 + $0x438] sm:$0xff] }
 0x755   : > { %3251 = vmatprep.subr.bf16.mxu0 %v2807_v11  ;;  %3423 = vmatprep.subr.bf16.mxu1 %v2809_v12  ;;  %v2891_v11 = vld [vmem:[#allocation4 + $0x468] sm:$0xff]  ;;  %v2893_v12 = vld [vmem:[#allocation4 + $0x478] sm:$0xff] }
 0x758   : > { %3252 = vmatpush1.bf16.msra.mxu0 %v2806_v13  ;;  %3424 = vmatpush1.bf16.msra.mxu1 %v2808_v14  ;;  %v2890_v13 = vld [vmem:[#allocation4 + $0x460] sm:$0xff]  ;;  %v2892_v14 = vld [vmem:[#allocation4 + $0x470] sm:$0xff] }
 0x759   : > { %3253 = vmatprep.subr.bf16.mxu0 %v2814_v23  ;;  %3425 = vmatprep.subr.bf16.mxu1 %v2816_v15  ;;  %v2898_v23 = vld [vmem:[#allocation4 + $0x4a0] sm:$0xff]  ;;  %v2900_v15 = vld [vmem:[#allocation4 + $0x4b0] sm:$0xff] }
 0x75c   : > { %3254 = vmatpush1.bf16.msra.mxu0 %v2813_v18  ;;  %3426 = vmatpush1.bf16.msra.mxu1 %v2815_v21  ;;  %v2897_v18 = vld [vmem:[#allocation4 + $0x498] sm:$0xff]  ;;  %v2899_v21 = vld [vmem:[#allocation4 + $0x4a8] sm:$0xff] }
 0x75d   : > { %3255 = vmatprep.subr.bf16.mxu0 %v2821_v25  ;;  %3427 = vmatprep.subr.bf16.mxu1 %v2823_v52  ;;  %v2905_v25 = vld [vmem:[#allocation4 + $0x4d8] sm:$0xff]  ;;  %v2907_v52 = vld [vmem:[#allocation4 + $0x4e8] sm:$0xff] }
 0x760   : > { %3256 = vmatpush1.bf16.msra.mxu0 %v2820_v26  ;;  %3428 = vmatpush1.bf16.msra.mxu1 %v2822_v27  ;;  %v2904_v26 = vld [vmem:[#allocation4 + $0x4d0] sm:$0xff]  ;;  %v2906_v27 = vld [vmem:[#allocation4 + $0x4e0] sm:$0xff] }
 0x761   : > { %3257 = vmatprep.subr.bf16.mxu0 %v2828_v28  ;;  %3429 = vmatprep.subr.bf16.mxu1 %v2830_v29  ;;  %v2912_v28 = vld [vmem:[#allocation4 + $0x510] sm:$0xff]  ;;  %v2914_v29 = vld [vmem:[#allocation4 + $0x520] sm:$0xff] }
 0x764   : > { %3258 = vmatpush1.bf16.msra.mxu0 %v2827_v34  ;;  %3430 = vmatpush1.bf16.msra.mxu1 %v2829_v35  ;;  %v2911_v34 = vld [vmem:[#allocation4 + $0x508] sm:$0xff]  ;;  %v2913_v35 = vld [vmem:[#allocation4 + $0x518] sm:$0xff] }
 0x765   : > { %3259 = vmatprep.subr.bf16.mxu0 %v2835_v38  ;;  %3431 = vmatprep.subr.bf16.mxu1 %v2837_v39  ;;  %v2919_v38 = vld [vmem:[#allocation4 + $0x548] sm:$0xff]  ;;  %v2921_v39 = vld [vmem:[#allocation4 + $0x558] sm:$0xff] }
 0x768   : > { %3260 = vmatpush1.bf16.msra.mxu0 %v2834_v40  ;;  %3432 = vmatpush1.bf16.msra.mxu1 %v2836_v41  ;;  %v2918_v40 = vld [vmem:[#allocation4 + $0x540] sm:$0xff]  ;;  %v2920_v41 = vld [vmem:[#allocation4 + $0x550] sm:$0xff] }
 0x769   : > { %3261 = vmatprep.subr.bf16.mxu0 %v2842_v42  ;;  %3433 = vmatprep.subr.bf16.mxu1 %v2844_v44  ;;  %v2926_v42 = vld [vmem:[#allocation4 + $0x580] sm:$0xff]  ;;  %v2928_v44 = vld [vmem:[#allocation4 + $0x590] sm:$0xff] }
 0x76c   : > { %3262 = vmatpush1.bf16.msra.mxu0 %v2841_v46  ;;  %3434 = vmatpush1.bf16.msra.mxu1 %v2843_v47  ;;  %v2925_v46 = vld [vmem:[#allocation4 + $0x578] sm:$0xff]  ;;  %v2927_v47 = vld [vmem:[#allocation4 + $0x588] sm:$0xff] }
 0x76d   : > { %3263 = vmatprep.subr.bf16.mxu0 %v2849_v48  ;;  %3435 = vmatprep.subr.bf16.mxu1 %v2851_v51  ;;  %v2933_v48 = vld [vmem:[#allocation4 + $0x5b8] sm:$0xff]  ;;  %v2935_v51 = vld [vmem:[#allocation4 + $0x5c8] sm:$0xff] }
 0x770   : > { %3264 = vmatpush1.bf16.msra.mxu0 %v2848_v53  ;;  %3436 = vmatpush1.bf16.msra.mxu1 %v2850_v57  ;;  %v2932_v53 = vld [vmem:[#allocation4 + $0x5b0] sm:$0xff]  ;;  %v2934_v57 = vld [vmem:[#allocation4 + $0x5c0] sm:$0xff] }
 0x771   : > { %3265 = vmatprep.subr.bf16.mxu0 %v2856_v58  ;;  %3437 = vmatprep.subr.bf16.mxu1 %v2858_v59  ;;  %v2940_v58 = vld [vmem:[#allocation4 + $0x5f0] sm:$0xff]  ;;  %v2942_v59 = vld [vmem:[#allocation4 + $0x600] sm:$0xff] }
 0x774   : > { %3266 = vmatpush1.bf16.msra.mxu0 %v2855_v7  ;;  %3438 = vmatpush1.bf16.msra.mxu1 %v2857_v60  ;;  %v2939_v7 = vld [vmem:[#allocation4 + $0x5e8] sm:$0xff]  ;;  %v2941_v60 = vld [vmem:[#allocation4 + $0x5f8] sm:$0xff] }
 0x775   : > { %3278 = vmatprep.subr.bf16.mxu0 %v2863_v61  ;;  %3450 = vmatprep.subr.bf16.mxu1 %v2865_v62  ;;  %v2947_v61 = vld [vmem:[#allocation4 + $0x628] sm:$0xff]  ;;  %v2949_v62 = vld [vmem:[#allocation4 + $0x638] sm:$0xff] }
 0x777   : > { %3268 = vmatmul.mubr.bf16.vlgmr.msra.gmra.mrb[20].mxu0 %v5585_v49  ;;  %3440 = vmatmul.mubr.bf16.vlgmr.msra.gmra.mrb[20].mxu1 %v5585_v49 }
 0x778   : > { %3279 = vmatpush1.bf16.msra.mxu0 %v2862_v63  ;;  %3451 = vmatpush1.bf16.msra.mxu1 %v2864_v17  ;;  %v2946_v63 = vld [vmem:[#allocation4 + $0x620] sm:$0xff]  ;;  %v2948_v17 = vld [vmem:[#allocation4 + $0x630] sm:$0xff] }
 0x779   : > { %3280 = vmatprep.subr.bf16.mxu0 %v2870_v0  ;;  %3452 = vmatprep.subr.bf16.mxu1 %v2872_v4  ;;  %v2954_v0 = vld [vmem:[#allocation4 + $0x660] sm:$0xff]  ;;  %v2956_v4 = vld [vmem:[#allocation4 + $0x670] sm:$0xff] }
 0x77a   : > { %3310 = vmatprep.mubr.bf16.mxu0 %v5591_v55  ;;  %3482 = vmatprep.mubr.bf16.mxu1 %v5591_v55 }
 0x77c   : > { %3281 = vmatpush1.bf16.msra.mxu0 %v2869_v1  ;;  %3453 = vmatpush1.bf16.msra.mxu1 %v2871_v2  ;;  %v2953_v1 = vld [vmem:[#allocation4 + $0x658] sm:$0xff]  ;;  %v2955_v2 = vld [vmem:[#allocation4 + $0x668] sm:$0xff] }
 0x77d   : > { %3282 = vmatprep.subr.bf16.mxu0 %v2877_v3  ;;  %3454 = vmatprep.subr.bf16.mxu1 %v2879_v5  ;;  %v2961_v3 = vld [vmem:[#allocation4 + $0x698] sm:$0xff]  ;;  %v2963_v5 = vld [vmem:[#allocation4 + $0x6a8] sm:$0xff] }
 0x780   : > { %3283 = vmatpush1.bf16.msra.mxu0 %v2876_v6  ;;  %3455 = vmatpush1.bf16.msra.mxu1 %v2878_v8  ;;  %v2960_v6 = vld [vmem:[#allocation4 + $0x690] sm:$0xff]  ;;  %v2962_v8 = vld [vmem:[#allocation4 + $0x6a0] sm:$0xff] }
 0x781   : > { %3284 = vmatprep.subr.bf16.mxu0 %v2884_v9  ;;  %3456 = vmatprep.subr.bf16.mxu1 %v2886_v10  ;;  %v2968_v9 = vld [vmem:[#allocation4 + $0x6d0] sm:$0xff]  ;;  %v2970_v10 = vld [vmem:[#allocation4 + $0x6e0] sm:$0xff] }
 0x784   : > { %3285 = vmatpush1.bf16.msra.mxu0 %v2883_v16  ;;  %3457 = vmatpush1.bf16.msra.mxu1 %v2885_v24  ;;  %v2967_v16 = vld [vmem:[#allocation4 + $0x6c8] sm:$0xff]  ;;  %v2969_v24 = vld [vmem:[#allocation4 + $0x6d8] sm:$0xff] }
 0x785   : > { %3286 = vmatprep.subr.bf16.mxu0 %v2891_v11  ;;  %3458 = vmatprep.subr.bf16.mxu1 %v2893_v12  ;;  %v2975_v11 = vld [vmem:[#allocation4 + $0x708] sm:$0xff]  ;;  %v2977_v12 = vld [vmem:[#allocation4 + $0x718] sm:$0xff] }
 0x788   : > { %3287 = vmatpush1.bf16.msra.mxu0 %v2890_v13  ;;  %3459 = vmatpush1.bf16.msra.mxu1 %v2892_v14  ;;  %v2974_v13 = vld [vmem:[#allocation4 + $0x700] sm:$0xff]  ;;  %v2976_v14 = vld [vmem:[#allocation4 + $0x710] sm:$0xff] }
 0x789   : > { %3288 = vmatprep.subr.bf16.mxu0 %v2898_v23  ;;  %3460 = vmatprep.subr.bf16.mxu1 %v2900_v15  ;;  %v2982_v23 = vld [vmem:[#allocation4 + $0x740] sm:$0xff]  ;;  %v2984_v15 = vld [vmem:[#allocation4 + $0x750] sm:$0xff] }
 0x78c   : > { %3289 = vmatpush1.bf16.msra.mxu0 %v2897_v18  ;;  %3461 = vmatpush1.bf16.msra.mxu1 %v2899_v21  ;;  %v2981_v18 = vld [vmem:[#allocation4 + $0x738] sm:$0xff]  ;;  %v2983_v21 = vld [vmem:[#allocation4 + $0x748] sm:$0xff] }
 0x78d   : > { %3290 = vmatprep.subr.bf16.mxu0 %v2905_v25  ;;  %3462 = vmatprep.subr.bf16.mxu1 %v2907_v52  ;;  %v2989_v25 = vld [vmem:[#allocation4 + $0x778] sm:$0xff]  ;;  %v2991_v52 = vld [vmem:[#allocation4 + $0x788] sm:$0xff] }
 0x790   : > { %3291 = vmatpush1.bf16.msra.mxu0 %v2904_v26  ;;  %3463 = vmatpush1.bf16.msra.mxu1 %v2906_v27  ;;  %v2988_v26 = vld [vmem:[#allocation4 + $0x770] sm:$0xff]  ;;  %v2990_v27 = vld [vmem:[#allocation4 + $0x780] sm:$0xff] }
 0x791   : > { %3292 = vmatprep.subr.bf16.mxu0 %v2912_v28  ;;  %3464 = vmatprep.subr.bf16.mxu1 %v2914_v29  ;;  %v2996_v28 = vld [vmem:[#allocation4 + $0x7b0] sm:$0xff]  ;;  %v2998_v29 = vld [vmem:[#allocation4 + $0x7c0] sm:$0xff] }
 0x794   : > { %3293 = vmatpush1.bf16.msra.mxu0 %v2911_v34  ;;  %3465 = vmatpush1.bf16.msra.mxu1 %v2913_v35  ;;  %v2995_v34 = vld [vmem:[#allocation4 + $0x7a8] sm:$0xff]  ;;  %v2997_v35 = vld [vmem:[#allocation4 + $0x7b8] sm:$0xff] }
 0x795   : > { %3294 = vmatprep.subr.bf16.mxu0 %v2919_v38  ;;  %3466 = vmatprep.subr.bf16.mxu1 %v2921_v39  ;;  %v3003_v38 = vld [vmem:[#allocation4 + $0x7e8] sm:$0xff]  ;;  %v3005_v39 = vld [vmem:[#allocation4 + $0x7f8] sm:$0xff] }
 0x798   : > { %3295 = vmatpush1.bf16.msra.mxu0 %v2918_v40  ;;  %3467 = vmatpush1.bf16.msra.mxu1 %v2920_v41  ;;  %v3002_v40 = vld [vmem:[#allocation4 + $0x7e0] sm:$0xff]  ;;  %v3004_v41 = vld [vmem:[#allocation4 + $0x7f0] sm:$0xff] }
 0x799   : > { %3296 = vmatprep.subr.bf16.mxu0 %v2926_v42  ;;  %3468 = vmatprep.subr.bf16.mxu1 %v2928_v44  ;;  %v3010_v42 = vld [vmem:[#allocation4 + $0x820] sm:$0xff]  ;;  %v3012_v44 = vld [vmem:[#allocation4 + $0x830] sm:$0xff] }
 0x79c   : > { %3297 = vmatpush1.bf16.msra.mxu0 %v2925_v46  ;;  %3469 = vmatpush1.bf16.msra.mxu1 %v2927_v47  ;;  %v3009_v46 = vld [vmem:[#allocation4 + $0x818] sm:$0xff]  ;;  %v3011_v47 = vld [vmem:[#allocation4 + $0x828] sm:$0xff] }
 0x79d   : > { %3298 = vmatprep.subr.bf16.mxu0 %v2933_v48  ;;  %3470 = vmatprep.subr.bf16.mxu1 %v2935_v51  ;;  %v3017_v48 = vld [vmem:[#allocation4 + $0x858] sm:$0xff]  ;;  %v3019_v51 = vld [vmem:[#allocation4 + $0x868] sm:$0xff] }
 0x7a0   : > { %3299 = vmatpush1.bf16.msra.mxu0 %v2932_v53  ;;  %3471 = vmatpush1.bf16.msra.mxu1 %v2934_v57  ;;  %v3016_v53 = vld [vmem:[#allocation4 + $0x850] sm:$0xff]  ;;  %v3018_v57 = vld [vmem:[#allocation4 + $0x860] sm:$0xff] }
 0x7a1   : > { %3300 = vmatprep.subr.bf16.mxu0 %v2940_v58  ;;  %3472 = vmatprep.subr.bf16.mxu1 %v2942_v59  ;;  %v3024_v58 = vld [vmem:[#allocation4 + $0x890] sm:$0xff]  ;;  %v3026_v59 = vld [vmem:[#allocation4 + $0x8a0] sm:$0xff] }
 0x7a4   : > { %3301 = vmatpush1.bf16.msra.mxu0 %v2939_v7  ;;  %3473 = vmatpush1.bf16.msra.mxu1 %v2941_v60  ;;  %v3023_v7 = vld [vmem:[#allocation4 + $0x888] sm:$0xff]  ;;  %v3025_v60 = vld [vmem:[#allocation4 + $0x898] sm:$0xff] }
 0x7a5   : > { %3302 = vmatprep.subr.bf16.mxu0 %v2947_v61  ;;  %3474 = vmatprep.subr.bf16.mxu1 %v2949_v62  ;;  %v3031_v61 = vld [vmem:[#allocation4 + $0x8c8] sm:$0xff]  ;;  %v3033_v62 = vld [vmem:[#allocation4 + $0x8d8] sm:$0xff] }
 0x7a8   : > { %3303 = vmatpush1.bf16.msra.mxu0 %v2946_v63  ;;  %3475 = vmatpush1.bf16.msra.mxu1 %v2948_v17  ;;  %v3030_v63 = vld [vmem:[#allocation4 + $0x8c0] sm:$0xff]  ;;  %v3032_v17 = vld [vmem:[#allocation4 + $0x8d0] sm:$0xff] }
 0x7a9   : > { %3304 = vmatprep.subr.bf16.mxu0 %v2954_v0  ;;  %3476 = vmatprep.subr.bf16.mxu1 %v2956_v4  ;;  %v3038_v0 = vld [vmem:[#allocation4 + $0x900] sm:$0xff]  ;;  %v3040_v4 = vld [vmem:[#allocation4 + $0x910] sm:$0xff] }
 0x7ac   : > { %3305 = vmatpush1.bf16.msra.mxu0 %v2953_v1  ;;  %3477 = vmatpush1.bf16.msra.mxu1 %v2955_v2  ;;  %v3037_v1 = vld [vmem:[#allocation4 + $0x8f8] sm:$0xff]  ;;  %v3039_v2 = vld [vmem:[#allocation4 + $0x908] sm:$0xff] }
 0x7ad   : > { %3306 = vmatprep.subr.bf16.mxu0 %v2961_v3  ;;  %3478 = vmatprep.subr.bf16.mxu1 %v2963_v5  ;;  %v3045_v3 = vld [vmem:[#allocation4 + $0x938] sm:$0xff]  ;;  %v3047_v5 = vld [vmem:[#allocation4 + $0x948] sm:$0xff] }
 0x7b0   : > { %3307 = vmatpush1.bf16.msra.mxu0 %v2960_v6  ;;  %3479 = vmatpush1.bf16.msra.mxu1 %v2962_v8  ;;  %v3044_v6 = vld [vmem:[#allocation4 + $0x930] sm:$0xff]  ;;  %v3046_v8 = vld [vmem:[#allocation4 + $0x940] sm:$0xff] }
 0x7b1   : > { %3308 = vmatprep.subr.bf16.mxu0 %v2968_v9  ;;  %3480 = vmatprep.subr.bf16.mxu1 %v2970_v10  ;;  %v3052_v9 = vld [vmem:[#allocation4 + $0x970] sm:$0xff]  ;;  %v3054_v10 = vld [vmem:[#allocation4 + $0x980] sm:$0xff] }
 0x7b4   : > { %3309 = vmatpush1.bf16.msra.mxu0 %v2967_v16  ;;  %3481 = vmatpush1.bf16.msra.mxu1 %v2969_v24  ;;  %v3051_v16 = vld [vmem:[#allocation4 + $0x968] sm:$0xff]  ;;  %v3053_v24 = vld [vmem:[#allocation4 + $0x978] sm:$0xff] }
 0x7b5   : > { %3321 = vmatprep.subr.bf16.mxu0 %v2975_v11  ;;  %3493 = vmatprep.subr.bf16.mxu1 %v2977_v12  ;;  %v3059_v11 = vld [vmem:[#allocation4 + $0x9a8] sm:$0xff]  ;;  %v3061_v12 = vld [vmem:[#allocation4 + $0x9b8] sm:$0xff] }
 0x7b7   : > { %3311 = vmatmul.mubr.bf16.vlgmr.msra.gmra.mrb[20].mxu0 %v5587_v50  ;;  %3483 = vmatmul.mubr.bf16.vlgmr.msra.gmra.mrb[20].mxu1 %v5587_v50 }
 0x7b8   : > { %3322 = vmatpush1.bf16.msra.mxu0 %v2974_v13  ;;  %3494 = vmatpush1.bf16.msra.mxu1 %v2976_v14  ;;  %v3058_v13 = vld [vmem:[#allocation4 + $0x9a0] sm:$0xff]  ;;  %v3060_v14 = vld [vmem:[#allocation4 + $0x9b0] sm:$0xff] }
 0x7b9   : > { %3323 = vmatprep.subr.bf16.mxu0 %v2982_v23  ;;  %3495 = vmatprep.subr.bf16.mxu1 %v2984_v15  ;;  %v3066_v23 = vld [vmem:[#allocation4 + $0x9e0] sm:$0xff]  ;;  %v3068_v15 = vld [vmem:[#allocation4 + $0x9f0] sm:$0xff] }
 0x7ba   : > { %3353 = vmatprep.mubr.bf16.mxu0 %v5605_v36  ;;  %3525 = vmatprep.mubr.bf16.mxu1 %v5605_v36 }
 0x7bc   : > { %3324 = vmatpush1.bf16.msra.mxu0 %v2981_v18  ;;  %3496 = vmatpush1.bf16.msra.mxu1 %v2983_v21  ;;  %v3065_v18 = vld [vmem:[#allocation4 + $0x9d8] sm:$0xff]  ;;  %v3067_v21 = vld [vmem:[#allocation4 + $0x9e8] sm:$0xff] }
 0x7bd   : > { %3325 = vmatprep.subr.bf16.mxu0 %v2989_v25  ;;  %3497 = vmatprep.subr.bf16.mxu1 %v2991_v52  ;;  %v3073_v25 = vld [vmem:[#allocation4 + $0xa18] sm:$0xff]  ;;  %v3075_v52 = vld [vmem:[#allocation4 + $0xa28] sm:$0xff] }
 0x7c0   : > { %3326 = vmatpush1.bf16.msra.mxu0 %v2988_v26  ;;  %3498 = vmatpush1.bf16.msra.mxu1 %v2990_v27  ;;  %v3072_v26 = vld [vmem:[#allocation4 + $0xa10] sm:$0xff]  ;;  %v3074_v27 = vld [vmem:[#allocation4 + $0xa20] sm:$0xff] }
 0x7c1   : > { %3327 = vmatprep.subr.bf16.mxu0 %v2996_v28  ;;  %3499 = vmatprep.subr.bf16.mxu1 %v2998_v29  ;;  %v3080_v28 = vld [vmem:[#allocation4 + $0xa50] sm:$0xff]  ;;  %v3082_v29 = vld [vmem:[#allocation4 + $0xa60] sm:$0xff] }
 0x7c4   : > { %3328 = vmatpush1.bf16.msra.mxu0 %v2995_v34  ;;  %3500 = vmatpush1.bf16.msra.mxu1 %v2997_v35  ;;  %v3079_v34 = vld [vmem:[#allocation4 + $0xa48] sm:$0xff]  ;;  %v3081_v35 = vld [vmem:[#allocation4 + $0xa58] sm:$0xff] }
 0x7c5   : > { %3329 = vmatprep.subr.bf16.mxu0 %v3003_v38  ;;  %3501 = vmatprep.subr.bf16.mxu1 %v3005_v39  ;;  %v3087_v38 = vld [vmem:[#allocation4 + $0xa88] sm:$0xff]  ;;  %v3089_v39 = vld [vmem:[#allocation4 + $0xa98] sm:$0xff] }
 0x7c8   : > { %3330 = vmatpush1.bf16.msra.mxu0 %v3002_v40  ;;  %3502 = vmatpush1.bf16.msra.mxu1 %v3004_v41  ;;  %v3086_v40 = vld [vmem:[#allocation4 + $0xa80] sm:$0xff]  ;;  %v3088_v41 = vld [vmem:[#allocation4 + $0xa90] sm:$0xff] }
 0x7c9   : > { %3331 = vmatprep.subr.bf16.mxu0 %v3010_v42  ;;  %3503 = vmatprep.subr.bf16.mxu1 %v3012_v44  ;;  %v3094_v42 = vld [vmem:[#allocation4 + $0xac0] sm:$0xff]  ;;  %v3096_v44 = vld [vmem:[#allocation4 + $0xad0] sm:$0xff] }
 0x7cc   : > { %3332 = vmatpush1.bf16.msra.mxu0 %v3009_v46  ;;  %3504 = vmatpush1.bf16.msra.mxu1 %v3011_v47  ;;  %v3093_v46 = vld [vmem:[#allocation4 + $0xab8] sm:$0xff]  ;;  %v3095_v47 = vld [vmem:[#allocation4 + $0xac8] sm:$0xff] }
 0x7cd   : > { %3333 = vmatprep.subr.bf16.mxu0 %v3017_v48  ;;  %3505 = vmatprep.subr.bf16.mxu1 %v3019_v51  ;;  %v3101_v48 = vld [vmem:[#allocation4 + $0xaf8] sm:$0xff]  ;;  %v3103_v51 = vld [vmem:[#allocation4 + $0xb08] sm:$0xff] }
 0x7d0   : > { %3334 = vmatpush1.bf16.msra.mxu0 %v3016_v53  ;;  %3506 = vmatpush1.bf16.msra.mxu1 %v3018_v57  ;;  %v3100_v53 = vld [vmem:[#allocation4 + $0xaf0] sm:$0xff]  ;;  %v3102_v57 = vld [vmem:[#allocation4 + $0xb00] sm:$0xff] }
 0x7d1   : > { %3335 = vmatprep.subr.bf16.mxu0 %v3024_v58  ;;  %3507 = vmatprep.subr.bf16.mxu1 %v3026_v59  ;;  %v3108_v58 = vld [vmem:[#allocation4 + $0xb30] sm:$0xff]  ;;  %v3110_v59 = vld [vmem:[#allocation4 + $0xb40] sm:$0xff] }
 0x7d4   : > { %3336 = vmatpush1.bf16.msra.mxu0 %v3023_v7  ;;  %3508 = vmatpush1.bf16.msra.mxu1 %v3025_v60  ;;  %v3107_v7 = vld [vmem:[#allocation4 + $0xb28] sm:$0xff]  ;;  %v3109_v60 = vld [vmem:[#allocation4 + $0xb38] sm:$0xff] }
 0x7d5   : > { %3337 = vmatprep.subr.bf16.mxu0 %v3031_v61  ;;  %3509 = vmatprep.subr.bf16.mxu1 %v3033_v62  ;;  %v3115_v61 = vld [vmem:[#allocation4 + $0xb68] sm:$0xff]  ;;  %v3117_v62 = vld [vmem:[#allocation4 + $0xb78] sm:$0xff] }
 0x7d8   : > { %3338 = vmatpush1.bf16.msra.mxu0 %v3030_v63  ;;  %3510 = vmatpush1.bf16.msra.mxu1 %v3032_v17  ;;  %v3114_v63 = vld [vmem:[#allocation4 + $0xb60] sm:$0xff]  ;;  %v3116_v17 = vld [vmem:[#allocation4 + $0xb70] sm:$0xff] }
 0x7d9   : > { %3339 = vmatprep.subr.bf16.mxu0 %v3038_v0  ;;  %3511 = vmatprep.subr.bf16.mxu1 %v3040_v4  ;;  %v3122_v0 = vld [vmem:[#allocation4 + $0xba0] sm:$0xff]  ;;  %v3124_v4 = vld [vmem:[#allocation4 + $0xbb0] sm:$0xff] }
 0x7dc   : > { %3340 = vmatpush1.bf16.msra.mxu0 %v3037_v1  ;;  %3512 = vmatpush1.bf16.msra.mxu1 %v3039_v2  ;;  %v3121_v1 = vld [vmem:[#allocation4 + $0xb98] sm:$0xff]  ;;  %v3123_v2 = vld [vmem:[#allocation4 + $0xba8] sm:$0xff] }
 0x7dd   : > { %3341 = vmatprep.subr.bf16.mxu0 %v3045_v3  ;;  %3513 = vmatprep.subr.bf16.mxu1 %v3047_v5  ;;  %v3129_v3 = vld [vmem:[#allocation4 + $0xbd8] sm:$0xff]  ;;  %v3131_v5 = vld [vmem:[#allocation4 + $0xbe8] sm:$0xff] }
 0x7e0   : > { %3342 = vmatpush1.bf16.msra.mxu0 %v3044_v6  ;;  %3514 = vmatpush1.bf16.msra.mxu1 %v3046_v8  ;;  %v3128_v6 = vld [vmem:[#allocation4 + $0xbd0] sm:$0xff]  ;;  %v3130_v8 = vld [vmem:[#allocation4 + $0xbe0] sm:$0xff] }
 0x7e1   : > { %3343 = vmatprep.subr.bf16.mxu0 %v3052_v9  ;;  %3515 = vmatprep.subr.bf16.mxu1 %v3054_v10  ;;  %v3136_v9 = vld [vmem:[#allocation4 + $0xc10] sm:$0xff]  ;;  %v3138_v10 = vld [vmem:[#allocation4 + $0xc20] sm:$0xff] }
 0x7e4   : > { %3344 = vmatpush1.bf16.msra.mxu0 %v3051_v16  ;;  %3516 = vmatpush1.bf16.msra.mxu1 %v3053_v24  ;;  %v3135_v16 = vld [vmem:[#allocation4 + $0xc08] sm:$0xff]  ;;  %v3137_v24 = vld [vmem:[#allocation4 + $0xc18] sm:$0xff] }
 0x7e5   : > { %3345 = vmatprep.subr.bf16.mxu0 %v3059_v11  ;;  %3517 = vmatprep.subr.bf16.mxu1 %v3061_v12  ;;  %v3143_v11 = vld [vmem:[#allocation4 + $0xc48] sm:$0xff]  ;;  %v3145_v12 = vld [vmem:[#allocation4 + $0xc58] sm:$0xff] }
 0x7e8   : > { %3346 = vmatpush1.bf16.msra.mxu0 %v3058_v13  ;;  %3518 = vmatpush1.bf16.msra.mxu1 %v3060_v14  ;;  %v3142_v13 = vld [vmem:[#allocation4 + $0xc40] sm:$0xff]  ;;  %v3144_v14 = vld [vmem:[#allocation4 + $0xc50] sm:$0xff] }
 0x7e9   : > { %3347 = vmatprep.subr.bf16.mxu0 %v3066_v23  ;;  %3519 = vmatprep.subr.bf16.mxu1 %v3068_v15  ;;  %v3150_v23 = vld [vmem:[#allocation4 + $0xc80] sm:$0xff]  ;;  %v3152_v15 = vld [vmem:[#allocation4 + $0xc90] sm:$0xff] }
 0x7ec   : > { %3348 = vmatpush1.bf16.msra.mxu0 %v3065_v18  ;;  %3520 = vmatpush1.bf16.msra.mxu1 %v3067_v21  ;;  %v3149_v18 = vld [vmem:[#allocation4 + $0xc78] sm:$0xff]  ;;  %v3151_v21 = vld [vmem:[#allocation4 + $0xc88] sm:$0xff] }
 0x7ed   : > { %3349 = vmatprep.subr.bf16.mxu0 %v3073_v25  ;;  %3521 = vmatprep.subr.bf16.mxu1 %v3075_v52  ;;  %v3157_v25 = vld [vmem:[#allocation4 + $0xcb8] sm:$0xff]  ;;  %v3159_v52 = vld [vmem:[#allocation4 + $0xcc8] sm:$0xff] }
 0x7f0   : > { %3350 = vmatpush1.bf16.msra.mxu0 %v3072_v26  ;;  %3522 = vmatpush1.bf16.msra.mxu1 %v3074_v27  ;;  %v3156_v26 = vld [vmem:[#allocation4 + $0xcb0] sm:$0xff]  ;;  %v3158_v27 = vld [vmem:[#allocation4 + $0xcc0] sm:$0xff] }
 0x7f1   : > { %3351 = vmatprep.subr.bf16.mxu0 %v3080_v28  ;;  %3523 = vmatprep.subr.bf16.mxu1 %v3082_v29  ;;  %v3164_v28 = vld [vmem:[#allocation4 + $0xcf0] sm:$0xff]  ;;  %v3166_v29 = vld [vmem:[#allocation4 + $0xd00] sm:$0xff] }
 0x7f4   : > { %3352 = vmatpush1.bf16.msra.mxu0 %v3079_v34  ;;  %3524 = vmatpush1.bf16.msra.mxu1 %v3081_v35  ;;  %v3163_v34 = vld [vmem:[#allocation4 + $0xce8] sm:$0xff]  ;;  %v3165_v35 = vld [vmem:[#allocation4 + $0xcf8] sm:$0xff] }
 0x7f5   : > { %3364 = vmatprep.subr.bf16.mxu0 %v3087_v38  ;;  %3536 = vmatprep.subr.bf16.mxu1 %v3089_v39  ;;  %v3171_v38 = vld [vmem:[#allocation4 + $0xd28] sm:$0xff]  ;;  %v3173_v39 = vld [vmem:[#allocation4 + $0xd38] sm:$0xff] }
 0x7f7   : > { %3354 = vmatmul.mubr.bf16.vlgmr.msra.gmra.mrb[20].mxu0 %v5601_v30  ;;  %3526 = vmatmul.mubr.bf16.vlgmr.msra.gmra.mrb[20].mxu1 %v5601_v30 }
 0x7f8   : > { %3365 = vmatpush1.bf16.msra.mxu0 %v3086_v40  ;;  %3537 = vmatpush1.bf16.msra.mxu1 %v3088_v41  ;;  %v3170_v40 = vld [vmem:[#allocation4 + $0xd20] sm:$0xff]  ;;  %v3172_v41 = vld [vmem:[#allocation4 + $0xd30] sm:$0xff] }
 0x7f9   : > { %3366 = vmatprep.subr.bf16.mxu0 %v3094_v42  ;;  %3538 = vmatprep.subr.bf16.mxu1 %v3096_v44  ;;  %v3178_v42 = vld [vmem:[#allocation4 + $0xd60] sm:$0xff]  ;;  %v3180_v44 = vld [vmem:[#allocation4 + $0xd70] sm:$0xff] }
 0x7fa   : > { %3396 = vmatprep.mubr.bf16.mxu0 %v5607_v37  ;;  %3568 = vmatprep.mubr.bf16.mxu1 %v5607_v37 }
 0x7fc   : > { %3367 = vmatpush1.bf16.msra.mxu0 %v3093_v46  ;;  %3539 = vmatpush1.bf16.msra.mxu1 %v3095_v47  ;;  %v3177_v46 = vld [vmem:[#allocation4 + $0xd58] sm:$0xff]  ;;  %v3179_v47 = vld [vmem:[#allocation4 + $0xd68] sm:$0xff] }
 0x7fd   : > { %3368 = vmatprep.subr.bf16.mxu0 %v3101_v48  ;;  %3540 = vmatprep.subr.bf16.mxu1 %v3103_v51  ;;  %v3185_v48 = vld [vmem:[#allocation4 + $0xd98] sm:$0xff]  ;;  %v3187_v51 = vld [vmem:[#allocation4 + $0xda8] sm:$0xff] }
 0x800   : > { %3369 = vmatpush1.bf16.msra.mxu0 %v3100_v53  ;;  %3541 = vmatpush1.bf16.msra.mxu1 %v3102_v57  ;;  %v3184_v53 = vld [vmem:[#allocation4 + $0xd90] sm:$0xff]  ;;  %v3186_v57 = vld [vmem:[#allocation4 + $0xda0] sm:$0xff] }
 0x801   : > { %3370 = vmatprep.subr.bf16.mxu0 %v3108_v58  ;;  %3542 = vmatprep.subr.bf16.mxu1 %v3110_v59  ;;  %v3192_v58 = vld [vmem:[#allocation4 + $0xdd0] sm:$0xff]  ;;  %v3194_v59 = vld [vmem:[#allocation4 + $0xde0] sm:$0xff] }
 0x804   : > { %3371 = vmatpush1.bf16.msra.mxu0 %v3107_v7  ;;  %3543 = vmatpush1.bf16.msra.mxu1 %v3109_v60  ;;  %v3191_v7 = vld [vmem:[#allocation4 + $0xdc8] sm:$0xff]  ;;  %v3193_v60 = vld [vmem:[#allocation4 + $0xdd8] sm:$0xff] }
 0x805   : > { %3372 = vmatprep.subr.bf16.mxu0 %v3115_v61  ;;  %3544 = vmatprep.subr.bf16.mxu1 %v3117_v62  ;;  %v2755_v61 = vld [vmem:[#allocation4 + $0x28] sm:$0xff]  ;;  %v2812_v62 = vld [vmem:[#allocation4 + $0x1f0] sm:$0xff] }
 0x808   : > { %3373 = vmatpush1.bf16.msra.mxu0 %v3114_v63  ;;  %3545 = vmatpush1.bf16.msra.mxu1 %v3116_v17  ;;  %v2754_v63 = vld [vmem:[#allocation4 + $0x20] sm:$0xff]  ;;  %v2756_v17 = vld [vmem:[#allocation4 + $0x30] sm:$0xff] }
 0x809   : > { %3374 = vmatprep.subr.bf16.mxu0 %v3122_v0  ;;  %3546 = vmatprep.subr.bf16.mxu1 %v3124_v4  ;;  %v2762_v0 = vld [vmem:[#allocation4 + $0x60] sm:$0xff]  ;;  %v2819_v4 = vld [vmem:[#allocation4 + $0x228] sm:$0xff] }
 0x80c   : > { %3375 = vmatpush1.bf16.msra.mxu0 %v3121_v1  ;;  %3547 = vmatpush1.bf16.msra.mxu1 %v3123_v2  ;;  %v2761_v1 = vld [vmem:[#allocation4 + $0x58] sm:$0xff]  ;;  %v2763_v2 = vld [vmem:[#allocation4 + $0x68] sm:$0xff] }
 0x80d   : > { %3376 = vmatprep.subr.bf16.mxu0 %v3129_v3  ;;  %3548 = vmatprep.subr.bf16.mxu1 %v3131_v5  ;;  %v2769_v3 = vld [vmem:[#allocation4 + $0x98] sm:$0xff]  ;;  %v2826_v5 = vld [vmem:[#allocation4 + $0x260] sm:$0xff] }
 0x810   : > { %3377 = vmatpush1.bf16.msra.mxu0 %v3128_v6  ;;  %3549 = vmatpush1.bf16.msra.mxu1 %v3130_v8  ;;  %v2768_v6 = vld [vmem:[#allocation4 + $0x90] sm:$0xff]  ;;  %v2770_v8 = vld [vmem:[#allocation4 + $0xa0] sm:$0xff] }
 0x811   : > { %3378 = vmatprep.subr.bf16.mxu0 %v3136_v9  ;;  %3550 = vmatprep.subr.bf16.mxu1 %v3138_v10  ;;  %v2776_v9 = vld [vmem:[#allocation4 + $0xd0] sm:$0xff]  ;;  %v2833_v10 = vld [vmem:[#allocation4 + $0x298] sm:$0xff] }
 0x814   : > { %3379 = vmatpush1.bf16.msra.mxu0 %v3135_v16  ;;  %3551 = vmatpush1.bf16.msra.mxu1 %v3137_v24  ;;  %v2775_v16 = vld [vmem:[#allocation4 + $0xc8] sm:$0xff]  ;;  %v2777_v24 = vld [vmem:[#allocation4 + $0xd8] sm:$0xff] }
 0x815   : > { %3380 = vmatprep.subr.bf16.mxu0 %v3143_v11  ;;  %3552 = vmatprep.subr.bf16.mxu1 %v3145_v12  ;;  %v2783_v11 = vld [vmem:[#allocation4 + $0x108] sm:$0xff]  ;;  %v2840_v12 = vld [vmem:[#allocation4 + $0x2d0] sm:$0xff] }
 0x818   : > { %3381 = vmatpush1.bf16.msra.mxu0 %v3142_v13  ;;  %3553 = vmatpush1.bf16.msra.mxu1 %v3144_v14  ;;  %v2784_v13 = vld [vmem:[#allocation4 + $0x110] sm:$0xff]  ;;  %v2790_v14 = vld [vmem:[#allocation4 + $0x140] sm:$0xff] }
 0x819   : > { %3382 = vmatprep.subr.bf16.mxu0 %v3150_v23  ;;  %3554 = vmatprep.subr.bf16.mxu1 %v3152_v15  ;;  %v2847_v23 = vld [vmem:[#allocation4 + $0x308] sm:$0xff]  ;;  %v2789_v15 = vld [vmem:[#allocation4 + $0x138] sm:$0xff] }
 0x81c   : > { %3383 = vmatpush1.bf16.msra.mxu0 %v3149_v18  ;;  %3555 = vmatpush1.bf16.msra.mxu1 %v3151_v21  ;;  %v2791_v18 = vld [vmem:[#allocation4 + $0x148] sm:$0xff]  ;;  %v2797_v21 = vld [vmem:[#allocation4 + $0x178] sm:$0xff] }
 0x81d   : > { %3384 = vmatprep.subr.bf16.mxu0 %v3157_v25  ;;  %3556 = vmatprep.subr.bf16.mxu1 %v3159_v52  ;;  %v2854_v25 = vld [vmem:[#allocation4 + $0x340] sm:$0xff]  ;;  %v2796_v52 = vld [vmem:[#allocation4 + $0x170] sm:$0xff] }
 0x820   : > { %3385 = vmatpush1.bf16.msra.mxu0 %v3156_v26  ;;  %3557 = vmatpush1.bf16.msra.mxu1 %v3158_v27  ;;  %v2798_v26 = vld [vmem:[#allocation4 + $0x180] sm:$0xff]  ;;  %v2804_v27 = vld [vmem:[#allocation4 + $0x1b0] sm:$0xff] }
 0x821   : > { %3386 = vmatprep.subr.bf16.mxu0 %v3164_v28  ;;  %3558 = vmatprep.subr.bf16.mxu1 %v3166_v29  ;;  %v2861_v28 = vld [vmem:[#allocation4 + $0x378] sm:$0xff]  ;;  %v2803_v29 = vld [vmem:[#allocation4 + $0x1a8] sm:$0xff] }
 0x824   : > { %3387 = vmatpush1.bf16.msra.mxu0 %v3163_v34  ;;  %3559 = vmatpush1.bf16.msra.mxu1 %v3165_v35  ;;  %v2805_v34 = vld [vmem:[#allocation4 + $0x1b8] sm:$0xff]  ;;  %v2811_v35 = vld [vmem:[#allocation4 + $0x1e8] sm:$0xff] }
 0x825   : > { %3388 = vmatprep.subr.bf16.mxu0 %v3171_v38  ;;  %3560 = vmatprep.subr.bf16.mxu1 %v3173_v39  ;;  %v2924_v38 = vld [vmem:[#allocation4 + $0x570] sm:$0xff]  ;;  %v2810_v39 = vld [vmem:[#allocation4 + $0x1e0] sm:$0xff] }
 0x828   : > { %3389 = vmatpush1.bf16.msra.mxu0 %v3170_v40  ;;  %3561 = vmatpush1.bf16.msra.mxu1 %v3172_v41  ;;  %v2868_v40 = vld [vmem:[#allocation4 + $0x3b0] sm:$0xff]  ;;  %v2818_v41 = vld [vmem:[#allocation4 + $0x220] sm:$0xff] }
 0x829   : > { %3390 = vmatprep.subr.bf16.mxu0 %v3178_v42  ;;  %3562 = vmatprep.subr.bf16.mxu1 %v3180_v44  ;;  %v2931_v42 = vld [vmem:[#allocation4 + $0x5a8] sm:$0xff]  ;;  %v2817_v44 = vld [vmem:[#allocation4 + $0x218] sm:$0xff] }
 0x82c   : > { %3391 = vmatpush1.bf16.msra.mxu0 %v3177_v46  ;;  %3563 = vmatpush1.bf16.msra.mxu1 %v3179_v47  ;;  %v2875_v46 = vld [vmem:[#allocation4 + $0x3e8] sm:$0xff]  ;;  %v2825_v47 = vld [vmem:[#allocation4 + $0x258] sm:$0xff] }
 0x82d   : > { %3392 = vmatprep.subr.bf16.mxu0 %v3185_v48  ;;  %3564 = vmatprep.subr.bf16.mxu1 %v3187_v51  ;;  %v2938_v48 = vld [vmem:[#allocation4 + $0x5e0] sm:$0xff]  ;;  %v2824_v51 = vld [vmem:[#allocation4 + $0x250] sm:$0xff] }
 0x830   : > { %3393 = vmatpush1.bf16.msra.mxu0 %v3184_v53  ;;  %3565 = vmatpush1.bf16.msra.mxu1 %v3186_v57  ;;  %v2882_v53 = vld [vmem:[#allocation4 + $0x420] sm:$0xff]  ;;  %v2832_v57 = vld [vmem:[#allocation4 + $0x290] sm:$0xff] }
 0x831   : > { %3394 = vmatprep.subr.bf16.mxu0 %v3192_v58  ;;  %3566 = vmatprep.subr.bf16.mxu1 %v3194_v59  ;;  %v2945_v58 = vld [vmem:[#allocation4 + $0x618] sm:$0xff]  ;;  %v2831_v59 = vld [vmem:[#allocation4 + $0x288] sm:$0xff] }
 0x834   : > { %3395 = vmatpush1.bf16.msra.mxu0 %v3191_v7  ;;  %3567 = vmatpush1.bf16.msra.mxu1 %v3193_v60  ;;  %v2889_v7 = vld [vmem:[#allocation4 + $0x458] sm:$0xff]  ;;  %v2839_v60 = vld [vmem:[#allocation4 + $0x2c8] sm:$0xff] }
 0x835   : > { %3579 = vmatprep.subr.bf16.mxu0 %v2755_v61  ;;  %4228 = vmatprep.subr.bf16.mxu1 %v2812_v62  ;;  %v2952_v61 = vld [vmem:[#allocation4 + $0x650] sm:$0xff]  ;;  %v2838_v62 = vld [vmem:[#allocation4 + $0x2c0] sm:$0xff] }
 0x837   : > { %3397 = vmatmul.mubr.bf16.vlgmr.msra.gmra.mrb[20].mxu0 %v5603_v33  ;;  %3569 = vmatmul.mubr.bf16.vlgmr.msra.gmra.mrb[20].mxu1 %v5603_v33 }
 0x838   : > { %3580 = vmatpush1.bf16.msra.mxu0 %v2754_v63  ;;  %4229 = vmatpush3.bf16.msra.mxu1 %v2756_v17  ;;  %v2896_v63 = vld [vmem:[#allocation4 + $0x490] sm:$0xff]  ;;  %v2846_v17 = vld [vmem:[#allocation4 + $0x300] sm:$0xff] }
 0x839   : > { %3581 = vmatprep.subr.bf16.mxu0 %v2762_v0  ;;  %4230 = vmatprep.subr.bf16.mxu1 %v2819_v4  ;;  %v2959_v0 = vld [vmem:[#allocation4 + $0x688] sm:$0xff]  ;;  %v2845_v4 = vld [vmem:[#allocation4 + $0x2f8] sm:$0xff] }
 0x83a   : > { %3611 = vmatprep.mubr.bf16.mxu0 %v5589_v54  ;;  %3783 = vmatprep.mubr.bf16.mxu1 %v5589_v54  ;;  %v2782_v54 = vld [vmem:[#allocation4 + $0x100] sm:$0xff] }
 0x83c   : > { %3582 = vmatpush1.bf16.msra.mxu0 %v2761_v1  ;;  %4231 = vmatpush3.bf16.msra.mxu1 %v2763_v2  ;;  %v2903_v1 = vld [vmem:[#allocation4 + $0x4c8] sm:$0xff]  ;;  %v2853_v2 = vld [vmem:[#allocation4 + $0x338] sm:$0xff] }
 0x83d   : > { %3583 = vmatprep.subr.bf16.mxu0 %v2769_v3  ;;  %4232 = vmatprep.subr.bf16.mxu1 %v2826_v5  ;;  %v2966_v3 = vld [vmem:[#allocation4 + $0x6c0] sm:$0xff]  ;;  %v2852_v5 = vld [vmem:[#allocation4 + $0x330] sm:$0xff] }
 0x840   : > { %3584 = vmatpush1.bf16.msra.mxu0 %v2768_v6  ;;  %4233 = vmatpush3.bf16.msra.mxu1 %v2770_v8  ;;  %v2910_v6 = vld [vmem:[#allocation4 + $0x500] sm:$0xff]  ;;  %v2860_v8 = vld [vmem:[#allocation4 + $0x370] sm:$0xff] }
 0x841   : > { %3585 = vmatprep.subr.bf16.mxu0 %v2776_v9  ;;  %4234 = vmatprep.subr.bf16.mxu1 %v2833_v10  ;;  %v2973_v9 = vld [vmem:[#allocation4 + $0x6f8] sm:$0xff]  ;;  %v2859_v10 = vld [vmem:[#allocation4 + $0x368] sm:$0xff] }
 0x844   : > { %3586 = vmatpush1.bf16.msra.mxu0 %v2775_v16  ;;  %4235 = vmatpush3.bf16.msra.mxu1 %v2777_v24  ;;  %v2917_v16 = vld [vmem:[#allocation4 + $0x538] sm:$0xff]  ;;  %v2867_v24 = vld [vmem:[#allocation4 + $0x3a8] sm:$0xff] }
 0x845   : > { %3587 = vmatprep.subr.bf16.mxu0 %v2783_v11  ;;  %4236 = vmatprep.subr.bf16.mxu1 %v2840_v12  ;;  %v3036_v11 = vld [vmem:[#allocation4 + $0x8f0] sm:$0xff]  ;;  %v2866_v12 = vld [vmem:[#allocation4 + $0x3a0] sm:$0xff] }
 0x848   : > { %3588 = vmatpush1.bf16.msra.mxu0 %v2782_v54  ;;  %4237 = vmatpush3.bf16.msra.mxu1 %v2784_v13  ;;  %v2980_v54 = vld [vmem:[#allocation4 + $0x730] sm:$0xff]  ;;  %v2874_v13 = vld [vmem:[#allocation4 + $0x3e0] sm:$0xff] }
 0x849   : > { %3589 = vmatprep.subr.bf16.mxu0 %v2790_v14  ;;  %4238 = vmatprep.subr.bf16.mxu1 %v2847_v23  ;;  %v3043_v14 = vld [vmem:[#allocation4 + $0x928] sm:$0xff]  ;;  %v2873_v23 = vld [vmem:[#allocation4 + $0x3d8] sm:$0xff] }
 0x84c   : > { %3590 = vmatpush1.bf16.msra.mxu0 %v2789_v15  ;;  %4239 = vmatpush3.bf16.msra.mxu1 %v2791_v18  ;;  %v2987_v15 = vld [vmem:[#allocation4 + $0x768] sm:$0xff]  ;;  %v2881_v18 = vld [vmem:[#allocation4 + $0x418] sm:$0xff] }
 0x84d   : > { %3591 = vmatprep.subr.bf16.mxu0 %v2797_v21  ;;  %4240 = vmatprep.subr.bf16.mxu1 %v2854_v25  ;;  %v3050_v21 = vld [vmem:[#allocation4 + $0x960] sm:$0xff]  ;;  %v2880_v25 = vld [vmem:[#allocation4 + $0x410] sm:$0xff] }
 0x850   : > { %3592 = vmatpush1.bf16.msra.mxu0 %v2796_v52  ;;  %4241 = vmatpush3.bf16.msra.mxu1 %v2798_v26  ;;  %v2888_v52 = vld [vmem:[#allocation4 + $0x450] sm:$0xff]  ;;  %v3057_v26 = vld [vmem:[#allocation4 + $0x998] sm:$0xff] }
 0x851   : > { %3593 = vmatprep.subr.bf16.mxu0 %v2804_v27  ;;  %4242 = vmatprep.subr.bf16.mxu1 %v2861_v28  ;;  %v2887_v27 = vld [vmem:[#allocation4 + $0x448] sm:$0xff]  ;;  %v3001_v28 = vld [vmem:[#allocation4 + $0x7d8] sm:$0xff] }
 0x854   : > { %3594 = vmatpush1.bf16.msra.mxu0 %v2803_v29  ;;  %4243 = vmatpush3.bf16.msra.mxu1 %v2805_v34  ;;  %v2895_v29 = vld [vmem:[#allocation4 + $0x488] sm:$0xff]  ;;  %v3064_v34 = vld [vmem:[#allocation4 + $0x9d0] sm:$0xff] }
 0x855   : > { %3595 = vmatprep.subr.bf16.mxu0 %v2811_v35  ;;  %4250 = vmatprep.subr.bf16.mxu1 %v2924_v38  ;;  %v3008_v35 = vld [vmem:[#allocation4 + $0x810] sm:$0xff]  ;;  %v2902_v38 = vld [vmem:[#allocation4 + $0x4c0] sm:$0xff] }
 0x857   : > { %3784 = vmatmul.mubr.bf16.vlgmr.msra.gmra.mrb[24].mxu1 %v5585_v49 }
 0x858   : > { %3596 = vmatpush1.bf16.msra.mxu0 %v2810_v39  ;;  %4251 = vmatpush3.bf16.msra.mxu1 %v2868_v40  ;;  %v3071_v39 = vld [vmem:[#allocation4 + $0xa08] sm:$0xff]  ;;  %v2901_v40 = vld [vmem:[#allocation4 + $0x4b8] sm:$0xff] }
 0x859   : > { %3597 = vmatprep.subr.bf16.mxu0 %v2818_v41  ;;  %4252 = vmatprep.subr.bf16.mxu1 %v2931_v42  ;;  %v3015_v41 = vld [vmem:[#allocation4 + $0x848] sm:$0xff]  ;;  %v2909_v42 = vld [vmem:[#allocation4 + $0x4f8] sm:$0xff] }
 0x85a   : > { %3824 = vmatprep.mubr.bf16.mxu1 %v5591_v55 }
 0x85c   : > { %3598 = vmatpush1.bf16.msra.mxu0 %v2817_v44  ;;  %4253 = vmatpush3.bf16.msra.mxu1 %v2875_v46  ;;  %v3078_v44 = vld [vmem:[#allocation4 + $0xa40] sm:$0xff]  ;;  %v2908_v46 = vld [vmem:[#allocation4 + $0x4f0] sm:$0xff] }
 0x85d   : > { %3599 = vmatprep.subr.bf16.mxu0 %v2825_v47  ;;  %4254 = vmatprep.subr.bf16.mxu1 %v2938_v48  ;;  %v3022_v47 = vld [vmem:[#allocation4 + $0x880] sm:$0xff]  ;;  %v2916_v48 = vld [vmem:[#allocation4 + $0x530] sm:$0xff] }
 0x860   : > { %3600 = vmatpush1.bf16.msra.mxu0 %v2824_v51  ;;  %4255 = vmatpush3.bf16.msra.mxu1 %v2882_v53  ;;  %v3085_v51 = vld [vmem:[#allocation4 + $0xa78] sm:$0xff]  ;;  %v2915_v53 = vld [vmem:[#allocation4 + $0x528] sm:$0xff] }
 0x861   : > { %3601 = vmatprep.subr.bf16.mxu0 %v2832_v57  ;;  %4256 = vmatprep.subr.bf16.mxu1 %v2945_v58  ;;  %v3029_v57 = vld [vmem:[#allocation4 + $0x8b8] sm:$0xff]  ;;  %v2923_v58 = vld [vmem:[#allocation4 + $0x568] sm:$0xff] }
 0x864   : > { %3602 = vmatpush1.bf16.msra.mxu0 %v2831_v59  ;;  %4257 = vmatpush3.bf16.msra.mxu1 %v2889_v7  ;;  %v3148_v59 = vld [vmem:[#allocation4 + $0xc70] sm:$0xff]  ;;  %v2922_v7 = vld [vmem:[#allocation4 + $0x560] sm:$0xff] }
 0x865   : > { %3603 = vmatprep.subr.bf16.mxu0 %v2839_v60  ;;  %4258 = vmatprep.subr.bf16.mxu1 %v2952_v61  ;;  %v3092_v60 = vld [vmem:[#allocation4 + $0xab0] sm:$0xff]  ;;  %v2930_v61 = vld [vmem:[#allocation4 + $0x5a0] sm:$0xff] }
 0x868   : > { %3604 = vmatpush1.bf16.msra.mxu0 %v2838_v62  ;;  %4259 = vmatpush3.bf16.msra.mxu1 %v2896_v63  ;;  %v3155_v62 = vld [vmem:[#allocation4 + $0xca8] sm:$0xff]  ;;  %v2929_v63 = vld [vmem:[#allocation4 + $0x598] sm:$0xff] }
 0x869   : > { %3605 = vmatprep.subr.bf16.mxu0 %v2846_v17  ;;  %4260 = vmatprep.subr.bf16.mxu1 %v2959_v0  ;;  %v3099_v17 = vld [vmem:[#allocation4 + $0xae8] sm:$0xff]  ;;  %v2937_v0 = vld [vmem:[#allocation4 + $0x5d8] sm:$0xff] }
 0x86c   : > { %3606 = vmatpush1.bf16.msra.mxu0 %v2845_v4  ;;  %4261 = vmatpush3.bf16.msra.mxu1 %v2903_v1  ;;  %v3162_v4 = vld [vmem:[#allocation4 + $0xce0] sm:$0xff]  ;;  %v2936_v1 = vld [vmem:[#allocation4 + $0x5d0] sm:$0xff] }
 0x86d   : > { %3607 = vmatprep.subr.bf16.mxu0 %v2853_v2  ;;  %4262 = vmatprep.subr.bf16.mxu1 %v2966_v3  ;;  %v3106_v2 = vld [vmem:[#allocation4 + $0xb20] sm:$0xff]  ;;  %v2944_v3 = vld [vmem:[#allocation4 + $0x610] sm:$0xff] }
 0x870   : > { %3608 = vmatpush1.bf16.msra.mxu0 %v2852_v5  ;;  %4263 = vmatpush3.bf16.msra.mxu1 %v2910_v6  ;;  %v3169_v5 = vld [vmem:[#allocation4 + $0xd18] sm:$0xff]  ;;  %v2943_v6 = vld [vmem:[#allocation4 + $0x608] sm:$0xff] }
 0x871   : > { %3609 = vmatprep.subr.bf16.mxu0 %v2860_v8  ;;  %4264 = vmatprep.subr.bf16.mxu1 %v2973_v9  ;;  %v3113_v8 = vld [vmem:[#allocation4 + $0xb58] sm:$0xff]  ;;  %v2951_v9 = vld [vmem:[#allocation4 + $0x648] sm:$0xff] }
 0x874   : > { %3610 = vmatpush1.bf16.msra.mxu0 %v2859_v10  ;;  %4265 = vmatpush3.bf16.msra.mxu1 %v2917_v16  ;;  %v3176_v10 = vld [vmem:[#allocation4 + $0xd50] sm:$0xff]  ;;  %v2950_v16 = vld [vmem:[#allocation4 + $0x640] sm:$0xff] }
 0x875   : > { %3622 = vmatprep.subr.bf16.mxu0 %v2867_v24  ;;  %4272 = vmatprep.subr.bf16.mxu1 %v3036_v11  ;;  %v3120_v24 = vld [vmem:[#allocation4 + $0xb90] sm:$0xff]  ;;  %v2958_v11 = vld [vmem:[#allocation4 + $0x680] sm:$0xff] }
 0x877   : > { %3612 = vmatmul.mubr.bf16.vlgmr.msra.gmra.mrb[24].mxu0 %v5585_v49  ;;  %3825 = vmatmul.mubr.bf16.vlgmr.msra.gmra.mrb[28].mxu1 %v5587_v50  ;;  %v2994_v49 = vld [vmem:[#allocation4 + $0x7a0] sm:$0xff] }
 0x878   : > { %3623 = vmatpush1.bf16.msra.mxu0 %v2866_v12  ;;  %4273 = vmatpush3.bf16.msra.mxu1 %v2980_v54  ;;  %v3183_v12 = vld [vmem:[#allocation4 + $0xd88] sm:$0xff]  ;;  %v2957_v54 = vld [vmem:[#allocation4 + $0x678] sm:$0xff] }
 0x879   : > { %3624 = vmatprep.subr.bf16.mxu0 %v2874_v13  ;;  %4274 = vmatprep.subr.bf16.mxu1 %v3043_v14  ;;  %v3127_v13 = vld [vmem:[#allocation4 + $0xbc8] sm:$0xff]  ;;  %v2965_v14 = vld [vmem:[#allocation4 + $0x6b8] sm:$0xff] }
 0x87a   : > { %3654 = vmatprep.mubr.bf16.mxu0 %v5591_v55  ;;  %3865 = vmatprep.mubr.bf16.mxu1 %v5605_v36  ;;  %v2894_v55 = vld [vmem:[#allocation4 + $0x480] sm:$0xff] }
 0x87c   : > { %3625 = vmatpush1.bf16.msra.mxu0 %v2873_v23  ;;  %4275 = vmatpush3.bf16.msra.mxu1 %v2987_v15  ;;  %v3190_v23 = vld [vmem:[#allocation4 + $0xdc0] sm:$0xff]  ;;  %v2964_v15 = vld [vmem:[#allocation4 + $0x6b0] sm:$0xff] }
 0x87d   : > { %3626 = vmatprep.subr.bf16.mxu0 %v2881_v18  ;;  %4276 = vmatprep.subr.bf16.mxu1 %v3050_v21  ;;  %v3134_v18 = vld [vmem:[#allocation4 + $0xc00] sm:$0xff]  ;;  %v2972_v21 = vld [vmem:[#allocation4 + $0x6f0] sm:$0xff] }
 0x880   : > { %3627 = vmatpush1.bf16.msra.mxu0 %v2880_v25  ;;  %4277 = vmatpush3.bf16.msra.mxu1 %v2994_v49  ;;  %v3197_v25 = vld [vmem:[#allocation4 + $0xdf8] sm:$0xff]  ;;  %v2971_v49 = vld [vmem:[#allocation4 + $0x6e8] sm:$0xff] }
 0x881   : > { %3628 = vmatprep.subr.bf16.mxu0 %v2888_v52  ;;  %4278 = vmatprep.subr.bf16.mxu1 %v3057_v26  ;;  %v3141_v52 = vld [vmem:[#allocation4 + $0xc38] sm:$0xff]  ;;  %v2979_v26 = vld [vmem:[#allocation4 + $0x728] sm:$0xff] }
 0x884   : > { %3629 = vmatpush1.bf16.msra.mxu0 %v2887_v27  ;;  %4279 = vmatpush3.bf16.msra.mxu1 %v3001_v28  ;;  %v2978_v27 = vld [vmem:[#allocation4 + $0x720] sm:$0xff] }
 0x885   : > { %3630 = vmatprep.subr.bf16.mxu0 %v2895_v29  ;;  %4280 = vmatprep.subr.bf16.mxu1 %v3064_v34  ;;  %v2986_v28 = vld [vmem:[#allocation4 + $0x760] sm:$0xff]  ;;  %v2985_v29 = vld [vmem:[#allocation4 + $0x758] sm:$0xff] }
 0x886   : > { %v2993_v34 = vld [vmem:[#allocation4 + $0x798] sm:$0xff] }
 0x888   : > { %3631 = vmatpush1.bf16.msra.mxu0 %v2894_v55  ;;  %4281 = vmatpush3.bf16.msra.mxu1 %v3008_v35  ;;  %v2992_v55 = vld [vmem:[#allocation4 + $0x790] sm:$0xff] }
 0x889   : > { %3632 = vmatprep.subr.bf16.mxu0 %v2902_v38  ;;  %4282 = vmatprep.subr.bf16.mxu1 %v3071_v39  ;;  %v3000_v35 = vld [vmem:[#allocation4 + $0x7d0] sm:$0xff]  ;;  %v2999_v38 = vld [vmem:[#allocation4 + $0x7c8] sm:$0xff] }
 0x88a   : > { %v3007_v39 = vld [vmem:[#allocation4 + $0x808] sm:$0xff] }
 0x88c   : > { %3633 = vmatpush1.bf16.msra.mxu0 %v2901_v40  ;;  %4283 = vmatpush3.bf16.msra.mxu1 %v3015_v41  ;;  %v3006_v40 = vld [vmem:[#allocation4 + $0x800] sm:$0xff]  ;;  %v3013_v41 = vld [vmem:[#allocation4 + $0x838] sm:$0xff] }
 0x88d   : > { %3634 = vmatprep.subr.bf16.mxu0 %v2909_v42  ;;  %4284 = vmatprep.subr.bf16.mxu1 %v3078_v44  ;;  %v3021_v42 = vld [vmem:[#allocation4 + $0x878] sm:$0xff]  ;;  %v3028_v44 = vld [vmem:[#allocation4 + $0x8b0] sm:$0xff] }
 0x890   : > { %3635 = vmatpush1.bf16.msra.mxu0 %v2908_v46  ;;  %4285 = vmatpush3.bf16.msra.mxu1 %v3022_v47  ;;  %v3027_v46 = vld [vmem:[#allocation4 + $0x8a8] sm:$0xff] }
 0x891   : > { %3636 = vmatprep.subr.bf16.mxu0 %v2916_v48  ;;  %4286 = vmatprep.subr.bf16.mxu1 %v3085_v51  ;;  %v3035_v47 = vld [vmem:[#allocation4 + $0x8e8] sm:$0xff]  ;;  %v3034_v48 = vld [vmem:[#allocation4 + $0x8e0] sm:$0xff] }
 0x892   : > { %v3042_v51 = vld [vmem:[#allocation4 + $0x920] sm:$0xff] }
 0x894   : > { %3637 = vmatpush1.bf16.msra.mxu0 %v2915_v53  ;;  %4287 = vmatpush3.bf16.msra.mxu1 %v3029_v57  ;;  %v3041_v53 = vld [vmem:[#allocation4 + $0x918] sm:$0xff] }
 0x895   : > { %3638 = vmatprep.subr.bf16.mxu0 %v2923_v58  ;;  %4294 = vmatprep.subr.bf16.mxu1 %v3148_v59  ;;  %v3049_v57 = vld [vmem:[#allocation4 + $0x958] sm:$0xff]  ;;  %v3048_v58 = vld [vmem:[#allocation4 + $0x950] sm:$0xff] }
 0x896   : > { %v3056_v59 = vld [vmem:[#allocation4 + $0x990] sm:$0xff] }
 0x897   : > { %3866 = vmatmul.mubr.bf16.vlgmr.msra.gmra.mrb[32].mxu1 %v5601_v30 }
 0x898   : > { %3639 = vmatpush1.bf16.msra.mxu0 %v2922_v7  ;;  %4295 = vmatpush3.bf16.msra.mxu1 %v3092_v60  ;;  %v3055_v7 = vld [vmem:[#allocation4 + $0x988] sm:$0xff] }
 0x899   : > { %3640 = vmatprep.subr.bf16.mxu0 %v2930_v61  ;;  %4296 = vmatprep.subr.bf16.mxu1 %v3155_v62  ;;  %v3063_v60 = vld [vmem:[#allocation4 + $0x9c8] sm:$0xff]  ;;  %v3062_v61 = vld [vmem:[#allocation4 + $0x9c0] sm:$0xff] }
 0x89a   : > { %3906 = vmatprep.mubr.bf16.mxu1 %v5607_v37  ;;  %v3070_v62 = vld [vmem:[#allocation4 + $0xa00] sm:$0xff] }
 0x89c   : > { %3641 = vmatpush1.bf16.msra.mxu0 %v2929_v63  ;;  %4297 = vmatpush3.bf16.msra.mxu1 %v3099_v17  ;;  %v3069_v63 = vld [vmem:[#allocation4 + $0x9f8] sm:$0xff] }
 0x89d   : > { %3642 = vmatprep.subr.bf16.mxu0 %v2937_v0  ;;  %4298 = vmatprep.subr.bf16.mxu1 %v3162_v4  ;;  %v3077_v17 = vld [vmem:[#allocation4 + $0xa38] sm:$0xff]  ;;  %v3076_v0 = vld [vmem:[#allocation4 + $0xa30] sm:$0xff] }
 0x89e   : > { %v3084_v4 = vld [vmem:[#allocation4 + $0xa70] sm:$0xff] }
 0x8a0   : > { %3643 = vmatpush1.bf16.msra.mxu0 %v2936_v1  ;;  %4299 = vmatpush3.bf16.msra.mxu1 %v3106_v2  ;;  %v3083_v1 = vld [vmem:[#allocation4 + $0xa68] sm:$0xff] }
 0x8a1   : > { %3644 = vmatprep.subr.bf16.mxu0 %v2944_v3  ;;  %4300 = vmatprep.subr.bf16.mxu1 %v3169_v5  ;;  %v3091_v2 = vld [vmem:[#allocation4 + $0xaa8] sm:$0xff]  ;;  %v3090_v3 = vld [vmem:[#allocation4 + $0xaa0] sm:$0xff] }
 0x8a2   : > { %v3098_v5 = vld [vmem:[#allocation4 + $0xae0] sm:$0xff] }
 0x8a4   : > { %3645 = vmatpush1.bf16.msra.mxu0 %v2943_v6  ;;  %4301 = vmatpush3.bf16.msra.mxu1 %v3113_v8  ;;  %v3097_v6 = vld [vmem:[#allocation4 + $0xad8] sm:$0xff] }
 0x8a5   : > { %3646 = vmatprep.subr.bf16.mxu0 %v2951_v9  ;;  %4302 = vmatprep.subr.bf16.mxu1 %v3176_v10  ;;  %v3105_v8 = vld [vmem:[#allocation4 + $0xb18] sm:$0xff]  ;;  %v3104_v9 = vld [vmem:[#allocation4 + $0xb10] sm:$0xff] }
 0x8a6   : > { %v3112_v10 = vld [vmem:[#allocation4 + $0xb50] sm:$0xff] }
 0x8a8   : > { %3647 = vmatpush1.bf16.msra.mxu0 %v2950_v16  ;;  %4303 = vmatpush3.bf16.msra.mxu1 %v3120_v24  ;;  %v3111_v16 = vld [vmem:[#allocation4 + $0xb48] sm:$0xff] }
 0x8a9   : > { %3648 = vmatprep.subr.bf16.mxu0 %v2958_v11  ;;  %4304 = vmatprep.subr.bf16.mxu1 %v3183_v12  ;;  %v3119_v24 = vld [vmem:[#allocation4 + $0xb88] sm:$0xff]  ;;  %v5644_v11 = vld [vmem:[#allocation17] sm:$0xff]  ;;  %v3118_v12 = vld [vmem:[#allocation4 + $0xb80] sm:$0xff] }
 0x8ac   : > { %3649 = vmatpush1.bf16.msra.mxu0 %v2957_v54  ;;  %4305 = vmatpush3.bf16.msra.mxu1 %v3127_v13  ;;  %v3211_v54 = vrot.slane %v5644_v11, %v5492_v43  ;;  %v3207_v13 = vrot.slane %v5644_v11, %v5487_v22 }
 0x8ad   : > { %3650 = vmatprep.subr.bf16.mxu0 %v2965_v14  ;;  %4306 = vmatprep.subr.bf16.mxu1 %v3190_v23  ;;  %v3215_v14 = vrot.slane %v5644_v11, %v5495_v45  ;;  %v3125_v23 = vld [vmem:[#allocation4 + $0xbb8] sm:$0xff]  ;;  %v3132_v45 = vld [vmem:[#allocation4 + $0xbf0] sm:$0xff] }
 0x8b0   : > { %3651 = vmatpush1.bf16.msra.mxu0 %v2964_v15  ;;  %4307 = vmatpush3.bf16.msra.mxu1 %v3134_v18 }
 0x8b1   : > { %3652 = vmatprep.subr.bf16.mxu0 %v2972_v21  ;;  %4308 = vmatprep.subr.bf16.mxu1 %v3197_v25  ;;  %v3133_v21 = vld [vmem:[#allocation4 + $0xbf8] sm:$0xff] }
 0x8b4   : > { %3653 = vmatpush1.bf16.msra.mxu0 %v2971_v49  ;;  %4309 = vmatpush3.bf16.msra.mxu1 %v3141_v52 }
 0x8b5   : > { %3665 = vmatprep.subr.bf16.mxu0 %v2979_v26 }
 0x8b7   : > { %3655 = vmatmul.mubr.bf16.vlgmr.msra.gmra.mrb[24].mxu0 %v5587_v50  ;;  %3907 = vmatmul.mubr.bf16.vlgmr.msra.gmra.mrb[36].mxu1 %v5603_v33  ;;  %v3014_v50 = vld [vmem:[#allocation4 + $0x840] sm:$0xff] }
 0x8b8   : > { %3666 = vmatpush1.bf16.msra.mxu0 %v2978_v27  ;;  %3697 = vmatprep.mubr.bf16.mxu0 %v5605_v36  ;;  %v3020_v36 = vld [vmem:[#allocation4 + $0x870] sm:$0xff] }
 0x8b9   : > { %3667 = vmatprep.subr.bf16.mxu0 %v2986_v28 }
 0x8bc   : > { %3668 = vmatpush1.bf16.msra.mxu0 %v2985_v29 }
 0x8bd   : > { %3669 = vmatprep.subr.bf16.mxu0 %v2993_v34 }
 0x8c0   : > { %3670 = vmatpush1.bf16.msra.mxu0 %v2992_v55 }
 0x8c1   : > { %3671 = vmatprep.subr.bf16.mxu0 %v3000_v35  ;;  %v3140_v35 = vld [vmem:[#allocation4 + $0xc30] sm:$0xff] }
 0x8c4   : > { %3672 = vmatpush1.bf16.msra.mxu0 %v2999_v38 }
 0x8c5   : > { %3673 = vmatprep.subr.bf16.mxu0 %v3007_v39 }
 0x8c8   : > { %3674 = vmatpush1.bf16.msra.mxu0 %v3006_v40  ;;  %v3139_v40 = vld [vmem:[#allocation4 + $0xc28] sm:$0xff] }
 0x8c9   : > { %3675 = vmatprep.subr.bf16.mxu0 %v3014_v50  ;;  %v3147_v50 = vld [vmem:[#allocation4 + $0xc68] sm:$0xff] }
 0x8cc   : > { %3676 = vmatpush1.bf16.msra.mxu0 %v3013_v41  ;;  %v3146_v41 = vld [vmem:[#allocation4 + $0xc60] sm:$0xff] }
 0x8cd   : > { %3677 = vmatprep.subr.bf16.mxu0 %v3021_v42  ;;  %v3154_v42 = vld [vmem:[#allocation4 + $0xca0] sm:$0xff] }
 0x8d0   : > { %3678 = vmatpush1.bf16.msra.mxu0 %v3020_v36 }
 0x8d1   : > { %3679 = vmatprep.subr.bf16.mxu0 %v3028_v44 }
 0x8d4   : > { %3680 = vmatpush1.bf16.msra.mxu0 %v3027_v46 }
 0x8d5   : > { %3681 = vmatprep.subr.bf16.mxu0 %v3035_v47  ;;  %v3153_v47 = vld [vmem:[#allocation4 + $0xc98] sm:$0xff] }
 0x8d8   : > { %3682 = vmatpush1.bf16.msra.mxu0 %v3034_v48 }
 0x8d9   : > { %3683 = vmatprep.subr.bf16.mxu0 %v3042_v51  ;;  %v3161_v51 = vld [vmem:[#allocation4 + $0xcd8] sm:$0xff] }
 0x8dc   : > { %3684 = vmatpush1.bf16.msra.mxu0 %v3041_v53 }
 0x8dd   : > { %3685 = vmatprep.subr.bf16.mxu0 %v3049_v57 }
 0x8e0   : > { %3686 = vmatpush1.bf16.msra.mxu0 %v3048_v58 }
 0x8e1   : > { %3687 = vmatprep.subr.bf16.mxu0 %v3056_v59  ;;  %v3160_v59 = vld [vmem:[#allocation4 + $0xcd0] sm:$0xff] }
 0x8e4   : > { %3688 = vmatpush1.bf16.msra.mxu0 %v3055_v7 }
 0x8e5   : > { %3689 = vmatprep.subr.bf16.mxu0 %v3063_v60  ;;  %v3168_v60 = vld [vmem:[#allocation4 + $0xd10] sm:$0xff] }
 0x8e8   : > { %3690 = vmatpush1.bf16.msra.mxu0 %v3062_v61  ;;  %v3167_v61 = vld [vmem:[#allocation4 + $0xd08] sm:$0xff] }
 0x8e9   : > { %3691 = vmatprep.subr.bf16.mxu0 %v3070_v62  ;;  %v3175_v62 = vld [vmem:[#allocation4 + $0xd48] sm:$0xff] }
 0x8ec   : > { %3692 = vmatpush1.bf16.msra.mxu0 %v3069_v63  ;;  %v3174_v63 = vld [vmem:[#allocation4 + $0xd40] sm:$0xff] }
 0x8ed   : > { %3693 = vmatprep.subr.bf16.mxu0 %v3077_v17  ;;  %v3182_v17 = vld [vmem:[#allocation4 + $0xd80] sm:$0xff] }
 0x8f0   : > { %3694 = vmatpush1.bf16.msra.mxu0 %v3076_v0  ;;  %v3181_v0 = vld [vmem:[#allocation4 + $0xd78] sm:$0xff] }
 0x8f1   : > { %3695 = vmatprep.subr.bf16.mxu0 %v3084_v4  ;;  %v3189_v4 = vld [vmem:[#allocation4 + $0xdb8] sm:$0xff] }
 0x8f4   : > { %3696 = vmatpush1.bf16.msra.mxu0 %v3083_v1 }
 0x8f5   : > { %3708 = vmatprep.subr.bf16.mxu0 %v3091_v2 }
 0x8f7   : > { %3698 = vmatmul.mubr.bf16.vlgmr.msra.gmra.mrb[24].mxu0 %v5601_v30  ;;  %v3126_v30 = vld [vmem:[#allocation4 + $0xbc0] sm:$0xff] }
 0x8f8   : > { %3709 = vmatpush1.bf16.msra.mxu0 %v3090_v3  ;;  %3740 = vmatprep.mubr.bf16.mxu0 %v5607_v37  ;;  %v3203_v37 = vrot.slane %v5644_v11, %v5484_v20 }
 0x8f9   : > { %3710 = vmatprep.subr.bf16.mxu0 %v3098_v5 }
 0x8fc   : > { %3711 = vmatpush1.bf16.msra.mxu0 %v3097_v6  ;;  %v3188_v6 = vld [vmem:[#allocation4 + $0xdb0] sm:$0xff] }
 0x8fd   : > { %3712 = vmatprep.subr.bf16.mxu0 %v3105_v8 }
 0x900   : > { %3713 = vmatpush1.bf16.msra.mxu0 %v3104_v9  ;;  %v3196_v9 = vld [vmem:[#allocation4 + $0xdf0] sm:$0xff] }
 0x901   : > { %3714 = vmatprep.subr.bf16.mxu0 %v3112_v10 }
 0x904   : > { %3715 = vmatpush1.bf16.msra.mxu0 %v3111_v16  ;;  %v3195_v16 = vld [vmem:[#allocation4 + $0xde8] sm:$0xff] }
 0x905   : > { %3716 = vmatprep.subr.bf16.mxu0 %v3119_v24  ;;  %v3227_v24 = vrot.slane %v5644_v11, %v2156_v56 }
 0x908   : > { %3717 = vmatpush1.bf16.msra.mxu0 %v3118_v12 }
 0x909   : > { %3718 = vmatprep.subr.bf16.mxu0 %v3126_v30 }
 0x90a   : > { %v3398_v15 = vpop.f32.mrb[20].mxu0  ;;  %v3570_v18 = vpop.f32.mrb[20].mxu1 }
 0x90b   : > { %v4344_v25 = vadd.f32 %v3398_v15, %v3203_v37  ;;  %v4348_v49 = vadd.f32 %v3570_v18, %v3211_v54  ;;  %v3400_v52 = vpop.f32.mrb[21].mxu0  ;;  %v3572_v26 = vpop.f32.mrb[21].mxu1 }
 0x90c   : > { %v4345_v20 = vadd.f32 %v3400_v52, %v3207_v13  ;;  %v4349_v27 = vadd.f32 %v3572_v26, %v3215_v14  ;;  %v3402_v28 = vpop.f32.mrb[22].mxu0  ;;  %v3574_v43 = vpop.f32.mrb[22].mxu1  ;;  %3719 = vmatpush1.bf16.msra.mxu0 %v3125_v23 }
 0x90d   : > { %4740 = vtanh.f32 %v4344_v25  ;;  %v4346_v29 = vadd.f32 %v3402_v28, %v3203_v37  ;;  %v3404_v22 = vpop.f32.mrb[23].mxu0  ;;  %v3576_v34 = vpop.f32.mrb[23].mxu1  ;;  %3720 = vmatprep.subr.bf16.mxu0 %v3133_v21  ;;  %v4350_v55 = vadd.f32 %v3574_v43, %v3211_v54 }
 0x90e   : > { %4742 = vtanh.f32 %v4348_v49  ;;  %v4347_v38 = vadd.f32 %v3404_v22, %v3207_v13  ;;  %v4351_v39 = vadd.f32 %v3576_v34, %v3215_v14 }
 0x90f   : > { %4744 = vtanh.f32 %v4345_v20 }
 0x910   : > { %4746 = vtanh.f32 %v4349_v27  ;;  %3721 = vmatpush1.bf16.msra.mxu0 %v3132_v45 }
 0x911   : > { %4748 = vtanh.f32 %v4346_v29  ;;  %3722 = vmatprep.subr.bf16.mxu0 %v3140_v35 }
 0x912   : > { %4750 = vtanh.f32 %v4350_v55 }
 0x913   : > { %4752 = vtanh.f32 %v4347_v38 }
 0x914   : > { %4754 = vtanh.f32 %v4351_v39  ;;  %3723 = vmatpush1.bf16.msra.mxu0 %v3139_v40  ;;  %v3219_v39 = vrot.slane %v5644_v11, %v5540_v31  ;;  %v3223_v40 = vrot.slane %v5644_v11, %v5543_v32 }
 0x915   : > { %3724 = vmatprep.subr.bf16.mxu0 %v3147_v50 }
 0x917   : > { %v4741_v36 = vpop.eup %4740 }
 0x918   : > { %v4743_v44 = vpop.eup %4742  ;;  %3929 = vst [vmem:[%s5387_s17] sm:$0xff] %v4741_v36  ;;  %3725 = vmatpush1.bf16.msra.mxu0 %v3146_v41 }
 0x919   : > { %v4745_v46 = vpop.eup %4744  ;;  %3931 = vst [vmem:[%s5387_s17 + $0x10] sm:$0xff] %v4743_v44  ;;  %3726 = vmatprep.subr.bf16.mxu0 %v3154_v42 }
 0x91a   : > { %v4747_v48 = vpop.eup %4746  ;;  %3930 = vst [vmem:[%s5387_s17 + $0x8] sm:$0xff] %v4745_v46 }
 0x91b   : > { %v4749_v53 = vpop.eup %4748  ;;  %3932 = vst [vmem:[%s5387_s17 + $0x18] sm:$0xff] %v4747_v48 }
 0x91c   : > { %v4751_v57 = vpop.eup %4750  ;;  %3936 = vst [vmem:[%s5387_s17 + $0x38] sm:$0xff] %v4749_v53  ;;  %3727 = vmatpush1.bf16.msra.mxu0 %v3153_v47 }
 0x91d   : > { %v4753_v58 = vpop.eup %4752  ;;  %3938 = vst [vmem:[%s5387_s17 + $0x48] sm:$0xff] %v4751_v57  ;;  %3728 = vmatprep.subr.bf16.mxu0 %v3161_v51 }
 0x91e   : > { %v4755_v7 = vpop.eup %4754  ;;  %3937 = vst [vmem:[%s5387_s17 + $0x40] sm:$0xff] %v4753_v58 }
 0x91f   : > { %3939 = vst [vmem:[%s5387_s17 + $0x50] sm:$0xff] %v4755_v7 }
 0x920   : > { %3729 = vmatpush1.bf16.msra.mxu0 %v3160_v59 }
 0x921   : > { %3730 = vmatprep.subr.bf16.mxu0 %v3168_v60 }
 0x924   : > { %3731 = vmatpush1.bf16.msra.mxu0 %v3167_v61 }
 0x925   : > { %3732 = vmatprep.subr.bf16.mxu0 %v3175_v62 }
 0x928   : > { %3733 = vmatpush1.bf16.msra.mxu0 %v3174_v63 }
 0x929   : > { %3734 = vmatprep.subr.bf16.mxu0 %v3182_v17 }
 0x92a   : > { %v4244_v1 = vpop.f32.mrb[24].mxu1 }
 0x92b   : > { %v4245_v2 = vpop.f32.mrb[25].mxu1 }
 0x92c   : > { %3735 = vmatpush1.bf16.msra.mxu0 %v3181_v0  ;;  %v4246_v3 = vadd.f32 %v4245_v2, %v4244_v1  ;;  %v4247_v5 = vpop.f32.mrb[26].mxu1 }
 0x92d   : > { %3736 = vmatprep.subr.bf16.mxu0 %v3189_v4  ;;  %v4248_v8 = vpop.f32.mrb[27].mxu1 }
 0x92e   : > { %v4249_v10 = vadd.f32 %v4248_v8, %v4247_v5  ;;  %v3786_v12 = vadd.f32 %v4246_v3, %v3227_v24 }
 0x930   : > { %3737 = vmatpush1.bf16.msra.mxu0 %v3188_v6  ;;  %v3789_v54 = vadd.f32 %v4249_v10, %v3227_v24 }
 0x931   : > { %3738 = vmatprep.subr.bf16.mxu0 %v3196_v9 }
 0x934   : > { %3739 = vmatpush1.bf16.msra.mxu0 %v3195_v16 }
 0x937   : > { %3741 = vmatmul.mubr.bf16.vlgmr.msra.gmra.mrb[24].mxu0 %v5603_v33 }
 0x94a   : > { %v4266_v30 = vpop.f32.mrb[28].mxu1 }
 0x94b   : > { %v4267_v37 = vpop.f32.mrb[29].mxu1 }
 0x94c   : > { %v4268_v13 = vadd.f32 %v4267_v37, %v4266_v30  ;;  %v4269_v14 = vpop.f32.mrb[30].mxu1 }
 0x94d   : > { %v4270_v23 = vpop.f32.mrb[31].mxu1 }
 0x94e   : > { %v3827_v15 = vadd.f32 %v4268_v13, %v3786_v12  ;;  %v4271_v18 = vadd.f32 %v4270_v23, %v4269_v14 }
 0x950   : > { %v3830_v21 = vadd.f32 %v4271_v18, %v3789_v54 }
 0x96a   : > { %v4288_v25 = vpop.f32.mrb[32].mxu1 }
 0x96b   : > { %v4289_v49 = vpop.f32.mrb[33].mxu1 }
 0x96c   : > { %v4290_v52 = vadd.f32 %v4289_v49, %v4288_v25  ;;  %v4291_v26 = vpop.f32.mrb[34].mxu1 }
 0x96d   : > { %v4292_v33 = vpop.f32.mrb[35].mxu1 }
 0x96e   : > { %v3868_v20 = vadd.f32 %v4290_v52, %v3827_v15  ;;  %v4293_v19 = vadd.f32 %v4292_v33, %v4291_v26 }
 0x970   : > { %v3871_v56 = vadd.f32 %v4293_v19, %v3830_v21 }
 0x98a   : > { %v4310_v27 = vpop.f32.mrb[36].mxu1 }
 0x98b   : > { %v4311_v28 = vpop.f32.mrb[37].mxu1 }
 0x98c   : > { %v4312_v43 = vadd.f32 %v4311_v28, %v4310_v27  ;;  %v4313_v29 = vpop.f32.mrb[38].mxu1 }
 0x98d   : > { %v4314_v22 = vpop.f32.mrb[39].mxu1 }
 0x98e   : > { %v3909_v34 = vadd.f32 %v4312_v43, %v3868_v20  ;;  %v4315_v45 = vadd.f32 %v4314_v22, %v4313_v29 }
 0x990   : > { %4756 = vtanh.f32 %v3909_v34  ;;  %v3912_v55 = vadd.f32 %v4315_v45, %v3871_v56 }
 0x992   : > { %4758 = vtanh.f32 %v3912_v55 }
 0x99a   : > { %v4757_v35 = vpop.eup %4756 }
 0x99b   : > { %3935 = vst [vmem:[%s5387_s17 + $0x30] sm:$0xff] %v4757_v35 }
 0x99c   : > { %v4759_v38 = vpop.eup %4758 }
 0x99d   : > { %3942 = vst [vmem:[%s5387_s17 + $0x68] sm:$0xff] %v4759_v38 }
 0xa0a   : > { %v3742_v50 = vpop.f32.mrb[24].mxu0 }
 0xa0b   : > { %v4352_v41 = vadd.f32 %v3742_v50, %v3219_v39  ;;  %v3744_v42 = vpop.f32.mrb[25].mxu0 }
 0xa0c   : > { %v4353_v36 = vadd.f32 %v3744_v42, %v3223_v40  ;;  %v3746_v44 = vpop.f32.mrb[26].mxu0 }
 0xa0d   : > { %4760 = vtanh.f32 %v4352_v41  ;;  %v4354_v46 = vadd.f32 %v3746_v44, %v3219_v39  ;;  %v3748_v47 = vpop.f32.mrb[27].mxu0 }
 0xa0e   : > { %4762 = vtanh.f32 %v4353_v36  ;;  %v4355_v48 = vadd.f32 %v3748_v47, %v3223_v40 }
 0xa0f   : > { %4764 = vtanh.f32 %v4354_v46 }
 0xa10   : > { %4766 = vtanh.f32 %v4355_v48 }
 0xa17   : > { %v4761_v31 = vpop.eup %4760 }
 0xa18   : > { %v4763_v32 = vpop.eup %4762  ;;  %3933 = vst [vmem:[%s5387_s17 + $0x20] sm:$0xff] %v4761_v31 }
 0xa19   : > { %v4765_v11 = vpop.eup %4764  ;;  %3934 = vst [vmem:[%s5387_s17 + $0x28] sm:$0xff] %v4763_v32 }
 0xa1a   : > { %v4767_v51 = vpop.eup %4766  ;;  %3940 = vst [vmem:[%s5387_s17 + $0x58] sm:$0xff] %v4765_v11 }
 0xa1b   : > { %3941 = vst [vmem:[%s5387_s17 + $0x60] sm:$0xff] %v4767_v51 }
 0xa1c   : > { %4977 = shalt.err (!%p4974_p8)
}
 0xa1d   : > { %s4978_s29 = scalar_lea.hbm %s5678_s22, 1792  ;;  %s4982_s8 = scalar_lea.hbm %s5739_s11, 3584 }
 0xa1e   : > { %p4979_p11 = scmp.ne.s32.totalorder %s5678_s22, %s4978_s29  ;;  %p4983_p0 = scmp.lt.u32.totalorder %s5678_s22, %s5739_s11 }
 0xa1f   : > { %p4984_p6 = scmp.lt.u32.totalorder %s4982_s8, %s4978_s29  ;;  %p4986_p9 = scmp.lt.u32.totalorder %s4978_s29, %s5678_s22 }
 0xa20   : > { %p4980_p13 = pnand %p4979_p11, %p5809_p12 }
 0xa21   : > { %p4985_p5 = por %p4984_p6, %p4983_p0 }
 0xa22   : > { %p4981_p1 = pneg %p4980_p13 }
 0xa23   : > { %p4987_p10 = por %p4986_p9, %p4985_p5 }
 0xa25   : > { %p4988_p2 = pnand %p4987_p10, %p4981_p1 }
 0xa27   : > { %4991 = shalt.err (!%p4988_p2)
}
 0xa28   : > { %s5091_s23 = smov 896   ;;  %s5092_s4 = smov 56  }
 0xa29   : > { %4504 = dma.vmem_to_hbm [thread:$0]  (%p5809_p12), %s5681_s16, 1792, %s5678_s22, %s5687_s21, %s5091_s23, %s5091_s23, %s5092_s4  }
 0xa2a PF: > { %s5810_s26 = sld [smem:[#allocation34_spill]]  ;;  %s5811_s15 = sld [smem:[#allocation38_spill]] }
 0xa2b   : > { %p4550_p3 = scmp.ge.s32.totalorder %s5054_s20, 2 }
 0xa30   : > { %s3973_s12 = sand.u32 1, %s5810_s26   ;;  %p5812_p4 = scmp.ne.s32.totalorder %s5811_s15, 0 }
 0xa31   : > { %s3974_s24 = scalar_lea.sflag [#allocation8], %s3973_s12 }
 0xa32   : > { %p4529_p7 = pnand %p4550_p3, %p5812_p4 }
 0xa34   : > { %5037 = dma.done.wait (!%p4529_p7), %s3974_s24, 1792  }
 0xa35   : > { %5039 = vsyncadd (!%p4529_p7), %s3974_s24, 4294965504  ;;  %s5813_s20 = sld [smem:[#allocation36_spill]]  ;;  %s5814_s14 = sld [smem:[#allocation35_spill]] }
 0xa36   : > { %s5815_s19 = sld [smem:[#allocation37_spill]]  ;;  %s5816_s17 = smov %s5046_s18 }
 0xa3b   : > { %p25_p8 = scmp.ge.s32.totalorder %s5813_s20, 4   ;;  %s5817_s18 = smov %s5814_s14 }
 0xa3d   :  { %27 = sbr.rel (!%p25_p8) target bundleno = 12 (0xc), region = 162 }
 0xa44   :  { %3979 = vsyncpa [#allocation7], 1 }
 0xa45   :  { %3981 = vsyncpa [#allocation7 + $0x1], 1 }
 0xa46   :  { %3982 = vsyncpa [#allocation10], 1 }
 0xa47   :  { %3983 = vsyncpa [#allocation13], 1 }
 0xa48   :  { %3984 = vsyncpa [#allocation16], 1 }
 0xa49   :  { %3985 = vsyncpa [#allocation8], 1 }
 0xa4a   :  { %3987 = vsyncpa [#allocation8 + $0x1], 1 }
 0xa4b   :  { %3988 = vsyncmov [#allocation5] }
 0xa4e   :  { %s3989_s27 = vpop.sfrf %3988 }
 0xa4f   :  { %p4225_p12 = scmp.ne.s32.totalorder %s3989_s27, 0 }
 0xa51   :  { %3993 = shalt.err (%p4225_p12)  }
 0xa52   :  { %3995 = vsyncmov [#allocation5 + $0x1] }
 0xa55   :  { %s3996_s16 = vpop.sfrf %3995 }
 0xa56   :  { %p4226_p11 = scmp.ne.s32.totalorder %s3996_s16, 0 }
 0xa58   :  { %4000 = shalt.err (%p4226_p11)  }
 0xa59   :  { %4002 = vsyncmov [#allocation5 + $0x2] }
 0xa5c   :  { %s4003_s22 = vpop.sfrf %4002 }
 0xa5d   :  { %p4227_p13 = scmp.ne.s32.totalorder %s4003_s22, 0 }
 0xa5f   :  { %4007 = shalt.err (%p4227_p13)  }

</bundles_post_ra>
